<compile_context>
chip_gen: v7x
topology: tpu7x:2x2x1
jax: 0.10.0
libtpu: 0.0.40
codegen_flags: <defaults>
</compile_context>

<pallas_src>
import functools
import math

import jax
import jax.numpy as jnp
from jax.experimental import pallas as pl
from jax.experimental.pallas import tpu as pltpu

# ---------------- small synthetic config (shapes consistent with a BERT forward) ----------
VOCAB = 100
HIDDEN = 32
HEADS = 4
HEAD_DIM = HIDDEN // HEADS
LAYERS = 2
INTERMEDIATE = 64
MAX_POS = 32
N_CLASSES = 3
LN_EPS = 1e-12
FC_PAD = 128            # lane-dense slab width for the tiny classifier output
B, S = 2, 8

_MXU_DTYPE = jnp.bfloat16   # matmul-input dtype; accumulation is always f32


# ---------------- the fused whole-model kernel ---------------------------------------------
def _visobert_kernel(
    x_ref, mask_ref, eg_ref, eb_ref,
    wq_ref, bq_ref, wk_ref, bk_ref, wv_ref, bv_ref,
    wo_ref, bo_ref, ln1g_ref, ln1b_ref,
    w1_ref, b1_ref, w2_ref, b2_ref, ln2g_ref, ln2b_ref,
    pw_ref, pb_ref, fw_ref, fb_ref,
    o_ref,
    *, n_layers, n_heads, batch, seq,
):
    """Embedding LN -> n_layers x (MHA + FFN, post-LN) -> pooler tanh -> classifier.
    Everything stays resident in VMEM; f32 elementwise math, bf16 MXU inputs."""

    def layer_norm(y, g, b):
        mean = jnp.mean(y, axis=-1, keepdims=True)
        c = y - mean
        var = jnp.mean(c * c, axis=-1, keepdims=True)
        return c * jax.lax.rsqrt(var + LN_EPS) * g + b

    rows = batch * seq
    mask = mask_ref[...]                                       # (B, 1, S) additive key mask

    # --- embedding LayerNorm fused as the kernel prologue
    x = layer_norm(x_ref[...], eg_ref[...], eb_ref[...])       # (R, HIDDEN) f32

    # --- transformer layers (static unroll; all weights live in VMEM across the whole kernel)
    for l in range(n_layers):
        xb = x.astype(_MXU_DTYPE)
        attn = jnp.zeros((rows, HIDDEN), jnp.float32)
        for h in range(n_heads):
            # per-head projections via static leading-dim ref indexing (no lane slicing)
            q = jnp.dot(xb, wq_ref[l, h], preferred_element_type=jnp.float32) + bq_ref[l, h]
            k = jnp.dot(xb, wk_ref[l, h], preferred_element_type=jnp.float32) + bk_ref[l, h]
            v = jnp.dot(xb, wv_ref[l, h], preferred_element_type=jnp.float32) + bv_ref[l, h]
            # (R, D) -> (B, S, D): leading-dim-only reshape (minor dim unchanged)
            qb = q.reshape(batch, seq, HEAD_DIM).astype(_MXU_DTYPE)
            kb = k.reshape(batch, seq, HEAD_DIM).astype(_MXU_DTYPE)
            vb = v.reshape(batch, seq, HEAD_DIM).astype(_MXU_DTYPE)

            s_att = jnp.einsum("bqd,bkd->bqk", qb, kb,
                               preferred_element_type=jnp.float32) + mask     # (B, S, S)
            m = jnp.max(s_att, axis=-1, keepdims=True)
            p = jnp.exp(s_att - m)                                            # f32 softmax
            inv_l = pl.reciprocal(jnp.sum(p, axis=-1, keepdims=True), approx=True)
            ctx = jnp.einsum("bqk,bkd->bqd", p.astype(_MXU_DTYPE), vb,
                             preferred_element_type=jnp.float32) * inv_l      # (B, S, D)

            # fold head-h context straight into the output projection: sum_h ctx_h @ Wo_h
            attn = attn + jnp.dot(ctx.reshape(rows, HEAD_DIM).astype(_MXU_DTYPE),
                                  wo_ref[l, h], preferred_element_type=jnp.float32)

        # attention out-proj bias + residual + post-LN
        x = layer_norm(attn + bo_ref[l] + x, ln1g_ref[l], ln1b_ref[l])

        # FFN: gelu dense, second dense + residual + post-LN
        # TODO(synk): HF BERT uses erf-gelu; tanh-approx gelu used for robust TPU lowering.
        h1 = jax.nn.gelu(
            jnp.dot(x.astype(_MXU_DTYPE), w1_ref[l], preferred_element_type=jnp.float32)
            + b1_ref[l], approximate=True)
        y2 = jnp.dot(h1.astype(_MXU_DTYPE), w2_ref[l], preferred_element_type=jnp.float32)
        x = layer_norm(y2 + b2_ref[l] + x, ln2g_ref[l], ln2b_ref[l])

    # --- pooler(tanh) + Dropout(p=0.3, eval-mode identity) + classifier
    # TODO(synk): computed for all R rows (trivial at these dims) so the kernel never has to
    # gather the CLS rows in VMEM; the wrapper slices row 0 of each sequence afterwards.
    pooled = jnp.tanh(jnp.dot(x.astype(_MXU_DTYPE), pw_ref[...],
                              preferred_element_type=jnp.float32) + pb_ref[...])
    o_ref[...] = jnp.dot(pooled.astype(_MXU_DTYPE), fw_ref[...],
                         preferred_element_type=jnp.float32) + fb_ref[...]     # (R, 128)


# ---------------- pallas_call wrapper -------------------------------------------------------
def visobert_forward(params, input_ids, attention_mask):
    b, s = input_ids.shape
    r = b * s

    # embedding lookups are tiny gathers, kept as XLA glue feeding the fused kernel
    x = (params["word_emb"][input_ids]
         + params["pos_emb"][jnp.arange(s)][None, :, :]
         + params["type_emb"][0][None, None, :]).reshape(r, HIDDEN)
    # additive key-mask bias, tiny (B, 1, S); broadcast to (B, S, S) inside the kernel
    mask_bias = ((1.0 - attention_mask.astype(jnp.float32)) * (-1e9))[:, None, :]

    operands = (
        x, mask_bias, params["emb_ln_g"], params["emb_ln_b"],
        params["w_q"], params["b_q"], params["w_k"], params["b_k"],
        params["w_v"], params["b_v"],
        params["w_o"], params["b_o"], params["ln1_g"], params["ln1_b"],
        params["w_1"], params["b_1"], params["w_2"], params["b_2"],
        params["ln2_g"], params["ln2_b"],
        params["pool_w"], params["pool_b"], params["fc_w_pad"], params["fc_b_pad"],
    )

    def full_spec(a):
        zeros = (0,) * a.ndim
        return pl.BlockSpec(a.shape, lambda i, _z=zeros: _z)

    logits_pad = pl.pallas_call(
        functools.partial(_visobert_kernel, n_layers=LAYERS, n_heads=HEADS, batch=b, seq=s),
        out_shape=jax.ShapeDtypeStruct((r, FC_PAD), jnp.float32),
        grid=(1,),
        in_specs=[full_spec(a) for a in operands],
        out_specs=pl.BlockSpec((r, FC_PAD), lambda i: (0, 0)),
        compiler_params=pltpu.CompilerParams(dimension_semantics=("arbitrary",)),
    )(*operands)

    # CLS row of each sequence, real classes only (slab was padded to 128 lanes for the store)
    return logits_pad.reshape(b, s, FC_PAD)[:, 0, :N_CLASSES]


# ---------------- deterministic parameter init ----------------------------------------------
def init_params(key):
    keys = iter(jax.random.split(key, 8 + 8 * LAYERS))

    def nrm(shape, std=0.02):
        return std * jax.random.normal(next(keys), shape, jnp.float32)

    scale = 1.0 / math.sqrt(HEAD_DIM)

    def split_heads_out(w):     # (HIDDEN, HIDDEN) -> (HEADS, HIDDEN, HEAD_DIM)
        return w.reshape(HIDDEN, HEADS, HEAD_DIM).transpose(1, 0, 2)

    wq, wk, wv, wo = [], [], [], []
    w1, w2 = [], []
    for _ in range(LAYERS):
        # 1/sqrt(head_dim) folded into the Q weights (Q biases are zero so no bias scaling
        # needed here; keep the scaling on the bias too when porting real checkpoint weights).
        wq.append(split_heads_out(nrm((HIDDEN, HIDDEN)) * scale))
        wk.append(split_heads_out(nrm((HIDDEN, HIDDEN))))
        wv.append(split_heads_out(nrm((HIDDEN, HIDDEN))))
        wo.append(nrm((HIDDEN, HIDDEN)).reshape(HEADS, HEAD_DIM, HIDDEN))
        w1.append(nrm((HIDDEN, INTERMEDIATE)))
        w2.append(nrm((INTERMEDIATE, HIDDEN)))

    zeros_h = jnp.zeros((LAYERS, HEADS, 1, HEAD_DIM), jnp.float32)
    ones_ln = jnp.ones((LAYERS, 1, HIDDEN), jnp.float32)
    zeros_ln = jnp.zeros((LAYERS, 1, HIDDEN), jnp.float32)

    # fc head: nn.init.normal_(weight, std=0.02); nn.init.normal_(bias)  (std defaults to 1.0)
    fc_w = nrm((HIDDEN, N_CLASSES), std=0.02)
    fc_b = nrm((N_CLASSES,), std=1.0)

    params = {
        "word_emb": nrm((VOCAB, HIDDEN)),
        "pos_emb": nrm((MAX_POS, HIDDEN)),
        "type_emb": nrm((2, HIDDEN)),
        "emb_ln_g": jnp.ones((1, HIDDEN), jnp.float32),
        "emb_ln_b": jnp.zeros((1, HIDDEN), jnp.float32),
        # per-head stacked projection weights: (L, HEADS, HIDDEN, D) / (L, HEADS, D, HIDDEN)
        "w_q": jnp.stack(wq).astype(_MXU_DTYPE),
        "b_q": zeros_h,
        "w_k": jnp.stack(wk).astype(_MXU_DTYPE),
        "b_k": zeros_h,
        "w_v": jnp.stack(wv).astype(_MXU_DTYPE),
        "b_v": zeros_h,
        "w_o": jnp.stack(wo).astype(_MXU_DTYPE),
        "b_o": zeros_ln,
        "ln1_g": ones_ln, "ln1_b": zeros_ln,
        "w_1": jnp.stack(w1).astype(_MXU_DTYPE),
        "b_1": jnp.zeros((LAYERS, 1, INTERMEDIATE), jnp.float32),
        "w_2": jnp.stack(w2).astype(_MXU_DTYPE),
        "b_2": zeros_ln,
        "ln2_g": ones_ln, "ln2_b": zeros_ln,
        "pool_w": nrm((HIDDEN, HIDDEN)).astype(_MXU_DTYPE),
        "pool_b": jnp.zeros((1, HIDDEN), jnp.float32),
        # lane-dense 128-wide padded classifier slab -> full (unmasked) vector stores
        "fc_w_pad": (jnp.zeros((HIDDEN, FC_PAD), jnp.float32)
                     .at[:, :N_CLASSES].set(fc_w).astype(_MXU_DTYPE)),
        "fc_b_pad": jnp.zeros((1, FC_PAD), jnp.float32).at[0, :N_CLASSES].set(fc_b),
    }
    return params


if __name__ == "__main__":
    key = jax.random.PRNGKey(0)
    k_param, k_ids = jax.random.split(key)
    params = init_params(k_param)

    input_ids = jax.random.randint(k_ids, (B, S), 0, VOCAB, dtype=jnp.int32)
    attention_mask = jnp.ones((B, S), jnp.int32).at[1, S - 2:].set(0)  # pad tail of sample 1

    fwd = jax.jit(visobert_forward)
    logits = fwd(params, input_ids, attention_mask)
    jax.block_until_ready(logits)
    assert logits.shape == (B, N_CLASSES)
    print("KERNEL_OK")
</pallas_src>

<mosaic_0001>
module attributes {stable_mosaic.version = 11 : i64} {
  func.func @_visobert_kernel(%arg0: i32, %arg1: memref<16x32xf32, #tpu.memory_space<vmem>>, %arg2: memref<2x1x8xf32, #tpu.memory_space<vmem>>, %arg3: memref<1x32xf32, #tpu.memory_space<vmem>>, %arg4: memref<1x32xf32, #tpu.memory_space<vmem>>, %arg5: memref<2x4x32x8xbf16, #tpu.memory_space<vmem>>, %arg6: memref<2x4x1x8xf32, #tpu.memory_space<vmem>>, %arg7: memref<2x4x32x8xbf16, #tpu.memory_space<vmem>>, %arg8: memref<2x4x1x8xf32, #tpu.memory_space<vmem>>, %arg9: memref<2x4x32x8xbf16, #tpu.memory_space<vmem>>, %arg10: memref<2x4x1x8xf32, #tpu.memory_space<vmem>>, %arg11: memref<2x4x8x32xbf16, #tpu.memory_space<vmem>>, %arg12: memref<2x1x32xf32, #tpu.memory_space<vmem>>, %arg13: memref<2x1x32xf32, #tpu.memory_space<vmem>>, %arg14: memref<2x1x32xf32, #tpu.memory_space<vmem>>, %arg15: memref<2x32x64xbf16, #tpu.memory_space<vmem>>, %arg16: memref<2x1x64xf32, #tpu.memory_space<vmem>>, %arg17: memref<2x64x32xbf16, #tpu.memory_space<vmem>>, %arg18: memref<2x1x32xf32, #tpu.memory_space<vmem>>, %arg19: memref<2x1x32xf32, #tpu.memory_space<vmem>>, %arg20: memref<2x1x32xf32, #tpu.memory_space<vmem>>, %arg21: memref<32x32xbf16, #tpu.memory_space<vmem>>, %arg22: memref<1x32xf32, #tpu.memory_space<vmem>>, %arg23: memref<32x128xbf16, #tpu.memory_space<vmem>>, %arg24: memref<1x128xf32, #tpu.memory_space<vmem>>, %arg25: memref<16x128xf32, #tpu.memory_space<vmem>>) attributes {dimension_semantics = [#tpu.dimension_semantics<arbitrary>], iteration_bounds = array<i64: 1>, scalar_prefetch = 0 : i64, scratch_operands = 0 : i64, tpu.core_type = #tpu.core_type<tc>, window_params = [{pipeline_mode = #tpu.pipeline_mode<synchronous>, transform_indices = @transform_0, window_bounds = array<i64: 16, 32>}, {pipeline_mode = #tpu.pipeline_mode<synchronous>, transform_indices = @transform_1, window_bounds = array<i64: 2, 1, 8>}, {pipeline_mode = #tpu.pipeline_mode<synchronous>, transform_indices = @transform_2, window_bounds = array<i64: 1, 32>}, {pipeline_mode = #tpu.pipeline_mode<synchronous>, transform_indices = @transform_3, window_bounds = array<i64: 1, 32>}, {pipeline_mode = #tpu.pipeline_mode<synchronous>, transform_indices = @transform_4, window_bounds = array<i64: 2, 4, 32, 8>}, {pipeline_mode = #tpu.pipeline_mode<synchronous>, transform_indices = @transform_5, window_bounds = array<i64: 2, 4, 1, 8>}, {pipeline_mode = #tpu.pipeline_mode<synchronous>, transform_indices = @transform_6, window_bounds = array<i64: 2, 4, 32, 8>}, {pipeline_mode = #tpu.pipeline_mode<synchronous>, transform_indices = @transform_7, window_bounds = array<i64: 2, 4, 1, 8>}, {pipeline_mode = #tpu.pipeline_mode<synchronous>, transform_indices = @transform_8, window_bounds = array<i64: 2, 4, 32, 8>}, {pipeline_mode = #tpu.pipeline_mode<synchronous>, transform_indices = @transform_9, window_bounds = array<i64: 2, 4, 1, 8>}, {pipeline_mode = #tpu.pipeline_mode<synchronous>, transform_indices = @transform_10, window_bounds = array<i64: 2, 4, 8, 32>}, {pipeline_mode = #tpu.pipeline_mode<synchronous>, transform_indices = @transform_11, window_bounds = array<i64: 2, 1, 32>}, {pipeline_mode = #tpu.pipeline_mode<synchronous>, transform_indices = @transform_12, window_bounds = array<i64: 2, 1, 32>}, {pipeline_mode = #tpu.pipeline_mode<synchronous>, transform_indices = @transform_13, window_bounds = array<i64: 2, 1, 32>}, {pipeline_mode = #tpu.pipeline_mode<synchronous>, transform_indices = @transform_14, window_bounds = array<i64: 2, 32, 64>}, {pipeline_mode = #tpu.pipeline_mode<synchronous>, transform_indices = @transform_15, window_bounds = array<i64: 2, 1, 64>}, {pipeline_mode = #tpu.pipeline_mode<synchronous>, transform_indices = @transform_16, window_bounds = array<i64: 2, 64, 32>}, {pipeline_mode = #tpu.pipeline_mode<synchronous>, transform_indices = @transform_17, window_bounds = array<i64: 2, 1, 32>}, {pipeline_mode = #tpu.pipeline_mode<synchronous>, transform_indices = @transform_18, window_bounds = array<i64: 2, 1, 32>}, {pipeline_mode = #tpu.pipeline_mode<synchronous>, transform_indices = @transform_19, window_bounds = array<i64: 2, 1, 32>}, {pipeline_mode = #tpu.pipeline_mode<synchronous>, transform_indices = @transform_20, window_bounds = array<i64: 32, 32>}, {pipeline_mode = #tpu.pipeline_mode<synchronous>, transform_indices = @transform_21, window_bounds = array<i64: 1, 32>}, {pipeline_mode = #tpu.pipeline_mode<synchronous>, transform_indices = @transform_22, window_bounds = array<i64: 32, 128>}, {pipeline_mode = #tpu.pipeline_mode<synchronous>, transform_indices = @transform_23, window_bounds = array<i64: 1, 128>}, {pipeline_mode = #tpu.pipeline_mode<synchronous>, transform_indices = @transform_24, window_bounds = array<i64: 16, 128>}]} {
    %c0 = arith.constant 0 : index
    %c0_0 = arith.constant 0 : index
    %c0_1 = arith.constant 0 : index
    %0 = vector.load %arg2[%c0, %c0_0, %c0_1] : memref<2x1x8xf32, #tpu.memory_space<vmem>>, vector<2x1x8xf32>
    %c0_2 = arith.constant 0 : index
    %c0_3 = arith.constant 0 : index
    %1 = vector.load %arg1[%c0_2, %c0_3] : memref<16x32xf32, #tpu.memory_space<vmem>>, vector<16x32xf32>
    %c0_4 = arith.constant 0 : index
    %c0_5 = arith.constant 0 : index
    %2 = vector.load %arg3[%c0_4, %c0_5] : memref<1x32xf32, #tpu.memory_space<vmem>>, vector<1x32xf32>
    %c0_6 = arith.constant 0 : index
    %c0_7 = arith.constant 0 : index
    %3 = vector.load %arg4[%c0_6, %c0_7] : memref<1x32xf32, #tpu.memory_space<vmem>>, vector<1x32xf32>
    %cst = arith.constant dense<0.000000e+00> : vector<16xf32>
    %4 = vector.multi_reduction <add>, %1, %cst [1] : vector<16x32xf32> to vector<16xf32>
    %5 = vector.shape_cast %4 : vector<16xf32> to vector<16x1xf32>
    %cst_8 = arith.constant 3.200000e+01 : f32
    %6 = vector.broadcast %cst_8 : f32 to vector<16x1xf32>
    %7 = arith.divf %5, %6 : vector<16x1xf32>
    %8 = vector.broadcast %7 : vector<16x1xf32> to vector<16x32xf32>
    %9 = arith.subf %1, %8 : vector<16x32xf32>
    %10 = arith.mulf %9, %9 : vector<16x32xf32>
    %cst_9 = arith.constant dense<0.000000e+00> : vector<16xf32>
    %11 = vector.multi_reduction <add>, %10, %cst_9 [1] : vector<16x32xf32> to vector<16xf32>
    %12 = vector.shape_cast %11 : vector<16xf32> to vector<16x1xf32>
    %cst_10 = arith.constant 3.200000e+01 : f32
    %13 = vector.broadcast %cst_10 : f32 to vector<16x1xf32>
    %14 = arith.divf %12, %13 : vector<16x1xf32>
    %cst_11 = arith.constant 9.99999996E-13 : f32
    %15 = vector.broadcast %cst_11 : f32 to vector<16x1xf32>
    %16 = arith.addf %14, %15 : vector<16x1xf32>
    %17 = math.rsqrt %16 : vector<16x1xf32>
    %18 = vector.broadcast %17 : vector<16x1xf32> to vector<16x32xf32>
    %19 = arith.mulf %9, %18 : vector<16x32xf32>
    %20 = vector.broadcast %2 : vector<1x32xf32> to vector<16x32xf32>
    %21 = arith.mulf %19, %20 : vector<16x32xf32>
    %22 = vector.broadcast %3 : vector<1x32xf32> to vector<16x32xf32>
    %23 = arith.addf %21, %22 : vector<16x32xf32>
    %24 = arith.truncf %23 : vector<16x32xf32> to vector<16x32xbf16>
    %cst_12 = arith.constant 0.000000e+00 : f32
    %25 = vector.broadcast %cst_12 : f32 to vector<16x32xf32>
    %c0_13 = arith.constant 0 : index
    %c0_14 = arith.constant 0 : index
    %c0_15 = arith.constant 0 : index
    %c0_16 = arith.constant 0 : index
    %26 = vector.load %arg5[%c0_13, %c0_14, %c0_15, %c0_16] : memref<2x4x32x8xbf16, #tpu.memory_space<vmem>>, vector<1x1x32x8xbf16>
    %27 = vector.shape_cast %26 : vector<1x1x32x8xbf16> to vector<32x8xbf16>
    %cst_17 = arith.constant dense<0.000000e+00> : vector<16x8xf32>
    %28 = tpu.matmul %24, %27, %cst_17 {dimension_numbers = #tpu.dot_dimension_numbers<[1], [0], [0], [1], [0, 0, 1, 1], [], []>} : vector<16x32xbf16>, vector<32x8xbf16>, vector<16x8xf32> -> vector<16x8xf32>
    %c0_18 = arith.constant 0 : index
    %c0_19 = arith.constant 0 : index
    %c0_20 = arith.constant 0 : index
    %c0_21 = arith.constant 0 : index
    %29 = vector.load %arg6[%c0_18, %c0_19, %c0_20, %c0_21] : memref<2x4x1x8xf32, #tpu.memory_space<vmem>>, vector<1x1x1x8xf32>
    %30 = vector.shape_cast %29 : vector<1x1x1x8xf32> to vector<1x8xf32>
    %31 = vector.broadcast %30 : vector<1x8xf32> to vector<16x8xf32>
    %32 = arith.addf %28, %31 : vector<16x8xf32>
    %c0_22 = arith.constant 0 : index
    %c0_23 = arith.constant 0 : index
    %c0_24 = arith.constant 0 : index
    %c0_25 = arith.constant 0 : index
    %33 = vector.load %arg7[%c0_22, %c0_23, %c0_24, %c0_25] : memref<2x4x32x8xbf16, #tpu.memory_space<vmem>>, vector<1x1x32x8xbf16>
    %34 = vector.shape_cast %33 : vector<1x1x32x8xbf16> to vector<32x8xbf16>
    %cst_26 = arith.constant dense<0.000000e+00> : vector<16x8xf32>
    %35 = tpu.matmul %24, %34, %cst_26 {dimension_numbers = #tpu.dot_dimension_numbers<[1], [0], [0], [1], [0, 0, 1, 1], [], []>} : vector<16x32xbf16>, vector<32x8xbf16>, vector<16x8xf32> -> vector<16x8xf32>
    %c0_27 = arith.constant 0 : index
    %c0_28 = arith.constant 0 : index
    %c0_29 = arith.constant 0 : index
    %c0_30 = arith.constant 0 : index
    %36 = vector.load %arg8[%c0_27, %c0_28, %c0_29, %c0_30] : memref<2x4x1x8xf32, #tpu.memory_space<vmem>>, vector<1x1x1x8xf32>
    %37 = vector.shape_cast %36 : vector<1x1x1x8xf32> to vector<1x8xf32>
    %38 = vector.broadcast %37 : vector<1x8xf32> to vector<16x8xf32>
    %39 = arith.addf %35, %38 : vector<16x8xf32>
    %c0_31 = arith.constant 0 : index
    %c0_32 = arith.constant 0 : index
    %c0_33 = arith.constant 0 : index
    %c0_34 = arith.constant 0 : index
    %40 = vector.load %arg9[%c0_31, %c0_32, %c0_33, %c0_34] : memref<2x4x32x8xbf16, #tpu.memory_space<vmem>>, vector<1x1x32x8xbf16>
    %41 = vector.shape_cast %40 : vector<1x1x32x8xbf16> to vector<32x8xbf16>
    %cst_35 = arith.constant dense<0.000000e+00> : vector<16x8xf32>
    %42 = tpu.matmul %24, %41, %cst_35 {dimension_numbers = #tpu.dot_dimension_numbers<[1], [0], [0], [1], [0, 0, 1, 1], [], []>} : vector<16x32xbf16>, vector<32x8xbf16>, vector<16x8xf32> -> vector<16x8xf32>
    %c0_36 = arith.constant 0 : index
    %c0_37 = arith.constant 0 : index
    %c0_38 = arith.constant 0 : index
    %c0_39 = arith.constant 0 : index
    %43 = vector.load %arg10[%c0_36, %c0_37, %c0_38, %c0_39] : memref<2x4x1x8xf32, #tpu.memory_space<vmem>>, vector<1x1x1x8xf32>
    %44 = vector.shape_cast %43 : vector<1x1x1x8xf32> to vector<1x8xf32>
    %45 = vector.broadcast %44 : vector<1x8xf32> to vector<16x8xf32>
    %46 = arith.addf %42, %45 : vector<16x8xf32>
    %47 = vector.shape_cast %32 : vector<16x8xf32> to vector<2x8x8xf32>
    %48 = arith.truncf %47 : vector<2x8x8xf32> to vector<2x8x8xbf16>
    %49 = vector.shape_cast %39 : vector<16x8xf32> to vector<2x8x8xf32>
    %50 = arith.truncf %49 : vector<2x8x8xf32> to vector<2x8x8xbf16>
    %51 = vector.shape_cast %46 : vector<16x8xf32> to vector<2x8x8xf32>
    %52 = arith.truncf %51 : vector<2x8x8xf32> to vector<2x8x8xbf16>
    "tpu.trace_start"() <{level = 10 : i32, message = "bqd,bkd->bqk"}> : () -> ()
    %cst_40 = arith.constant dense<0.000000e+00> : vector<2x8x8xf32>
    %53 = tpu.matmul %48, %50, %cst_40 {dimension_numbers = #tpu.dot_dimension_numbers<[2], [2], [1], [1], [0, 0, 0, 1, 1, 1], [0], [0]>} : vector<2x8x8xbf16>, vector<2x8x8xbf16>, vector<2x8x8xf32> -> vector<2x8x8xf32>
    "tpu.trace_stop"() : () -> ()
    %54 = vector.broadcast %0 : vector<2x1x8xf32> to vector<2x8x8xf32>
    %55 = arith.addf %53, %54 : vector<2x8x8xf32>
    %cst_41 = arith.constant dense<0xFF800000> : vector<2x8xf32>
    %56 = vector.multi_reduction <maximumf>, %55, %cst_41 [2] : vector<2x8x8xf32> to vector<2x8xf32>
    %57 = vector.shape_cast %56 : vector<2x8xf32> to vector<2x8x1xf32>
    %58 = vector.broadcast %57 : vector<2x8x1xf32> to vector<2x8x8xf32>
    %59 = arith.subf %55, %58 : vector<2x8x8xf32>
    %60 = math.exp %59 : vector<2x8x8xf32>
    %cst_42 = arith.constant dense<0.000000e+00> : vector<2x8xf32>
    %61 = vector.multi_reduction <add>, %60, %cst_42 [2] : vector<2x8x8xf32> to vector<2x8xf32>
    %62 = vector.shape_cast %61 : vector<2x8xf32> to vector<2x8x1xf32>
    %63 = tpu.reciprocal %62 {approx = true} : vector<2x8x1xf32> -> vector<2x8x1xf32>
    %64 = arith.truncf %60 : vector<2x8x8xf32> to vector<2x8x8xbf16>
    "tpu.trace_start"() <{level = 10 : i32, message = "bqk,bkd->bqd"}> : () -> ()
    %cst_43 = arith.constant dense<0.000000e+00> : vector<2x8x8xf32>
    %65 = tpu.matmul %64, %52, %cst_43 {dimension_numbers = #tpu.dot_dimension_numbers<[2], [1], [1], [2], [0, 0, 0, 1, 1, 2], [0], [0]>} : vector<2x8x8xbf16>, vector<2x8x8xbf16>, vector<2x8x8xf32> -> vector<2x8x8xf32>
    "tpu.trace_stop"() : () -> ()
    %66 = vector.broadcast %63 : vector<2x8x1xf32> to vector<2x8x8xf32>
    %67 = arith.mulf %65, %66 : vector<2x8x8xf32>
    %68 = vector.shape_cast %67 : vector<2x8x8xf32> to vector<16x8xf32>
    %69 = arith.truncf %68 : vector<16x8xf32> to vector<16x8xbf16>
    %c0_44 = arith.constant 0 : index
    %c0_45 = arith.constant 0 : index
    %c0_46 = arith.constant 0 : index
    %c0_47 = arith.constant 0 : index
    %70 = vector.load %arg11[%c0_44, %c0_45, %c0_46, %c0_47] : memref<2x4x8x32xbf16, #tpu.memory_space<vmem>>, vector<1x1x8x32xbf16>
    %71 = vector.shape_cast %70 : vector<1x1x8x32xbf16> to vector<8x32xbf16>
    %cst_48 = arith.constant dense<0.000000e+00> : vector<16x32xf32>
    %72 = tpu.matmul %69, %71, %cst_48 {dimension_numbers = #tpu.dot_dimension_numbers<[1], [0], [0], [1], [0, 0, 1, 1], [], []>} : vector<16x8xbf16>, vector<8x32xbf16>, vector<16x32xf32> -> vector<16x32xf32>
    %73 = arith.addf %25, %72 : vector<16x32xf32>
    %c0_49 = arith.constant 0 : index
    %c1 = arith.constant 1 : index
    %c0_50 = arith.constant 0 : index
    %c0_51 = arith.constant 0 : index
    %74 = vector.load %arg5[%c0_49, %c1, %c0_50, %c0_51] : memref<2x4x32x8xbf16, #tpu.memory_space<vmem>>, vector<1x1x32x8xbf16>
    %75 = vector.shape_cast %74 : vector<1x1x32x8xbf16> to vector<32x8xbf16>
    %cst_52 = arith.constant dense<0.000000e+00> : vector<16x8xf32>
    %76 = tpu.matmul %24, %75, %cst_52 {dimension_numbers = #tpu.dot_dimension_numbers<[1], [0], [0], [1], [0, 0, 1, 1], [], []>} : vector<16x32xbf16>, vector<32x8xbf16>, vector<16x8xf32> -> vector<16x8xf32>
    %c0_53 = arith.constant 0 : index
    %c1_54 = arith.constant 1 : index
    %c0_55 = arith.constant 0 : index
    %c0_56 = arith.constant 0 : index
    %77 = vector.load %arg6[%c0_53, %c1_54, %c0_55, %c0_56] : memref<2x4x1x8xf32, #tpu.memory_space<vmem>>, vector<1x1x1x8xf32>
    %78 = vector.shape_cast %77 : vector<1x1x1x8xf32> to vector<1x8xf32>
    %79 = vector.broadcast %78 : vector<1x8xf32> to vector<16x8xf32>
    %80 = arith.addf %76, %79 : vector<16x8xf32>
    %c0_57 = arith.constant 0 : index
    %c1_58 = arith.constant 1 : index
    %c0_59 = arith.constant 0 : index
    %c0_60 = arith.constant 0 : index
    %81 = vector.load %arg7[%c0_57, %c1_58, %c0_59, %c0_60] : memref<2x4x32x8xbf16, #tpu.memory_space<vmem>>, vector<1x1x32x8xbf16>
    %82 = vector.shape_cast %81 : vector<1x1x32x8xbf16> to vector<32x8xbf16>
    %cst_61 = arith.constant dense<0.000000e+00> : vector<16x8xf32>
    %83 = tpu.matmul %24, %82, %cst_61 {dimension_numbers = #tpu.dot_dimension_numbers<[1], [0], [0], [1], [0, 0, 1, 1], [], []>} : vector<16x32xbf16>, vector<32x8xbf16>, vector<16x8xf32> -> vector<16x8xf32>
    %c0_62 = arith.constant 0 : index
    %c1_63 = arith.constant 1 : index
    %c0_64 = arith.constant 0 : index
    %c0_65 = arith.constant 0 : index
    %84 = vector.load %arg8[%c0_62, %c1_63, %c0_64, %c0_65] : memref<2x4x1x8xf32, #tpu.memory_space<vmem>>, vector<1x1x1x8xf32>
    %85 = vector.shape_cast %84 : vector<1x1x1x8xf32> to vector<1x8xf32>
    %86 = vector.broadcast %85 : vector<1x8xf32> to vector<16x8xf32>
    %87 = arith.addf %83, %86 : vector<16x8xf32>
    %c0_66 = arith.constant 0 : index
    %c1_67 = arith.constant 1 : index
    %c0_68 = arith.constant 0 : index
    %c0_69 = arith.constant 0 : index
    %88 = vector.load %arg9[%c0_66, %c1_67, %c0_68, %c0_69] : memref<2x4x32x8xbf16, #tpu.memory_space<vmem>>, vector<1x1x32x8xbf16>
    %89 = vector.shape_cast %88 : vector<1x1x32x8xbf16> to vector<32x8xbf16>
    %cst_70 = arith.constant dense<0.000000e+00> : vector<16x8xf32>
    %90 = tpu.matmul %24, %89, %cst_70 {dimension_numbers = #tpu.dot_dimension_numbers<[1], [0], [0], [1], [0, 0, 1, 1], [], []>} : vector<16x32xbf16>, vector<32x8xbf16>, vector<16x8xf32> -> vector<16x8xf32>
    %c0_71 = arith.constant 0 : index
    %c1_72 = arith.constant 1 : index
    %c0_73 = arith.constant 0 : index
    %c0_74 = arith.constant 0 : index
    %91 = vector.load %arg10[%c0_71, %c1_72, %c0_73, %c0_74] : memref<2x4x1x8xf32, #tpu.memory_space<vmem>>, vector<1x1x1x8xf32>
    %92 = vector.shape_cast %91 : vector<1x1x1x8xf32> to vector<1x8xf32>
    %93 = vector.broadcast %92 : vector<1x8xf32> to vector<16x8xf32>
    %94 = arith.addf %90, %93 : vector<16x8xf32>
    %95 = vector.shape_cast %80 : vector<16x8xf32> to vector<2x8x8xf32>
    %96 = arith.truncf %95 : vector<2x8x8xf32> to vector<2x8x8xbf16>
    %97 = vector.shape_cast %87 : vector<16x8xf32> to vector<2x8x8xf32>
    %98 = arith.truncf %97 : vector<2x8x8xf32> to vector<2x8x8xbf16>
    %99 = vector.shape_cast %94 : vector<16x8xf32> to vector<2x8x8xf32>
    %100 = arith.truncf %99 : vector<2x8x8xf32> to vector<2x8x8xbf16>
    "tpu.trace_start"() <{level = 10 : i32, message = "bqd,bkd->bqk"}> : () -> ()
    %cst_75 = arith.constant dense<0.000000e+00> : vector<2x8x8xf32>
    %101 = tpu.matmul %96, %98, %cst_75 {dimension_numbers = #tpu.dot_dimension_numbers<[2], [2], [1], [1], [0, 0, 0, 1, 1, 1], [0], [0]>} : vector<2x8x8xbf16>, vector<2x8x8xbf16>, vector<2x8x8xf32> -> vector<2x8x8xf32>
    "tpu.trace_stop"() : () -> ()
    %102 = vector.broadcast %0 : vector<2x1x8xf32> to vector<2x8x8xf32>
    %103 = arith.addf %101, %102 : vector<2x8x8xf32>
    %cst_76 = arith.constant dense<0xFF800000> : vector<2x8xf32>
    %104 = vector.multi_reduction <maximumf>, %103, %cst_76 [2] : vector<2x8x8xf32> to vector<2x8xf32>
    %105 = vector.shape_cast %104 : vector<2x8xf32> to vector<2x8x1xf32>
    %106 = vector.broadcast %105 : vector<2x8x1xf32> to vector<2x8x8xf32>
    %107 = arith.subf %103, %106 : vector<2x8x8xf32>
    %108 = math.exp %107 : vector<2x8x8xf32>
    %cst_77 = arith.constant dense<0.000000e+00> : vector<2x8xf32>
    %109 = vector.multi_reduction <add>, %108, %cst_77 [2] : vector<2x8x8xf32> to vector<2x8xf32>
    %110 = vector.shape_cast %109 : vector<2x8xf32> to vector<2x8x1xf32>
    %111 = tpu.reciprocal %110 {approx = true} : vector<2x8x1xf32> -> vector<2x8x1xf32>
    %112 = arith.truncf %108 : vector<2x8x8xf32> to vector<2x8x8xbf16>
    "tpu.trace_start"() <{level = 10 : i32, message = "bqk,bkd->bqd"}> : () -> ()
    %cst_78 = arith.constant dense<0.000000e+00> : vector<2x8x8xf32>
    %113 = tpu.matmul %112, %100, %cst_78 {dimension_numbers = #tpu.dot_dimension_numbers<[2], [1], [1], [2], [0, 0, 0, 1, 1, 2], [0], [0]>} : vector<2x8x8xbf16>, vector<2x8x8xbf16>, vector<2x8x8xf32> -> vector<2x8x8xf32>
    "tpu.trace_stop"() : () -> ()
    %114 = vector.broadcast %111 : vector<2x8x1xf32> to vector<2x8x8xf32>
    %115 = arith.mulf %113, %114 : vector<2x8x8xf32>
    %116 = vector.shape_cast %115 : vector<2x8x8xf32> to vector<16x8xf32>
    %117 = arith.truncf %116 : vector<16x8xf32> to vector<16x8xbf16>
    %c0_79 = arith.constant 0 : index
    %c1_80 = arith.constant 1 : index
    %c0_81 = arith.constant 0 : index
    %c0_82 = arith.constant 0 : index
    %118 = vector.load %arg11[%c0_79, %c1_80, %c0_81, %c0_82] : memref<2x4x8x32xbf16, #tpu.memory_space<vmem>>, vector<1x1x8x32xbf16>
    %119 = vector.shape_cast %118 : vector<1x1x8x32xbf16> to vector<8x32xbf16>
    %cst_83 = arith.constant dense<0.000000e+00> : vector<16x32xf32>
    %120 = tpu.matmul %117, %119, %cst_83 {dimension_numbers = #tpu.dot_dimension_numbers<[1], [0], [0], [1], [0, 0, 1, 1], [], []>} : vector<16x8xbf16>, vector<8x32xbf16>, vector<16x32xf32> -> vector<16x32xf32>
    %121 = arith.addf %73, %120 : vector<16x32xf32>
    %c0_84 = arith.constant 0 : index
    %c2 = arith.constant 2 : index
    %c0_85 = arith.constant 0 : index
    %c0_86 = arith.constant 0 : index
    %122 = vector.load %arg5[%c0_84, %c2, %c0_85, %c0_86] : memref<2x4x32x8xbf16, #tpu.memory_space<vmem>>, vector<1x1x32x8xbf16>
    %123 = vector.shape_cast %122 : vector<1x1x32x8xbf16> to vector<32x8xbf16>
    %cst_87 = arith.constant dense<0.000000e+00> : vector<16x8xf32>
    %124 = tpu.matmul %24, %123, %cst_87 {dimension_numbers = #tpu.dot_dimension_numbers<[1], [0], [0], [1], [0, 0, 1, 1], [], []>} : vector<16x32xbf16>, vector<32x8xbf16>, vector<16x8xf32> -> vector<16x8xf32>
    %c0_88 = arith.constant 0 : index
    %c2_89 = arith.constant 2 : index
    %c0_90 = arith.constant 0 : index
    %c0_91 = arith.constant 0 : index
    %125 = vector.load %arg6[%c0_88, %c2_89, %c0_90, %c0_91] : memref<2x4x1x8xf32, #tpu.memory_space<vmem>>, vector<1x1x1x8xf32>
    %126 = vector.shape_cast %125 : vector<1x1x1x8xf32> to vector<1x8xf32>
    %127 = vector.broadcast %126 : vector<1x8xf32> to vector<16x8xf32>
    %128 = arith.addf %124, %127 : vector<16x8xf32>
    %c0_92 = arith.constant 0 : index
    %c2_93 = arith.constant 2 : index
    %c0_94 = arith.constant 0 : index
    %c0_95 = arith.constant 0 : index
    %129 = vector.load %arg7[%c0_92, %c2_93, %c0_94, %c0_95] : memref<2x4x32x8xbf16, #tpu.memory_space<vmem>>, vector<1x1x32x8xbf16>
    %130 = vector.shape_cast %129 : vector<1x1x32x8xbf16> to vector<32x8xbf16>
    %cst_96 = arith.constant dense<0.000000e+00> : vector<16x8xf32>
    %131 = tpu.matmul %24, %130, %cst_96 {dimension_numbers = #tpu.dot_dimension_numbers<[1], [0], [0], [1], [0, 0, 1, 1], [], []>} : vector<16x32xbf16>, vector<32x8xbf16>, vector<16x8xf32> -> vector<16x8xf32>
    %c0_97 = arith.constant 0 : index
    %c2_98 = arith.constant 2 : index
    %c0_99 = arith.constant 0 : index
    %c0_100 = arith.constant 0 : index
    %132 = vector.load %arg8[%c0_97, %c2_98, %c0_99, %c0_100] : memref<2x4x1x8xf32, #tpu.memory_space<vmem>>, vector<1x1x1x8xf32>
    %133 = vector.shape_cast %132 : vector<1x1x1x8xf32> to vector<1x8xf32>
    %134 = vector.broadcast %133 : vector<1x8xf32> to vector<16x8xf32>
    %135 = arith.addf %131, %134 : vector<16x8xf32>
    %c0_101 = arith.constant 0 : index
    %c2_102 = arith.constant 2 : index
    %c0_103 = arith.constant 0 : index
    %c0_104 = arith.constant 0 : index
    %136 = vector.load %arg9[%c0_101, %c2_102, %c0_103, %c0_104] : memref<2x4x32x8xbf16, #tpu.memory_space<vmem>>, vector<1x1x32x8xbf16>
    %137 = vector.shape_cast %136 : vector<1x1x32x8xbf16> to vector<32x8xbf16>
    %cst_105 = arith.constant dense<0.000000e+00> : vector<16x8xf32>
    %138 = tpu.matmul %24, %137, %cst_105 {dimension_numbers = #tpu.dot_dimension_numbers<[1], [0], [0], [1], [0, 0, 1, 1], [], []>} : vector<16x32xbf16>, vector<32x8xbf16>, vector<16x8xf32> -> vector<16x8xf32>
    %c0_106 = arith.constant 0 : index
    %c2_107 = arith.constant 2 : index
    %c0_108 = arith.constant 0 : index
    %c0_109 = arith.constant 0 : index
    %139 = vector.load %arg10[%c0_106, %c2_107, %c0_108, %c0_109] : memref<2x4x1x8xf32, #tpu.memory_space<vmem>>, vector<1x1x1x8xf32>
    %140 = vector.shape_cast %139 : vector<1x1x1x8xf32> to vector<1x8xf32>
    %141 = vector.broadcast %140 : vector<1x8xf32> to vector<16x8xf32>
    %142 = arith.addf %138, %141 : vector<16x8xf32>
    %143 = vector.shape_cast %128 : vector<16x8xf32> to vector<2x8x8xf32>
    %144 = arith.truncf %143 : vector<2x8x8xf32> to vector<2x8x8xbf16>
    %145 = vector.shape_cast %135 : vector<16x8xf32> to vector<2x8x8xf32>
    %146 = arith.truncf %145 : vector<2x8x8xf32> to vector<2x8x8xbf16>
    %147 = vector.shape_cast %142 : vector<16x8xf32> to vector<2x8x8xf32>
    %148 = arith.truncf %147 : vector<2x8x8xf32> to vector<2x8x8xbf16>
    "tpu.trace_start"() <{level = 10 : i32, message = "bqd,bkd->bqk"}> : () -> ()
    %cst_110 = arith.constant dense<0.000000e+00> : vector<2x8x8xf32>
    %149 = tpu.matmul %144, %146, %cst_110 {dimension_numbers = #tpu.dot_dimension_numbers<[2], [2], [1], [1], [0, 0, 0, 1, 1, 1], [0], [0]>} : vector<2x8x8xbf16>, vector<2x8x8xbf16>, vector<2x8x8xf32> -> vector<2x8x8xf32>
    "tpu.trace_stop"() : () -> ()
    %150 = vector.broadcast %0 : vector<2x1x8xf32> to vector<2x8x8xf32>
    %151 = arith.addf %149, %150 : vector<2x8x8xf32>
    %cst_111 = arith.constant dense<0xFF800000> : vector<2x8xf32>
    %152 = vector.multi_reduction <maximumf>, %151, %cst_111 [2] : vector<2x8x8xf32> to vector<2x8xf32>
    %153 = vector.shape_cast %152 : vector<2x8xf32> to vector<2x8x1xf32>
    %154 = vector.broadcast %153 : vector<2x8x1xf32> to vector<2x8x8xf32>
    %155 = arith.subf %151, %154 : vector<2x8x8xf32>
    %156 = math.exp %155 : vector<2x8x8xf32>
    %cst_112 = arith.constant dense<0.000000e+00> : vector<2x8xf32>
    %157 = vector.multi_reduction <add>, %156, %cst_112 [2] : vector<2x8x8xf32> to vector<2x8xf32>
    %158 = vector.shape_cast %157 : vector<2x8xf32> to vector<2x8x1xf32>
    %159 = tpu.reciprocal %158 {approx = true} : vector<2x8x1xf32> -> vector<2x8x1xf32>
    %160 = arith.truncf %156 : vector<2x8x8xf32> to vector<2x8x8xbf16>
    "tpu.trace_start"() <{level = 10 : i32, message = "bqk,bkd->bqd"}> : () -> ()
    %cst_113 = arith.constant dense<0.000000e+00> : vector<2x8x8xf32>
    %161 = tpu.matmul %160, %148, %cst_113 {dimension_numbers = #tpu.dot_dimension_numbers<[2], [1], [1], [2], [0, 0, 0, 1, 1, 2], [0], [0]>} : vector<2x8x8xbf16>, vector<2x8x8xbf16>, vector<2x8x8xf32> -> vector<2x8x8xf32>
    "tpu.trace_stop"() : () -> ()
    %162 = vector.broadcast %159 : vector<2x8x1xf32> to vector<2x8x8xf32>
    %163 = arith.mulf %161, %162 : vector<2x8x8xf32>
    %164 = vector.shape_cast %163 : vector<2x8x8xf32> to vector<16x8xf32>
    %165 = arith.truncf %164 : vector<16x8xf32> to vector<16x8xbf16>
    %c0_114 = arith.constant 0 : index
    %c2_115 = arith.constant 2 : index
    %c0_116 = arith.constant 0 : index
    %c0_117 = arith.constant 0 : index
    %166 = vector.load %arg11[%c0_114, %c2_115, %c0_116, %c0_117] : memref<2x4x8x32xbf16, #tpu.memory_space<vmem>>, vector<1x1x8x32xbf16>
    %167 = vector.shape_cast %166 : vector<1x1x8x32xbf16> to vector<8x32xbf16>
    %cst_118 = arith.constant dense<0.000000e+00> : vector<16x32xf32>
    %168 = tpu.matmul %165, %167, %cst_118 {dimension_numbers = #tpu.dot_dimension_numbers<[1], [0], [0], [1], [0, 0, 1, 1], [], []>} : vector<16x8xbf16>, vector<8x32xbf16>, vector<16x32xf32> -> vector<16x32xf32>
    %169 = arith.addf %121, %168 : vector<16x32xf32>
    %c0_119 = arith.constant 0 : index
    %c3 = arith.constant 3 : index
    %c0_120 = arith.constant 0 : index
    %c0_121 = arith.constant 0 : index
    %170 = vector.load %arg5[%c0_119, %c3, %c0_120, %c0_121] : memref<2x4x32x8xbf16, #tpu.memory_space<vmem>>, vector<1x1x32x8xbf16>
    %171 = vector.shape_cast %170 : vector<1x1x32x8xbf16> to vector<32x8xbf16>
    %cst_122 = arith.constant dense<0.000000e+00> : vector<16x8xf32>
    %172 = tpu.matmul %24, %171, %cst_122 {dimension_numbers = #tpu.dot_dimension_numbers<[1], [0], [0], [1], [0, 0, 1, 1], [], []>} : vector<16x32xbf16>, vector<32x8xbf16>, vector<16x8xf32> -> vector<16x8xf32>
    %c0_123 = arith.constant 0 : index
    %c3_124 = arith.constant 3 : index
    %c0_125 = arith.constant 0 : index
    %c0_126 = arith.constant 0 : index
    %173 = vector.load %arg6[%c0_123, %c3_124, %c0_125, %c0_126] : memref<2x4x1x8xf32, #tpu.memory_space<vmem>>, vector<1x1x1x8xf32>
    %174 = vector.shape_cast %173 : vector<1x1x1x8xf32> to vector<1x8xf32>
    %175 = vector.broadcast %174 : vector<1x8xf32> to vector<16x8xf32>
    %176 = arith.addf %172, %175 : vector<16x8xf32>
    %c0_127 = arith.constant 0 : index
    %c3_128 = arith.constant 3 : index
    %c0_129 = arith.constant 0 : index
    %c0_130 = arith.constant 0 : index
    %177 = vector.load %arg7[%c0_127, %c3_128, %c0_129, %c0_130] : memref<2x4x32x8xbf16, #tpu.memory_space<vmem>>, vector<1x1x32x8xbf16>
    %178 = vector.shape_cast %177 : vector<1x1x32x8xbf16> to vector<32x8xbf16>
    %cst_131 = arith.constant dense<0.000000e+00> : vector<16x8xf32>
    %179 = tpu.matmul %24, %178, %cst_131 {dimension_numbers = #tpu.dot_dimension_numbers<[1], [0], [0], [1], [0, 0, 1, 1], [], []>} : vector<16x32xbf16>, vector<32x8xbf16>, vector<16x8xf32> -> vector<16x8xf32>
    %c0_132 = arith.constant 0 : index
    %c3_133 = arith.constant 3 : index
    %c0_134 = arith.constant 0 : index
    %c0_135 = arith.constant 0 : index
    %180 = vector.load %arg8[%c0_132, %c3_133, %c0_134, %c0_135] : memref<2x4x1x8xf32, #tpu.memory_space<vmem>>, vector<1x1x1x8xf32>
    %181 = vector.shape_cast %180 : vector<1x1x1x8xf32> to vector<1x8xf32>
    %182 = vector.broadcast %181 : vector<1x8xf32> to vector<16x8xf32>
    %183 = arith.addf %179, %182 : vector<16x8xf32>
    %c0_136 = arith.constant 0 : index
    %c3_137 = arith.constant 3 : index
    %c0_138 = arith.constant 0 : index
    %c0_139 = arith.constant 0 : index
    %184 = vector.load %arg9[%c0_136, %c3_137, %c0_138, %c0_139] : memref<2x4x32x8xbf16, #tpu.memory_space<vmem>>, vector<1x1x32x8xbf16>
    %185 = vector.shape_cast %184 : vector<1x1x32x8xbf16> to vector<32x8xbf16>
    %cst_140 = arith.constant dense<0.000000e+00> : vector<16x8xf32>
    %186 = tpu.matmul %24, %185, %cst_140 {dimension_numbers = #tpu.dot_dimension_numbers<[1], [0], [0], [1], [0, 0, 1, 1], [], []>} : vector<16x32xbf16>, vector<32x8xbf16>, vector<16x8xf32> -> vector<16x8xf32>
    %c0_141 = arith.constant 0 : index
    %c3_142 = arith.constant 3 : index
    %c0_143 = arith.constant 0 : index
    %c0_144 = arith.constant 0 : index
    %187 = vector.load %arg10[%c0_141, %c3_142, %c0_143, %c0_144] : memref<2x4x1x8xf32, #tpu.memory_space<vmem>>, vector<1x1x1x8xf32>
    %188 = vector.shape_cast %187 : vector<1x1x1x8xf32> to vector<1x8xf32>
    %189 = vector.broadcast %188 : vector<1x8xf32> to vector<16x8xf32>
    %190 = arith.addf %186, %189 : vector<16x8xf32>
    %191 = vector.shape_cast %176 : vector<16x8xf32> to vector<2x8x8xf32>
    %192 = arith.truncf %191 : vector<2x8x8xf32> to vector<2x8x8xbf16>
    %193 = vector.shape_cast %183 : vector<16x8xf32> to vector<2x8x8xf32>
    %194 = arith.truncf %193 : vector<2x8x8xf32> to vector<2x8x8xbf16>
    %195 = vector.shape_cast %190 : vector<16x8xf32> to vector<2x8x8xf32>
    %196 = arith.truncf %195 : vector<2x8x8xf32> to vector<2x8x8xbf16>
    "tpu.trace_start"() <{level = 10 : i32, message = "bqd,bkd->bqk"}> : () -> ()
    %cst_145 = arith.constant dense<0.000000e+00> : vector<2x8x8xf32>
    %197 = tpu.matmul %192, %194, %cst_145 {dimension_numbers = #tpu.dot_dimension_numbers<[2], [2], [1], [1], [0, 0, 0, 1, 1, 1], [0], [0]>} : vector<2x8x8xbf16>, vector<2x8x8xbf16>, vector<2x8x8xf32> -> vector<2x8x8xf32>
    "tpu.trace_stop"() : () -> ()
    %198 = vector.broadcast %0 : vector<2x1x8xf32> to vector<2x8x8xf32>
    %199 = arith.addf %197, %198 : vector<2x8x8xf32>
    %cst_146 = arith.constant dense<0xFF800000> : vector<2x8xf32>
    %200 = vector.multi_reduction <maximumf>, %199, %cst_146 [2] : vector<2x8x8xf32> to vector<2x8xf32>
    %201 = vector.shape_cast %200 : vector<2x8xf32> to vector<2x8x1xf32>
    %202 = vector.broadcast %201 : vector<2x8x1xf32> to vector<2x8x8xf32>
    %203 = arith.subf %199, %202 : vector<2x8x8xf32>
    %204 = math.exp %203 : vector<2x8x8xf32>
    %cst_147 = arith.constant dense<0.000000e+00> : vector<2x8xf32>
    %205 = vector.multi_reduction <add>, %204, %cst_147 [2] : vector<2x8x8xf32> to vector<2x8xf32>
    %206 = vector.shape_cast %205 : vector<2x8xf32> to vector<2x8x1xf32>
    %207 = tpu.reciprocal %206 {approx = true} : vector<2x8x1xf32> -> vector<2x8x1xf32>
    %208 = arith.truncf %204 : vector<2x8x8xf32> to vector<2x8x8xbf16>
    "tpu.trace_start"() <{level = 10 : i32, message = "bqk,bkd->bqd"}> : () -> ()
    %cst_148 = arith.constant dense<0.000000e+00> : vector<2x8x8xf32>
    %209 = tpu.matmul %208, %196, %cst_148 {dimension_numbers = #tpu.dot_dimension_numbers<[2], [1], [1], [2], [0, 0, 0, 1, 1, 2], [0], [0]>} : vector<2x8x8xbf16>, vector<2x8x8xbf16>, vector<2x8x8xf32> -> vector<2x8x8xf32>
    "tpu.trace_stop"() : () -> ()
    %210 = vector.broadcast %207 : vector<2x8x1xf32> to vector<2x8x8xf32>
    %211 = arith.mulf %209, %210 : vector<2x8x8xf32>
    %212 = vector.shape_cast %211 : vector<2x8x8xf32> to vector<16x8xf32>
    %213 = arith.truncf %212 : vector<16x8xf32> to vector<16x8xbf16>
    %c0_149 = arith.constant 0 : index
    %c3_150 = arith.constant 3 : index
    %c0_151 = arith.constant 0 : index
    %c0_152 = arith.constant 0 : index
    %214 = vector.load %arg11[%c0_149, %c3_150, %c0_151, %c0_152] : memref<2x4x8x32xbf16, #tpu.memory_space<vmem>>, vector<1x1x8x32xbf16>
    %215 = vector.shape_cast %214 : vector<1x1x8x32xbf16> to vector<8x32xbf16>
    %cst_153 = arith.constant dense<0.000000e+00> : vector<16x32xf32>
    %216 = tpu.matmul %213, %215, %cst_153 {dimension_numbers = #tpu.dot_dimension_numbers<[1], [0], [0], [1], [0, 0, 1, 1], [], []>} : vector<16x8xbf16>, vector<8x32xbf16>, vector<16x32xf32> -> vector<16x32xf32>
    %217 = arith.addf %169, %216 : vector<16x32xf32>
    %c0_154 = arith.constant 0 : index
    %c0_155 = arith.constant 0 : index
    %c0_156 = arith.constant 0 : index
    %218 = vector.load %arg12[%c0_154, %c0_155, %c0_156] : memref<2x1x32xf32, #tpu.memory_space<vmem>>, vector<1x1x32xf32>
    %219 = vector.shape_cast %218 : vector<1x1x32xf32> to vector<1x32xf32>
    %220 = vector.broadcast %219 : vector<1x32xf32> to vector<16x32xf32>
    %221 = arith.addf %217, %220 : vector<16x32xf32>
    %222 = arith.addf %221, %23 : vector<16x32xf32>
    %c0_157 = arith.constant 0 : index
    %c0_158 = arith.constant 0 : index
    %c0_159 = arith.constant 0 : index
    %223 = vector.load %arg13[%c0_157, %c0_158, %c0_159] : memref<2x1x32xf32, #tpu.memory_space<vmem>>, vector<1x1x32xf32>
    %224 = vector.shape_cast %223 : vector<1x1x32xf32> to vector<1x32xf32>
    %c0_160 = arith.constant 0 : index
    %c0_161 = arith.constant 0 : index
    %c0_162 = arith.constant 0 : index
    %225 = vector.load %arg14[%c0_160, %c0_161, %c0_162] : memref<2x1x32xf32, #tpu.memory_space<vmem>>, vector<1x1x32xf32>
    %226 = vector.shape_cast %225 : vector<1x1x32xf32> to vector<1x32xf32>
    %cst_163 = arith.constant dense<0.000000e+00> : vector<16xf32>
    %227 = vector.multi_reduction <add>, %222, %cst_163 [1] : vector<16x32xf32> to vector<16xf32>
    %228 = vector.shape_cast %227 : vector<16xf32> to vector<16x1xf32>
    %cst_164 = arith.constant 3.200000e+01 : f32
    %229 = vector.broadcast %cst_164 : f32 to vector<16x1xf32>
    %230 = arith.divf %228, %229 : vector<16x1xf32>
    %231 = vector.broadcast %230 : vector<16x1xf32> to vector<16x32xf32>
    %232 = arith.subf %222, %231 : vector<16x32xf32>
    %233 = arith.mulf %232, %232 : vector<16x32xf32>
    %cst_165 = arith.constant dense<0.000000e+00> : vector<16xf32>
    %234 = vector.multi_reduction <add>, %233, %cst_165 [1] : vector<16x32xf32> to vector<16xf32>
    %235 = vector.shape_cast %234 : vector<16xf32> to vector<16x1xf32>
    %cst_166 = arith.constant 3.200000e+01 : f32
    %236 = vector.broadcast %cst_166 : f32 to vector<16x1xf32>
    %237 = arith.divf %235, %236 : vector<16x1xf32>
    %cst_167 = arith.constant 9.99999996E-13 : f32
    %238 = vector.broadcast %cst_167 : f32 to vector<16x1xf32>
    %239 = arith.addf %237, %238 : vector<16x1xf32>
    %240 = math.rsqrt %239 : vector<16x1xf32>
    %241 = vector.broadcast %240 : vector<16x1xf32> to vector<16x32xf32>
    %242 = arith.mulf %232, %241 : vector<16x32xf32>
    %243 = vector.broadcast %224 : vector<1x32xf32> to vector<16x32xf32>
    %244 = arith.mulf %242, %243 : vector<16x32xf32>
    %245 = vector.broadcast %226 : vector<1x32xf32> to vector<16x32xf32>
    %246 = arith.addf %244, %245 : vector<16x32xf32>
    %247 = arith.truncf %246 : vector<16x32xf32> to vector<16x32xbf16>
    %c0_168 = arith.constant 0 : index
    %c0_169 = arith.constant 0 : index
    %c0_170 = arith.constant 0 : index
    %248 = vector.load %arg15[%c0_168, %c0_169, %c0_170] : memref<2x32x64xbf16, #tpu.memory_space<vmem>>, vector<1x32x64xbf16>
    %249 = vector.shape_cast %248 : vector<1x32x64xbf16> to vector<32x64xbf16>
    %cst_171 = arith.constant dense<0.000000e+00> : vector<16x64xf32>
    %250 = tpu.matmul %247, %249, %cst_171 {dimension_numbers = #tpu.dot_dimension_numbers<[1], [0], [0], [1], [0, 0, 1, 1], [], []>} : vector<16x32xbf16>, vector<32x64xbf16>, vector<16x64xf32> -> vector<16x64xf32>
    %c0_172 = arith.constant 0 : index
    %c0_173 = arith.constant 0 : index
    %c0_174 = arith.constant 0 : index
    %251 = vector.load %arg16[%c0_172, %c0_173, %c0_174] : memref<2x1x64xf32, #tpu.memory_space<vmem>>, vector<1x1x64xf32>
    %252 = vector.shape_cast %251 : vector<1x1x64xf32> to vector<1x64xf32>
    %253 = vector.broadcast %252 : vector<1x64xf32> to vector<16x64xf32>
    %254 = arith.addf %250, %253 : vector<16x64xf32>
    %255 = arith.mulf %254, %254 : vector<16x64xf32>
    %256 = arith.mulf %254, %255 : vector<16x64xf32>
    %cst_175 = arith.constant 4.471500e-02 : f32
    %257 = vector.broadcast %cst_175 : f32 to vector<16x64xf32>
    %258 = arith.mulf %257, %256 : vector<16x64xf32>
    %259 = arith.addf %254, %258 : vector<16x64xf32>
    %cst_176 = arith.constant 0.797884583 : f32
    %260 = vector.broadcast %cst_176 : f32 to vector<16x64xf32>
    %261 = arith.mulf %260, %259 : vector<16x64xf32>
    %262 = math.tanh %261 : vector<16x64xf32>
    %cst_177 = arith.constant 1.000000e+00 : f32
    %263 = vector.broadcast %cst_177 : f32 to vector<16x64xf32>
    %264 = arith.addf %263, %262 : vector<16x64xf32>
    %cst_178 = arith.constant 5.000000e-01 : f32
    %265 = vector.broadcast %cst_178 : f32 to vector<16x64xf32>
    %266 = arith.mulf %265, %264 : vector<16x64xf32>
    %267 = arith.mulf %254, %266 : vector<16x64xf32>
    %268 = arith.truncf %267 : vector<16x64xf32> to vector<16x64xbf16>
    %c0_179 = arith.constant 0 : index
    %c0_180 = arith.constant 0 : index
    %c0_181 = arith.constant 0 : index
    %269 = vector.load %arg17[%c0_179, %c0_180, %c0_181] : memref<2x64x32xbf16, #tpu.memory_space<vmem>>, vector<1x64x32xbf16>
    %270 = vector.shape_cast %269 : vector<1x64x32xbf16> to vector<64x32xbf16>
    %cst_182 = arith.constant dense<0.000000e+00> : vector<16x32xf32>
    %271 = tpu.matmul %268, %270, %cst_182 {dimension_numbers = #tpu.dot_dimension_numbers<[1], [0], [0], [1], [0, 0, 1, 1], [], []>} : vector<16x64xbf16>, vector<64x32xbf16>, vector<16x32xf32> -> vector<16x32xf32>
    %c0_183 = arith.constant 0 : index
    %c0_184 = arith.constant 0 : index
    %c0_185 = arith.constant 0 : index
    %272 = vector.load %arg18[%c0_183, %c0_184, %c0_185] : memref<2x1x32xf32, #tpu.memory_space<vmem>>, vector<1x1x32xf32>
    %273 = vector.shape_cast %272 : vector<1x1x32xf32> to vector<1x32xf32>
    %274 = vector.broadcast %273 : vector<1x32xf32> to vector<16x32xf32>
    %275 = arith.addf %271, %274 : vector<16x32xf32>
    %276 = arith.addf %275, %246 : vector<16x32xf32>
    %c0_186 = arith.constant 0 : index
    %c0_187 = arith.constant 0 : index
    %c0_188 = arith.constant 0 : index
    %277 = vector.load %arg19[%c0_186, %c0_187, %c0_188] : memref<2x1x32xf32, #tpu.memory_space<vmem>>, vector<1x1x32xf32>
    %278 = vector.shape_cast %277 : vector<1x1x32xf32> to vector<1x32xf32>
    %c0_189 = arith.constant 0 : index
    %c0_190 = arith.constant 0 : index
    %c0_191 = arith.constant 0 : index
    %279 = vector.load %arg20[%c0_189, %c0_190, %c0_191] : memref<2x1x32xf32, #tpu.memory_space<vmem>>, vector<1x1x32xf32>
    %280 = vector.shape_cast %279 : vector<1x1x32xf32> to vector<1x32xf32>
    %cst_192 = arith.constant dense<0.000000e+00> : vector<16xf32>
    %281 = vector.multi_reduction <add>, %276, %cst_192 [1] : vector<16x32xf32> to vector<16xf32>
    %282 = vector.shape_cast %281 : vector<16xf32> to vector<16x1xf32>
    %cst_193 = arith.constant 3.200000e+01 : f32
    %283 = vector.broadcast %cst_193 : f32 to vector<16x1xf32>
    %284 = arith.divf %282, %283 : vector<16x1xf32>
    %285 = vector.broadcast %284 : vector<16x1xf32> to vector<16x32xf32>
    %286 = arith.subf %276, %285 : vector<16x32xf32>
    %287 = arith.mulf %286, %286 : vector<16x32xf32>
    %cst_194 = arith.constant dense<0.000000e+00> : vector<16xf32>
    %288 = vector.multi_reduction <add>, %287, %cst_194 [1] : vector<16x32xf32> to vector<16xf32>
    %289 = vector.shape_cast %288 : vector<16xf32> to vector<16x1xf32>
    %cst_195 = arith.constant 3.200000e+01 : f32
    %290 = vector.broadcast %cst_195 : f32 to vector<16x1xf32>
    %291 = arith.divf %289, %290 : vector<16x1xf32>
    %cst_196 = arith.constant 9.99999996E-13 : f32
    %292 = vector.broadcast %cst_196 : f32 to vector<16x1xf32>
    %293 = arith.addf %291, %292 : vector<16x1xf32>
    %294 = math.rsqrt %293 : vector<16x1xf32>
    %295 = vector.broadcast %294 : vector<16x1xf32> to vector<16x32xf32>
    %296 = arith.mulf %286, %295 : vector<16x32xf32>
    %297 = vector.broadcast %278 : vector<1x32xf32> to vector<16x32xf32>
    %298 = arith.mulf %296, %297 : vector<16x32xf32>
    %299 = vector.broadcast %280 : vector<1x32xf32> to vector<16x32xf32>
    %300 = arith.addf %298, %299 : vector<16x32xf32>
    %301 = arith.truncf %300 : vector<16x32xf32> to vector<16x32xbf16>
    %cst_197 = arith.constant 0.000000e+00 : f32
    %302 = vector.broadcast %cst_197 : f32 to vector<16x32xf32>
    %c1_198 = arith.constant 1 : index
    %c0_199 = arith.constant 0 : index
    %c0_200 = arith.constant 0 : index
    %c0_201 = arith.constant 0 : index
    %303 = vector.load %arg5[%c1_198, %c0_199, %c0_200, %c0_201] : memref<2x4x32x8xbf16, #tpu.memory_space<vmem>>, vector<1x1x32x8xbf16>
    %304 = vector.shape_cast %303 : vector<1x1x32x8xbf16> to vector<32x8xbf16>
    %cst_202 = arith.constant dense<0.000000e+00> : vector<16x8xf32>
    %305 = tpu.matmul %301, %304, %cst_202 {dimension_numbers = #tpu.dot_dimension_numbers<[1], [0], [0], [1], [0, 0, 1, 1], [], []>} : vector<16x32xbf16>, vector<32x8xbf16>, vector<16x8xf32> -> vector<16x8xf32>
    %c1_203 = arith.constant 1 : index
    %c0_204 = arith.constant 0 : index
    %c0_205 = arith.constant 0 : index
    %c0_206 = arith.constant 0 : index
    %306 = vector.load %arg6[%c1_203, %c0_204, %c0_205, %c0_206] : memref<2x4x1x8xf32, #tpu.memory_space<vmem>>, vector<1x1x1x8xf32>
    %307 = vector.shape_cast %306 : vector<1x1x1x8xf32> to vector<1x8xf32>
    %308 = vector.broadcast %307 : vector<1x8xf32> to vector<16x8xf32>
    %309 = arith.addf %305, %308 : vector<16x8xf32>
    %c1_207 = arith.constant 1 : index
    %c0_208 = arith.constant 0 : index
    %c0_209 = arith.constant 0 : index
    %c0_210 = arith.constant 0 : index
    %310 = vector.load %arg7[%c1_207, %c0_208, %c0_209, %c0_210] : memref<2x4x32x8xbf16, #tpu.memory_space<vmem>>, vector<1x1x32x8xbf16>
    %311 = vector.shape_cast %310 : vector<1x1x32x8xbf16> to vector<32x8xbf16>
    %cst_211 = arith.constant dense<0.000000e+00> : vector<16x8xf32>
    %312 = tpu.matmul %301, %311, %cst_211 {dimension_numbers = #tpu.dot_dimension_numbers<[1], [0], [0], [1], [0, 0, 1, 1], [], []>} : vector<16x32xbf16>, vector<32x8xbf16>, vector<16x8xf32> -> vector<16x8xf32>
    %c1_212 = arith.constant 1 : index
    %c0_213 = arith.constant 0 : index
    %c0_214 = arith.constant 0 : index
    %c0_215 = arith.constant 0 : index
    %313 = vector.load %arg8[%c1_212, %c0_213, %c0_214, %c0_215] : memref<2x4x1x8xf32, #tpu.memory_space<vmem>>, vector<1x1x1x8xf32>
    %314 = vector.shape_cast %313 : vector<1x1x1x8xf32> to vector<1x8xf32>
    %315 = vector.broadcast %314 : vector<1x8xf32> to vector<16x8xf32>
    %316 = arith.addf %312, %315 : vector<16x8xf32>
    %c1_216 = arith.constant 1 : index
    %c0_217 = arith.constant 0 : index
    %c0_218 = arith.constant 0 : index
    %c0_219 = arith.constant 0 : index
    %317 = vector.load %arg9[%c1_216, %c0_217, %c0_218, %c0_219] : memref<2x4x32x8xbf16, #tpu.memory_space<vmem>>, vector<1x1x32x8xbf16>
    %318 = vector.shape_cast %317 : vector<1x1x32x8xbf16> to vector<32x8xbf16>
    %cst_220 = arith.constant dense<0.000000e+00> : vector<16x8xf32>
    %319 = tpu.matmul %301, %318, %cst_220 {dimension_numbers = #tpu.dot_dimension_numbers<[1], [0], [0], [1], [0, 0, 1, 1], [], []>} : vector<16x32xbf16>, vector<32x8xbf16>, vector<16x8xf32> -> vector<16x8xf32>
    %c1_221 = arith.constant 1 : index
    %c0_222 = arith.constant 0 : index
    %c0_223 = arith.constant 0 : index
    %c0_224 = arith.constant 0 : index
    %320 = vector.load %arg10[%c1_221, %c0_222, %c0_223, %c0_224] : memref<2x4x1x8xf32, #tpu.memory_space<vmem>>, vector<1x1x1x8xf32>
    %321 = vector.shape_cast %320 : vector<1x1x1x8xf32> to vector<1x8xf32>
    %322 = vector.broadcast %321 : vector<1x8xf32> to vector<16x8xf32>
    %323 = arith.addf %319, %322 : vector<16x8xf32>
    %324 = vector.shape_cast %309 : vector<16x8xf32> to vector<2x8x8xf32>
    %325 = arith.truncf %324 : vector<2x8x8xf32> to vector<2x8x8xbf16>
    %326 = vector.shape_cast %316 : vector<16x8xf32> to vector<2x8x8xf32>
    %327 = arith.truncf %326 : vector<2x8x8xf32> to vector<2x8x8xbf16>
    %328 = vector.shape_cast %323 : vector<16x8xf32> to vector<2x8x8xf32>
    %329 = arith.truncf %328 : vector<2x8x8xf32> to vector<2x8x8xbf16>
    "tpu.trace_start"() <{level = 10 : i32, message = "bqd,bkd->bqk"}> : () -> ()
    %cst_225 = arith.constant dense<0.000000e+00> : vector<2x8x8xf32>
    %330 = tpu.matmul %325, %327, %cst_225 {dimension_numbers = #tpu.dot_dimension_numbers<[2], [2], [1], [1], [0, 0, 0, 1, 1, 1], [0], [0]>} : vector<2x8x8xbf16>, vector<2x8x8xbf16>, vector<2x8x8xf32> -> vector<2x8x8xf32>
    "tpu.trace_stop"() : () -> ()
    %331 = vector.broadcast %0 : vector<2x1x8xf32> to vector<2x8x8xf32>
    %332 = arith.addf %330, %331 : vector<2x8x8xf32>
    %cst_226 = arith.constant dense<0xFF800000> : vector<2x8xf32>
    %333 = vector.multi_reduction <maximumf>, %332, %cst_226 [2] : vector<2x8x8xf32> to vector<2x8xf32>
    %334 = vector.shape_cast %333 : vector<2x8xf32> to vector<2x8x1xf32>
    %335 = vector.broadcast %334 : vector<2x8x1xf32> to vector<2x8x8xf32>
    %336 = arith.subf %332, %335 : vector<2x8x8xf32>
    %337 = math.exp %336 : vector<2x8x8xf32>
    %cst_227 = arith.constant dense<0.000000e+00> : vector<2x8xf32>
    %338 = vector.multi_reduction <add>, %337, %cst_227 [2] : vector<2x8x8xf32> to vector<2x8xf32>
    %339 = vector.shape_cast %338 : vector<2x8xf32> to vector<2x8x1xf32>
    %340 = tpu.reciprocal %339 {approx = true} : vector<2x8x1xf32> -> vector<2x8x1xf32>
    %341 = arith.truncf %337 : vector<2x8x8xf32> to vector<2x8x8xbf16>
    "tpu.trace_start"() <{level = 10 : i32, message = "bqk,bkd->bqd"}> : () -> ()
    %cst_228 = arith.constant dense<0.000000e+00> : vector<2x8x8xf32>
    %342 = tpu.matmul %341, %329, %cst_228 {dimension_numbers = #tpu.dot_dimension_numbers<[2], [1], [1], [2], [0, 0, 0, 1, 1, 2], [0], [0]>} : vector<2x8x8xbf16>, vector<2x8x8xbf16>, vector<2x8x8xf32> -> vector<2x8x8xf32>
    "tpu.trace_stop"() : () -> ()
    %343 = vector.broadcast %340 : vector<2x8x1xf32> to vector<2x8x8xf32>
    %344 = arith.mulf %342, %343 : vector<2x8x8xf32>
    %345 = vector.shape_cast %344 : vector<2x8x8xf32> to vector<16x8xf32>
    %346 = arith.truncf %345 : vector<16x8xf32> to vector<16x8xbf16>
    %c1_229 = arith.constant 1 : index
    %c0_230 = arith.constant 0 : index
    %c0_231 = arith.constant 0 : index
    %c0_232 = arith.constant 0 : index
    %347 = vector.load %arg11[%c1_229, %c0_230, %c0_231, %c0_232] : memref<2x4x8x32xbf16, #tpu.memory_space<vmem>>, vector<1x1x8x32xbf16>
    %348 = vector.shape_cast %347 : vector<1x1x8x32xbf16> to vector<8x32xbf16>
    %cst_233 = arith.constant dense<0.000000e+00> : vector<16x32xf32>
    %349 = tpu.matmul %346, %348, %cst_233 {dimension_numbers = #tpu.dot_dimension_numbers<[1], [0], [0], [1], [0, 0, 1, 1], [], []>} : vector<16x8xbf16>, vector<8x32xbf16>, vector<16x32xf32> -> vector<16x32xf32>
    %350 = arith.addf %302, %349 : vector<16x32xf32>
    %c1_234 = arith.constant 1 : index
    %c1_235 = arith.constant 1 : index
    %c0_236 = arith.constant 0 : index
    %c0_237 = arith.constant 0 : index
    %351 = vector.load %arg5[%c1_234, %c1_235, %c0_236, %c0_237] : memref<2x4x32x8xbf16, #tpu.memory_space<vmem>>, vector<1x1x32x8xbf16>
    %352 = vector.shape_cast %351 : vector<1x1x32x8xbf16> to vector<32x8xbf16>
    %cst_238 = arith.constant dense<0.000000e+00> : vector<16x8xf32>
    %353 = tpu.matmul %301, %352, %cst_238 {dimension_numbers = #tpu.dot_dimension_numbers<[1], [0], [0], [1], [0, 0, 1, 1], [], []>} : vector<16x32xbf16>, vector<32x8xbf16>, vector<16x8xf32> -> vector<16x8xf32>
    %c1_239 = arith.constant 1 : index
    %c1_240 = arith.constant 1 : index
    %c0_241 = arith.constant 0 : index
    %c0_242 = arith.constant 0 : index
    %354 = vector.load %arg6[%c1_239, %c1_240, %c0_241, %c0_242] : memref<2x4x1x8xf32, #tpu.memory_space<vmem>>, vector<1x1x1x8xf32>
    %355 = vector.shape_cast %354 : vector<1x1x1x8xf32> to vector<1x8xf32>
    %356 = vector.broadcast %355 : vector<1x8xf32> to vector<16x8xf32>
    %357 = arith.addf %353, %356 : vector<16x8xf32>
    %c1_243 = arith.constant 1 : index
    %c1_244 = arith.constant 1 : index
    %c0_245 = arith.constant 0 : index
    %c0_246 = arith.constant 0 : index
    %358 = vector.load %arg7[%c1_243, %c1_244, %c0_245, %c0_246] : memref<2x4x32x8xbf16, #tpu.memory_space<vmem>>, vector<1x1x32x8xbf16>
    %359 = vector.shape_cast %358 : vector<1x1x32x8xbf16> to vector<32x8xbf16>
    %cst_247 = arith.constant dense<0.000000e+00> : vector<16x8xf32>
    %360 = tpu.matmul %301, %359, %cst_247 {dimension_numbers = #tpu.dot_dimension_numbers<[1], [0], [0], [1], [0, 0, 1, 1], [], []>} : vector<16x32xbf16>, vector<32x8xbf16>, vector<16x8xf32> -> vector<16x8xf32>
    %c1_248 = arith.constant 1 : index
    %c1_249 = arith.constant 1 : index
    %c0_250 = arith.constant 0 : index
    %c0_251 = arith.constant 0 : index
    %361 = vector.load %arg8[%c1_248, %c1_249, %c0_250, %c0_251] : memref<2x4x1x8xf32, #tpu.memory_space<vmem>>, vector<1x1x1x8xf32>
    %362 = vector.shape_cast %361 : vector<1x1x1x8xf32> to vector<1x8xf32>
    %363 = vector.broadcast %362 : vector<1x8xf32> to vector<16x8xf32>
    %364 = arith.addf %360, %363 : vector<16x8xf32>
    %c1_252 = arith.constant 1 : index
    %c1_253 = arith.constant 1 : index
    %c0_254 = arith.constant 0 : index
    %c0_255 = arith.constant 0 : index
    %365 = vector.load %arg9[%c1_252, %c1_253, %c0_254, %c0_255] : memref<2x4x32x8xbf16, #tpu.memory_space<vmem>>, vector<1x1x32x8xbf16>
    %366 = vector.shape_cast %365 : vector<1x1x32x8xbf16> to vector<32x8xbf16>
    %cst_256 = arith.constant dense<0.000000e+00> : vector<16x8xf32>
    %367 = tpu.matmul %301, %366, %cst_256 {dimension_numbers = #tpu.dot_dimension_numbers<[1], [0], [0], [1], [0, 0, 1, 1], [], []>} : vector<16x32xbf16>, vector<32x8xbf16>, vector<16x8xf32> -> vector<16x8xf32>
    %c1_257 = arith.constant 1 : index
    %c1_258 = arith.constant 1 : index
    %c0_259 = arith.constant 0 : index
    %c0_260 = arith.constant 0 : index
    %368 = vector.load %arg10[%c1_257, %c1_258, %c0_259, %c0_260] : memref<2x4x1x8xf32, #tpu.memory_space<vmem>>, vector<1x1x1x8xf32>
    %369 = vector.shape_cast %368 : vector<1x1x1x8xf32> to vector<1x8xf32>
    %370 = vector.broadcast %369 : vector<1x8xf32> to vector<16x8xf32>
    %371 = arith.addf %367, %370 : vector<16x8xf32>
    %372 = vector.shape_cast %357 : vector<16x8xf32> to vector<2x8x8xf32>
    %373 = arith.truncf %372 : vector<2x8x8xf32> to vector<2x8x8xbf16>
    %374 = vector.shape_cast %364 : vector<16x8xf32> to vector<2x8x8xf32>
    %375 = arith.truncf %374 : vector<2x8x8xf32> to vector<2x8x8xbf16>
    %376 = vector.shape_cast %371 : vector<16x8xf32> to vector<2x8x8xf32>
    %377 = arith.truncf %376 : vector<2x8x8xf32> to vector<2x8x8xbf16>
    "tpu.trace_start"() <{level = 10 : i32, message = "bqd,bkd->bqk"}> : () -> ()
    %cst_261 = arith.constant dense<0.000000e+00> : vector<2x8x8xf32>
    %378 = tpu.matmul %373, %375, %cst_261 {dimension_numbers = #tpu.dot_dimension_numbers<[2], [2], [1], [1], [0, 0, 0, 1, 1, 1], [0], [0]>} : vector<2x8x8xbf16>, vector<2x8x8xbf16>, vector<2x8x8xf32> -> vector<2x8x8xf32>
    "tpu.trace_stop"() : () -> ()
    %379 = vector.broadcast %0 : vector<2x1x8xf32> to vector<2x8x8xf32>
    %380 = arith.addf %378, %379 : vector<2x8x8xf32>
    %cst_262 = arith.constant dense<0xFF800000> : vector<2x8xf32>
    %381 = vector.multi_reduction <maximumf>, %380, %cst_262 [2] : vector<2x8x8xf32> to vector<2x8xf32>
    %382 = vector.shape_cast %381 : vector<2x8xf32> to vector<2x8x1xf32>
    %383 = vector.broadcast %382 : vector<2x8x1xf32> to vector<2x8x8xf32>
    %384 = arith.subf %380, %383 : vector<2x8x8xf32>
    %385 = math.exp %384 : vector<2x8x8xf32>
    %cst_263 = arith.constant dense<0.000000e+00> : vector<2x8xf32>
    %386 = vector.multi_reduction <add>, %385, %cst_263 [2] : vector<2x8x8xf32> to vector<2x8xf32>
    %387 = vector.shape_cast %386 : vector<2x8xf32> to vector<2x8x1xf32>
    %388 = tpu.reciprocal %387 {approx = true} : vector<2x8x1xf32> -> vector<2x8x1xf32>
    %389 = arith.truncf %385 : vector<2x8x8xf32> to vector<2x8x8xbf16>
    "tpu.trace_start"() <{level = 10 : i32, message = "bqk,bkd->bqd"}> : () -> ()
    %cst_264 = arith.constant dense<0.000000e+00> : vector<2x8x8xf32>
    %390 = tpu.matmul %389, %377, %cst_264 {dimension_numbers = #tpu.dot_dimension_numbers<[2], [1], [1], [2], [0, 0, 0, 1, 1, 2], [0], [0]>} : vector<2x8x8xbf16>, vector<2x8x8xbf16>, vector<2x8x8xf32> -> vector<2x8x8xf32>
    "tpu.trace_stop"() : () -> ()
    %391 = vector.broadcast %388 : vector<2x8x1xf32> to vector<2x8x8xf32>
    %392 = arith.mulf %390, %391 : vector<2x8x8xf32>
    %393 = vector.shape_cast %392 : vector<2x8x8xf32> to vector<16x8xf32>
    %394 = arith.truncf %393 : vector<16x8xf32> to vector<16x8xbf16>
    %c1_265 = arith.constant 1 : index
    %c1_266 = arith.constant 1 : index
    %c0_267 = arith.constant 0 : index
    %c0_268 = arith.constant 0 : index
    %395 = vector.load %arg11[%c1_265, %c1_266, %c0_267, %c0_268] : memref<2x4x8x32xbf16, #tpu.memory_space<vmem>>, vector<1x1x8x32xbf16>
    %396 = vector.shape_cast %395 : vector<1x1x8x32xbf16> to vector<8x32xbf16>
    %cst_269 = arith.constant dense<0.000000e+00> : vector<16x32xf32>
    %397 = tpu.matmul %394, %396, %cst_269 {dimension_numbers = #tpu.dot_dimension_numbers<[1], [0], [0], [1], [0, 0, 1, 1], [], []>} : vector<16x8xbf16>, vector<8x32xbf16>, vector<16x32xf32> -> vector<16x32xf32>
    %398 = arith.addf %350, %397 : vector<16x32xf32>
    %c1_270 = arith.constant 1 : index
    %c2_271 = arith.constant 2 : index
    %c0_272 = arith.constant 0 : index
    %c0_273 = arith.constant 0 : index
    %399 = vector.load %arg5[%c1_270, %c2_271, %c0_272, %c0_273] : memref<2x4x32x8xbf16, #tpu.memory_space<vmem>>, vector<1x1x32x8xbf16>
    %400 = vector.shape_cast %399 : vector<1x1x32x8xbf16> to vector<32x8xbf16>
    %cst_274 = arith.constant dense<0.000000e+00> : vector<16x8xf32>
    %401 = tpu.matmul %301, %400, %cst_274 {dimension_numbers = #tpu.dot_dimension_numbers<[1], [0], [0], [1], [0, 0, 1, 1], [], []>} : vector<16x32xbf16>, vector<32x8xbf16>, vector<16x8xf32> -> vector<16x8xf32>
    %c1_275 = arith.constant 1 : index
    %c2_276 = arith.constant 2 : index
    %c0_277 = arith.constant 0 : index
    %c0_278 = arith.constant 0 : index
    %402 = vector.load %arg6[%c1_275, %c2_276, %c0_277, %c0_278] : memref<2x4x1x8xf32, #tpu.memory_space<vmem>>, vector<1x1x1x8xf32>
    %403 = vector.shape_cast %402 : vector<1x1x1x8xf32> to vector<1x8xf32>
    %404 = vector.broadcast %403 : vector<1x8xf32> to vector<16x8xf32>
    %405 = arith.addf %401, %404 : vector<16x8xf32>
    %c1_279 = arith.constant 1 : index
    %c2_280 = arith.constant 2 : index
    %c0_281 = arith.constant 0 : index
    %c0_282 = arith.constant 0 : index
    %406 = vector.load %arg7[%c1_279, %c2_280, %c0_281, %c0_282] : memref<2x4x32x8xbf16, #tpu.memory_space<vmem>>, vector<1x1x32x8xbf16>
    %407 = vector.shape_cast %406 : vector<1x1x32x8xbf16> to vector<32x8xbf16>
    %cst_283 = arith.constant dense<0.000000e+00> : vector<16x8xf32>
    %408 = tpu.matmul %301, %407, %cst_283 {dimension_numbers = #tpu.dot_dimension_numbers<[1], [0], [0], [1], [0, 0, 1, 1], [], []>} : vector<16x32xbf16>, vector<32x8xbf16>, vector<16x8xf32> -> vector<16x8xf32>
    %c1_284 = arith.constant 1 : index
    %c2_285 = arith.constant 2 : index
    %c0_286 = arith.constant 0 : index
    %c0_287 = arith.constant 0 : index
    %409 = vector.load %arg8[%c1_284, %c2_285, %c0_286, %c0_287] : memref<2x4x1x8xf32, #tpu.memory_space<vmem>>, vector<1x1x1x8xf32>
    %410 = vector.shape_cast %409 : vector<1x1x1x8xf32> to vector<1x8xf32>
    %411 = vector.broadcast %410 : vector<1x8xf32> to vector<16x8xf32>
    %412 = arith.addf %408, %411 : vector<16x8xf32>
    %c1_288 = arith.constant 1 : index
    %c2_289 = arith.constant 2 : index
    %c0_290 = arith.constant 0 : index
    %c0_291 = arith.constant 0 : index
    %413 = vector.load %arg9[%c1_288, %c2_289, %c0_290, %c0_291] : memref<2x4x32x8xbf16, #tpu.memory_space<vmem>>, vector<1x1x32x8xbf16>
    %414 = vector.shape_cast %413 : vector<1x1x32x8xbf16> to vector<32x8xbf16>
    %cst_292 = arith.constant dense<0.000000e+00> : vector<16x8xf32>
    %415 = tpu.matmul %301, %414, %cst_292 {dimension_numbers = #tpu.dot_dimension_numbers<[1], [0], [0], [1], [0, 0, 1, 1], [], []>} : vector<16x32xbf16>, vector<32x8xbf16>, vector<16x8xf32> -> vector<16x8xf32>
    %c1_293 = arith.constant 1 : index
    %c2_294 = arith.constant 2 : index
    %c0_295 = arith.constant 0 : index
    %c0_296 = arith.constant 0 : index
    %416 = vector.load %arg10[%c1_293, %c2_294, %c0_295, %c0_296] : memref<2x4x1x8xf32, #tpu.memory_space<vmem>>, vector<1x1x1x8xf32>
    %417 = vector.shape_cast %416 : vector<1x1x1x8xf32> to vector<1x8xf32>
    %418 = vector.broadcast %417 : vector<1x8xf32> to vector<16x8xf32>
    %419 = arith.addf %415, %418 : vector<16x8xf32>
    %420 = vector.shape_cast %405 : vector<16x8xf32> to vector<2x8x8xf32>
    %421 = arith.truncf %420 : vector<2x8x8xf32> to vector<2x8x8xbf16>
    %422 = vector.shape_cast %412 : vector<16x8xf32> to vector<2x8x8xf32>
    %423 = arith.truncf %422 : vector<2x8x8xf32> to vector<2x8x8xbf16>
    %424 = vector.shape_cast %419 : vector<16x8xf32> to vector<2x8x8xf32>
    %425 = arith.truncf %424 : vector<2x8x8xf32> to vector<2x8x8xbf16>
    "tpu.trace_start"() <{level = 10 : i32, message = "bqd,bkd->bqk"}> : () -> ()
    %cst_297 = arith.constant dense<0.000000e+00> : vector<2x8x8xf32>
    %426 = tpu.matmul %421, %423, %cst_297 {dimension_numbers = #tpu.dot_dimension_numbers<[2], [2], [1], [1], [0, 0, 0, 1, 1, 1], [0], [0]>} : vector<2x8x8xbf16>, vector<2x8x8xbf16>, vector<2x8x8xf32> -> vector<2x8x8xf32>
    "tpu.trace_stop"() : () -> ()
    %427 = vector.broadcast %0 : vector<2x1x8xf32> to vector<2x8x8xf32>
    %428 = arith.addf %426, %427 : vector<2x8x8xf32>
    %cst_298 = arith.constant dense<0xFF800000> : vector<2x8xf32>
    %429 = vector.multi_reduction <maximumf>, %428, %cst_298 [2] : vector<2x8x8xf32> to vector<2x8xf32>
    %430 = vector.shape_cast %429 : vector<2x8xf32> to vector<2x8x1xf32>
    %431 = vector.broadcast %430 : vector<2x8x1xf32> to vector<2x8x8xf32>
    %432 = arith.subf %428, %431 : vector<2x8x8xf32>
    %433 = math.exp %432 : vector<2x8x8xf32>
    %cst_299 = arith.constant dense<0.000000e+00> : vector<2x8xf32>
    %434 = vector.multi_reduction <add>, %433, %cst_299 [2] : vector<2x8x8xf32> to vector<2x8xf32>
    %435 = vector.shape_cast %434 : vector<2x8xf32> to vector<2x8x1xf32>
    %436 = tpu.reciprocal %435 {approx = true} : vector<2x8x1xf32> -> vector<2x8x1xf32>
    %437 = arith.truncf %433 : vector<2x8x8xf32> to vector<2x8x8xbf16>
    "tpu.trace_start"() <{level = 10 : i32, message = "bqk,bkd->bqd"}> : () -> ()
    %cst_300 = arith.constant dense<0.000000e+00> : vector<2x8x8xf32>
    %438 = tpu.matmul %437, %425, %cst_300 {dimension_numbers = #tpu.dot_dimension_numbers<[2], [1], [1], [2], [0, 0, 0, 1, 1, 2], [0], [0]>} : vector<2x8x8xbf16>, vector<2x8x8xbf16>, vector<2x8x8xf32> -> vector<2x8x8xf32>
    "tpu.trace_stop"() : () -> ()
    %439 = vector.broadcast %436 : vector<2x8x1xf32> to vector<2x8x8xf32>
    %440 = arith.mulf %438, %439 : vector<2x8x8xf32>
    %441 = vector.shape_cast %440 : vector<2x8x8xf32> to vector<16x8xf32>
    %442 = arith.truncf %441 : vector<16x8xf32> to vector<16x8xbf16>
    %c1_301 = arith.constant 1 : index
    %c2_302 = arith.constant 2 : index
    %c0_303 = arith.constant 0 : index
    %c0_304 = arith.constant 0 : index
    %443 = vector.load %arg11[%c1_301, %c2_302, %c0_303, %c0_304] : memref<2x4x8x32xbf16, #tpu.memory_space<vmem>>, vector<1x1x8x32xbf16>
    %444 = vector.shape_cast %443 : vector<1x1x8x32xbf16> to vector<8x32xbf16>
    %cst_305 = arith.constant dense<0.000000e+00> : vector<16x32xf32>
    %445 = tpu.matmul %442, %444, %cst_305 {dimension_numbers = #tpu.dot_dimension_numbers<[1], [0], [0], [1], [0, 0, 1, 1], [], []>} : vector<16x8xbf16>, vector<8x32xbf16>, vector<16x32xf32> -> vector<16x32xf32>
    %446 = arith.addf %398, %445 : vector<16x32xf32>
    %c1_306 = arith.constant 1 : index
    %c3_307 = arith.constant 3 : index
    %c0_308 = arith.constant 0 : index
    %c0_309 = arith.constant 0 : index
    %447 = vector.load %arg5[%c1_306, %c3_307, %c0_308, %c0_309] : memref<2x4x32x8xbf16, #tpu.memory_space<vmem>>, vector<1x1x32x8xbf16>
    %448 = vector.shape_cast %447 : vector<1x1x32x8xbf16> to vector<32x8xbf16>
    %cst_310 = arith.constant dense<0.000000e+00> : vector<16x8xf32>
    %449 = tpu.matmul %301, %448, %cst_310 {dimension_numbers = #tpu.dot_dimension_numbers<[1], [0], [0], [1], [0, 0, 1, 1], [], []>} : vector<16x32xbf16>, vector<32x8xbf16>, vector<16x8xf32> -> vector<16x8xf32>
    %c1_311 = arith.constant 1 : index
    %c3_312 = arith.constant 3 : index
    %c0_313 = arith.constant 0 : index
    %c0_314 = arith.constant 0 : index
    %450 = vector.load %arg6[%c1_311, %c3_312, %c0_313, %c0_314] : memref<2x4x1x8xf32, #tpu.memory_space<vmem>>, vector<1x1x1x8xf32>
    %451 = vector.shape_cast %450 : vector<1x1x1x8xf32> to vector<1x8xf32>
    %452 = vector.broadcast %451 : vector<1x8xf32> to vector<16x8xf32>
    %453 = arith.addf %449, %452 : vector<16x8xf32>
    %c1_315 = arith.constant 1 : index
    %c3_316 = arith.constant 3 : index
    %c0_317 = arith.constant 0 : index
    %c0_318 = arith.constant 0 : index
    %454 = vector.load %arg7[%c1_315, %c3_316, %c0_317, %c0_318] : memref<2x4x32x8xbf16, #tpu.memory_space<vmem>>, vector<1x1x32x8xbf16>
    %455 = vector.shape_cast %454 : vector<1x1x32x8xbf16> to vector<32x8xbf16>
    %cst_319 = arith.constant dense<0.000000e+00> : vector<16x8xf32>
    %456 = tpu.matmul %301, %455, %cst_319 {dimension_numbers = #tpu.dot_dimension_numbers<[1], [0], [0], [1], [0, 0, 1, 1], [], []>} : vector<16x32xbf16>, vector<32x8xbf16>, vector<16x8xf32> -> vector<16x8xf32>
    %c1_320 = arith.constant 1 : index
    %c3_321 = arith.constant 3 : index
    %c0_322 = arith.constant 0 : index
    %c0_323 = arith.constant 0 : index
    %457 = vector.load %arg8[%c1_320, %c3_321, %c0_322, %c0_323] : memref<2x4x1x8xf32, #tpu.memory_space<vmem>>, vector<1x1x1x8xf32>
    %458 = vector.shape_cast %457 : vector<1x1x1x8xf32> to vector<1x8xf32>
    %459 = vector.broadcast %458 : vector<1x8xf32> to vector<16x8xf32>
    %460 = arith.addf %456, %459 : vector<16x8xf32>
    %c1_324 = arith.constant 1 : index
    %c3_325 = arith.constant 3 : index
    %c0_326 = arith.constant 0 : index
    %c0_327 = arith.constant 0 : index
    %461 = vector.load %arg9[%c1_324, %c3_325, %c0_326, %c0_327] : memref<2x4x32x8xbf16, #tpu.memory_space<vmem>>, vector<1x1x32x8xbf16>
    %462 = vector.shape_cast %461 : vector<1x1x32x8xbf16> to vector<32x8xbf16>
    %cst_328 = arith.constant dense<0.000000e+00> : vector<16x8xf32>
    %463 = tpu.matmul %301, %462, %cst_328 {dimension_numbers = #tpu.dot_dimension_numbers<[1], [0], [0], [1], [0, 0, 1, 1], [], []>} : vector<16x32xbf16>, vector<32x8xbf16>, vector<16x8xf32> -> vector<16x8xf32>
    %c1_329 = arith.constant 1 : index
    %c3_330 = arith.constant 3 : index
    %c0_331 = arith.constant 0 : index
    %c0_332 = arith.constant 0 : index
    %464 = vector.load %arg10[%c1_329, %c3_330, %c0_331, %c0_332] : memref<2x4x1x8xf32, #tpu.memory_space<vmem>>, vector<1x1x1x8xf32>
    %465 = vector.shape_cast %464 : vector<1x1x1x8xf32> to vector<1x8xf32>
    %466 = vector.broadcast %465 : vector<1x8xf32> to vector<16x8xf32>
    %467 = arith.addf %463, %466 : vector<16x8xf32>
    %468 = vector.shape_cast %453 : vector<16x8xf32> to vector<2x8x8xf32>
    %469 = arith.truncf %468 : vector<2x8x8xf32> to vector<2x8x8xbf16>
    %470 = vector.shape_cast %460 : vector<16x8xf32> to vector<2x8x8xf32>
    %471 = arith.truncf %470 : vector<2x8x8xf32> to vector<2x8x8xbf16>
    %472 = vector.shape_cast %467 : vector<16x8xf32> to vector<2x8x8xf32>
    %473 = arith.truncf %472 : vector<2x8x8xf32> to vector<2x8x8xbf16>
    "tpu.trace_start"() <{level = 10 : i32, message = "bqd,bkd->bqk"}> : () -> ()
    %cst_333 = arith.constant dense<0.000000e+00> : vector<2x8x8xf32>
    %474 = tpu.matmul %469, %471, %cst_333 {dimension_numbers = #tpu.dot_dimension_numbers<[2], [2], [1], [1], [0, 0, 0, 1, 1, 1], [0], [0]>} : vector<2x8x8xbf16>, vector<2x8x8xbf16>, vector<2x8x8xf32> -> vector<2x8x8xf32>
    "tpu.trace_stop"() : () -> ()
    %475 = vector.broadcast %0 : vector<2x1x8xf32> to vector<2x8x8xf32>
    %476 = arith.addf %474, %475 : vector<2x8x8xf32>
    %cst_334 = arith.constant dense<0xFF800000> : vector<2x8xf32>
    %477 = vector.multi_reduction <maximumf>, %476, %cst_334 [2] : vector<2x8x8xf32> to vector<2x8xf32>
    %478 = vector.shape_cast %477 : vector<2x8xf32> to vector<2x8x1xf32>
    %479 = vector.broadcast %478 : vector<2x8x1xf32> to vector<2x8x8xf32>
    %480 = arith.subf %476, %479 : vector<2x8x8xf32>
    %481 = math.exp %480 : vector<2x8x8xf32>
    %cst_335 = arith.constant dense<0.000000e+00> : vector<2x8xf32>
    %482 = vector.multi_reduction <add>, %481, %cst_335 [2] : vector<2x8x8xf32> to vector<2x8xf32>
    %483 = vector.shape_cast %482 : vector<2x8xf32> to vector<2x8x1xf32>
    %484 = tpu.reciprocal %483 {approx = true} : vector<2x8x1xf32> -> vector<2x8x1xf32>
    %485 = arith.truncf %481 : vector<2x8x8xf32> to vector<2x8x8xbf16>
    "tpu.trace_start"() <{level = 10 : i32, message = "bqk,bkd->bqd"}> : () -> ()
    %cst_336 = arith.constant dense<0.000000e+00> : vector<2x8x8xf32>
    %486 = tpu.matmul %485, %473, %cst_336 {dimension_numbers = #tpu.dot_dimension_numbers<[2], [1], [1], [2], [0, 0, 0, 1, 1, 2], [0], [0]>} : vector<2x8x8xbf16>, vector<2x8x8xbf16>, vector<2x8x8xf32> -> vector<2x8x8xf32>
    "tpu.trace_stop"() : () -> ()
    %487 = vector.broadcast %484 : vector<2x8x1xf32> to vector<2x8x8xf32>
    %488 = arith.mulf %486, %487 : vector<2x8x8xf32>
    %489 = vector.shape_cast %488 : vector<2x8x8xf32> to vector<16x8xf32>
    %490 = arith.truncf %489 : vector<16x8xf32> to vector<16x8xbf16>
    %c1_337 = arith.constant 1 : index
    %c3_338 = arith.constant 3 : index
    %c0_339 = arith.constant 0 : index
    %c0_340 = arith.constant 0 : index
    %491 = vector.load %arg11[%c1_337, %c3_338, %c0_339, %c0_340] : memref<2x4x8x32xbf16, #tpu.memory_space<vmem>>, vector<1x1x8x32xbf16>
    %492 = vector.shape_cast %491 : vector<1x1x8x32xbf16> to vector<8x32xbf16>
    %cst_341 = arith.constant dense<0.000000e+00> : vector<16x32xf32>
    %493 = tpu.matmul %490, %492, %cst_341 {dimension_numbers = #tpu.dot_dimension_numbers<[1], [0], [0], [1], [0, 0, 1, 1], [], []>} : vector<16x8xbf16>, vector<8x32xbf16>, vector<16x32xf32> -> vector<16x32xf32>
    %494 = arith.addf %446, %493 : vector<16x32xf32>
    %c1_342 = arith.constant 1 : index
    %c0_343 = arith.constant 0 : index
    %c0_344 = arith.constant 0 : index
    %495 = vector.load %arg12[%c1_342, %c0_343, %c0_344] : memref<2x1x32xf32, #tpu.memory_space<vmem>>, vector<1x1x32xf32>
    %496 = vector.shape_cast %495 : vector<1x1x32xf32> to vector<1x32xf32>
    %497 = vector.broadcast %496 : vector<1x32xf32> to vector<16x32xf32>
    %498 = arith.addf %494, %497 : vector<16x32xf32>
    %499 = arith.addf %498, %300 : vector<16x32xf32>
    %c1_345 = arith.constant 1 : index
    %c0_346 = arith.constant 0 : index
    %c0_347 = arith.constant 0 : index
    %500 = vector.load %arg13[%c1_345, %c0_346, %c0_347] : memref<2x1x32xf32, #tpu.memory_space<vmem>>, vector<1x1x32xf32>
    %501 = vector.shape_cast %500 : vector<1x1x32xf32> to vector<1x32xf32>
    %c1_348 = arith.constant 1 : index
    %c0_349 = arith.constant 0 : index
    %c0_350 = arith.constant 0 : index
    %502 = vector.load %arg14[%c1_348, %c0_349, %c0_350] : memref<2x1x32xf32, #tpu.memory_space<vmem>>, vector<1x1x32xf32>
    %503 = vector.shape_cast %502 : vector<1x1x32xf32> to vector<1x32xf32>
    %cst_351 = arith.constant dense<0.000000e+00> : vector<16xf32>
    %504 = vector.multi_reduction <add>, %499, %cst_351 [1] : vector<16x32xf32> to vector<16xf32>
    %505 = vector.shape_cast %504 : vector<16xf32> to vector<16x1xf32>
    %cst_352 = arith.constant 3.200000e+01 : f32
    %506 = vector.broadcast %cst_352 : f32 to vector<16x1xf32>
    %507 = arith.divf %505, %506 : vector<16x1xf32>
    %508 = vector.broadcast %507 : vector<16x1xf32> to vector<16x32xf32>
    %509 = arith.subf %499, %508 : vector<16x32xf32>
    %510 = arith.mulf %509, %509 : vector<16x32xf32>
    %cst_353 = arith.constant dense<0.000000e+00> : vector<16xf32>
    %511 = vector.multi_reduction <add>, %510, %cst_353 [1] : vector<16x32xf32> to vector<16xf32>
    %512 = vector.shape_cast %511 : vector<16xf32> to vector<16x1xf32>
    %cst_354 = arith.constant 3.200000e+01 : f32
    %513 = vector.broadcast %cst_354 : f32 to vector<16x1xf32>
    %514 = arith.divf %512, %513 : vector<16x1xf32>
    %cst_355 = arith.constant 9.99999996E-13 : f32
    %515 = vector.broadcast %cst_355 : f32 to vector<16x1xf32>
    %516 = arith.addf %514, %515 : vector<16x1xf32>
    %517 = math.rsqrt %516 : vector<16x1xf32>
    %518 = vector.broadcast %517 : vector<16x1xf32> to vector<16x32xf32>
    %519 = arith.mulf %509, %518 : vector<16x32xf32>
    %520 = vector.broadcast %501 : vector<1x32xf32> to vector<16x32xf32>
    %521 = arith.mulf %519, %520 : vector<16x32xf32>
    %522 = vector.broadcast %503 : vector<1x32xf32> to vector<16x32xf32>
    %523 = arith.addf %521, %522 : vector<16x32xf32>
    %524 = arith.truncf %523 : vector<16x32xf32> to vector<16x32xbf16>
    %c1_356 = arith.constant 1 : index
    %c0_357 = arith.constant 0 : index
    %c0_358 = arith.constant 0 : index
    %525 = vector.load %arg15[%c1_356, %c0_357, %c0_358] : memref<2x32x64xbf16, #tpu.memory_space<vmem>>, vector<1x32x64xbf16>
    %526 = vector.shape_cast %525 : vector<1x32x64xbf16> to vector<32x64xbf16>
    %cst_359 = arith.constant dense<0.000000e+00> : vector<16x64xf32>
    %527 = tpu.matmul %524, %526, %cst_359 {dimension_numbers = #tpu.dot_dimension_numbers<[1], [0], [0], [1], [0, 0, 1, 1], [], []>} : vector<16x32xbf16>, vector<32x64xbf16>, vector<16x64xf32> -> vector<16x64xf32>
    %c1_360 = arith.constant 1 : index
    %c0_361 = arith.constant 0 : index
    %c0_362 = arith.constant 0 : index
    %528 = vector.load %arg16[%c1_360, %c0_361, %c0_362] : memref<2x1x64xf32, #tpu.memory_space<vmem>>, vector<1x1x64xf32>
    %529 = vector.shape_cast %528 : vector<1x1x64xf32> to vector<1x64xf32>
    %530 = vector.broadcast %529 : vector<1x64xf32> to vector<16x64xf32>
    %531 = arith.addf %527, %530 : vector<16x64xf32>
    %532 = arith.mulf %531, %531 : vector<16x64xf32>
    %533 = arith.mulf %531, %532 : vector<16x64xf32>
    %cst_363 = arith.constant 4.471500e-02 : f32
    %534 = vector.broadcast %cst_363 : f32 to vector<16x64xf32>
    %535 = arith.mulf %534, %533 : vector<16x64xf32>
    %536 = arith.addf %531, %535 : vector<16x64xf32>
    %cst_364 = arith.constant 0.797884583 : f32
    %537 = vector.broadcast %cst_364 : f32 to vector<16x64xf32>
    %538 = arith.mulf %537, %536 : vector<16x64xf32>
    %539 = math.tanh %538 : vector<16x64xf32>
    %cst_365 = arith.constant 1.000000e+00 : f32
    %540 = vector.broadcast %cst_365 : f32 to vector<16x64xf32>
    %541 = arith.addf %540, %539 : vector<16x64xf32>
    %cst_366 = arith.constant 5.000000e-01 : f32
    %542 = vector.broadcast %cst_366 : f32 to vector<16x64xf32>
    %543 = arith.mulf %542, %541 : vector<16x64xf32>
    %544 = arith.mulf %531, %543 : vector<16x64xf32>
    %545 = arith.truncf %544 : vector<16x64xf32> to vector<16x64xbf16>
    %c1_367 = arith.constant 1 : index
    %c0_368 = arith.constant 0 : index
    %c0_369 = arith.constant 0 : index
    %546 = vector.load %arg17[%c1_367, %c0_368, %c0_369] : memref<2x64x32xbf16, #tpu.memory_space<vmem>>, vector<1x64x32xbf16>
    %547 = vector.shape_cast %546 : vector<1x64x32xbf16> to vector<64x32xbf16>
    %cst_370 = arith.constant dense<0.000000e+00> : vector<16x32xf32>
    %548 = tpu.matmul %545, %547, %cst_370 {dimension_numbers = #tpu.dot_dimension_numbers<[1], [0], [0], [1], [0, 0, 1, 1], [], []>} : vector<16x64xbf16>, vector<64x32xbf16>, vector<16x32xf32> -> vector<16x32xf32>
    %c1_371 = arith.constant 1 : index
    %c0_372 = arith.constant 0 : index
    %c0_373 = arith.constant 0 : index
    %549 = vector.load %arg18[%c1_371, %c0_372, %c0_373] : memref<2x1x32xf32, #tpu.memory_space<vmem>>, vector<1x1x32xf32>
    %550 = vector.shape_cast %549 : vector<1x1x32xf32> to vector<1x32xf32>
    %551 = vector.broadcast %550 : vector<1x32xf32> to vector<16x32xf32>
    %552 = arith.addf %548, %551 : vector<16x32xf32>
    %553 = arith.addf %552, %523 : vector<16x32xf32>
    %c1_374 = arith.constant 1 : index
    %c0_375 = arith.constant 0 : index
    %c0_376 = arith.constant 0 : index
    %554 = vector.load %arg19[%c1_374, %c0_375, %c0_376] : memref<2x1x32xf32, #tpu.memory_space<vmem>>, vector<1x1x32xf32>
    %555 = vector.shape_cast %554 : vector<1x1x32xf32> to vector<1x32xf32>
    %c1_377 = arith.constant 1 : index
    %c0_378 = arith.constant 0 : index
    %c0_379 = arith.constant 0 : index
    %556 = vector.load %arg20[%c1_377, %c0_378, %c0_379] : memref<2x1x32xf32, #tpu.memory_space<vmem>>, vector<1x1x32xf32>
    %557 = vector.shape_cast %556 : vector<1x1x32xf32> to vector<1x32xf32>
    %cst_380 = arith.constant dense<0.000000e+00> : vector<16xf32>
    %558 = vector.multi_reduction <add>, %553, %cst_380 [1] : vector<16x32xf32> to vector<16xf32>
    %559 = vector.shape_cast %558 : vector<16xf32> to vector<16x1xf32>
    %cst_381 = arith.constant 3.200000e+01 : f32
    %560 = vector.broadcast %cst_381 : f32 to vector<16x1xf32>
    %561 = arith.divf %559, %560 : vector<16x1xf32>
    %562 = vector.broadcast %561 : vector<16x1xf32> to vector<16x32xf32>
    %563 = arith.subf %553, %562 : vector<16x32xf32>
    %564 = arith.mulf %563, %563 : vector<16x32xf32>
    %cst_382 = arith.constant dense<0.000000e+00> : vector<16xf32>
    %565 = vector.multi_reduction <add>, %564, %cst_382 [1] : vector<16x32xf32> to vector<16xf32>
    %566 = vector.shape_cast %565 : vector<16xf32> to vector<16x1xf32>
    %cst_383 = arith.constant 3.200000e+01 : f32
    %567 = vector.broadcast %cst_383 : f32 to vector<16x1xf32>
    %568 = arith.divf %566, %567 : vector<16x1xf32>
    %cst_384 = arith.constant 9.99999996E-13 : f32
    %569 = vector.broadcast %cst_384 : f32 to vector<16x1xf32>
    %570 = arith.addf %568, %569 : vector<16x1xf32>
    %571 = math.rsqrt %570 : vector<16x1xf32>
    %572 = vector.broadcast %571 : vector<16x1xf32> to vector<16x32xf32>
    %573 = arith.mulf %563, %572 : vector<16x32xf32>
    %574 = vector.broadcast %555 : vector<1x32xf32> to vector<16x32xf32>
    %575 = arith.mulf %573, %574 : vector<16x32xf32>
    %576 = vector.broadcast %557 : vector<1x32xf32> to vector<16x32xf32>
    %577 = arith.addf %575, %576 : vector<16x32xf32>
    %578 = arith.truncf %577 : vector<16x32xf32> to vector<16x32xbf16>
    %c0_385 = arith.constant 0 : index
    %c0_386 = arith.constant 0 : index
    %579 = vector.load %arg21[%c0_385, %c0_386] : memref<32x32xbf16, #tpu.memory_space<vmem>>, vector<32x32xbf16>
    %cst_387 = arith.constant dense<0.000000e+00> : vector<16x32xf32>
    %580 = tpu.matmul %578, %579, %cst_387 {dimension_numbers = #tpu.dot_dimension_numbers<[1], [0], [0], [1], [0, 0, 1, 1], [], []>} : vector<16x32xbf16>, vector<32x32xbf16>, vector<16x32xf32> -> vector<16x32xf32>
    %c0_388 = arith.constant 0 : index
    %c0_389 = arith.constant 0 : index
    %581 = vector.load %arg22[%c0_388, %c0_389] : memref<1x32xf32, #tpu.memory_space<vmem>>, vector<1x32xf32>
    %582 = vector.broadcast %581 : vector<1x32xf32> to vector<16x32xf32>
    %583 = arith.addf %580, %582 : vector<16x32xf32>
    %584 = math.tanh %583 : vector<16x32xf32>
    %585 = arith.truncf %584 : vector<16x32xf32> to vector<16x32xbf16>
    %c0_390 = arith.constant 0 : index
    %c0_391 = arith.constant 0 : index
    %586 = vector.load %arg23[%c0_390, %c0_391] : memref<32x128xbf16, #tpu.memory_space<vmem>>, vector<32x128xbf16>
    %cst_392 = arith.constant dense<0.000000e+00> : vector<16x128xf32>
    %587 = tpu.matmul %585, %586, %cst_392 {dimension_numbers = #tpu.dot_dimension_numbers<[1], [0], [0], [1], [0, 0, 1, 1], [], []>} : vector<16x32xbf16>, vector<32x128xbf16>, vector<16x128xf32> -> vector<16x128xf32>
    %c0_393 = arith.constant 0 : index
    %c0_394 = arith.constant 0 : index
    %588 = vector.load %arg24[%c0_393, %c0_394] : memref<1x128xf32, #tpu.memory_space<vmem>>, vector<1x128xf32>
    %589 = vector.broadcast %588 : vector<1x128xf32> to vector<16x128xf32>
    %590 = arith.addf %587, %589 : vector<16x128xf32>
    %c0_395 = arith.constant 0 : index
    %c0_396 = arith.constant 0 : index
    %591 = vector.load %arg25[%c0_395, %c0_396] : memref<16x128xf32, #tpu.memory_space<vmem>>, vector<16x128xf32>
    tpu.vector_store %arg25[%c0_395, %c0_396], %590 {strides = array<i32>} : memref<16x128xf32, #tpu.memory_space<vmem>>, vector<16x128xf32>,
    return
  }
  func.func @transform_0(%arg0: i32) -> (i32, i32) {
    %c0_i32 = arith.constant 0 : i32
    %c0_i32_0 = arith.constant 0 : i32
    %c0_i32_1 = arith.constant 0 : i32
    return %c0_i32, %c0_i32_0 : i32, i32
  }
  func.func @transform_1(%arg0: i32) -> (i32, i32, i32) {
    %c0_i32 = arith.constant 0 : i32
    %c0_i32_0 = arith.constant 0 : i32
    %c0_i32_1 = arith.constant 0 : i32
    %c0_i32_2 = arith.constant 0 : i32
    return %c0_i32, %c0_i32_0, %c0_i32_1 : i32, i32, i32
  }
  func.func @transform_2(%arg0: i32) -> (i32, i32) {
    %c0_i32 = arith.constant 0 : i32
    %c0_i32_0 = arith.constant 0 : i32
    %c0_i32_1 = arith.constant 0 : i32
    return %c0_i32, %c0_i32_0 : i32, i32
  }
  func.func @transform_3(%arg0: i32) -> (i32, i32) {
    %c0_i32 = arith.constant 0 : i32
    %c0_i32_0 = arith.constant 0 : i32
    %c0_i32_1 = arith.constant 0 : i32
    return %c0_i32, %c0_i32_0 : i32, i32
  }
  func.func @transform_4(%arg0: i32) -> (i32, i32, i32, i32) {
    %c0_i32 = arith.constant 0 : i32
    %c0_i32_0 = arith.constant 0 : i32
    %c0_i32_1 = arith.constant 0 : i32
    %c0_i32_2 = arith.constant 0 : i32
    %c0_i32_3 = arith.constant 0 : i32
    return %c0_i32, %c0_i32_0, %c0_i32_1, %c0_i32_2 : i32, i32, i32, i32
  }
  func.func @transform_5(%arg0: i32) -> (i32, i32, i32, i32) {
    %c0_i32 = arith.constant 0 : i32
    %c0_i32_0 = arith.constant 0 : i32
    %c0_i32_1 = arith.constant 0 : i32
    %c0_i32_2 = arith.constant 0 : i32
    %c0_i32_3 = arith.constant 0 : i32
    return %c0_i32, %c0_i32_0, %c0_i32_1, %c0_i32_2 : i32, i32, i32, i32
  }
  func.func @transform_6(%arg0: i32) -> (i32, i32, i32, i32) {
    %c0_i32 = arith.constant 0 : i32
    %c0_i32_0 = arith.constant 0 : i32
    %c0_i32_1 = arith.constant 0 : i32
    %c0_i32_2 = arith.constant 0 : i32
    %c0_i32_3 = arith.constant 0 : i32
    return %c0_i32, %c0_i32_0, %c0_i32_1, %c0_i32_2 : i32, i32, i32, i32
  }
  func.func @transform_7(%arg0: i32) -> (i32, i32, i32, i32) {
    %c0_i32 = arith.constant 0 : i32
    %c0_i32_0 = arith.constant 0 : i32
    %c0_i32_1 = arith.constant 0 : i32
    %c0_i32_2 = arith.constant 0 : i32
    %c0_i32_3 = arith.constant 0 : i32
    return %c0_i32, %c0_i32_0, %c0_i32_1, %c0_i32_2 : i32, i32, i32, i32
  }
  func.func @transform_8(%arg0: i32) -> (i32, i32, i32, i32) {
    %c0_i32 = arith.constant 0 : i32
    %c0_i32_0 = arith.constant 0 : i32
    %c0_i32_1 = arith.constant 0 : i32
    %c0_i32_2 = arith.constant 0 : i32
    %c0_i32_3 = arith.constant 0 : i32
    return %c0_i32, %c0_i32_0, %c0_i32_1, %c0_i32_2 : i32, i32, i32, i32
  }
  func.func @transform_9(%arg0: i32) -> (i32, i32, i32, i32) {
    %c0_i32 = arith.constant 0 : i32
    %c0_i32_0 = arith.constant 0 : i32
    %c0_i32_1 = arith.constant 0 : i32
    %c0_i32_2 = arith.constant 0 : i32
    %c0_i32_3 = arith.constant 0 : i32
    return %c0_i32, %c0_i32_0, %c0_i32_1, %c0_i32_2 : i32, i32, i32, i32
  }
  func.func @transform_10(%arg0: i32) -> (i32, i32, i32, i32) {
    %c0_i32 = arith.constant 0 : i32
    %c0_i32_0 = arith.constant 0 : i32
    %c0_i32_1 = arith.constant 0 : i32
    %c0_i32_2 = arith.constant 0 : i32
    %c0_i32_3 = arith.constant 0 : i32
    return %c0_i32, %c0_i32_0, %c0_i32_1, %c0_i32_2 : i32, i32, i32, i32
  }
  func.func @transform_11(%arg0: i32) -> (i32, i32, i32) {
    %c0_i32 = arith.constant 0 : i32
    %c0_i32_0 = arith.constant 0 : i32
    %c0_i32_1 = arith.constant 0 : i32
    %c0_i32_2 = arith.constant 0 : i32
    return %c0_i32, %c0_i32_0, %c0_i32_1 : i32, i32, i32
  }
  func.func @transform_12(%arg0: i32) -> (i32, i32, i32) {
    %c0_i32 = arith.constant 0 : i32
    %c0_i32_0 = arith.constant 0 : i32
    %c0_i32_1 = arith.constant 0 : i32
    %c0_i32_2 = arith.constant 0 : i32
    return %c0_i32, %c0_i32_0, %c0_i32_1 : i32, i32, i32
  }
  func.func @transform_13(%arg0: i32) -> (i32, i32, i32) {
    %c0_i32 = arith.constant 0 : i32
    %c0_i32_0 = arith.constant 0 : i32
    %c0_i32_1 = arith.constant 0 : i32
    %c0_i32_2 = arith.constant 0 : i32
    return %c0_i32, %c0_i32_0, %c0_i32_1 : i32, i32, i32
  }
  func.func @transform_14(%arg0: i32) -> (i32, i32, i32) {
    %c0_i32 = arith.constant 0 : i32
    %c0_i32_0 = arith.constant 0 : i32
    %c0_i32_1 = arith.constant 0 : i32
    %c0_i32_2 = arith.constant 0 : i32
    return %c0_i32, %c0_i32_0, %c0_i32_1 : i32, i32, i32
  }
  func.func @transform_15(%arg0: i32) -> (i32, i32, i32) {
    %c0_i32 = arith.constant 0 : i32
    %c0_i32_0 = arith.constant 0 : i32
    %c0_i32_1 = arith.constant 0 : i32
    %c0_i32_2 = arith.constant 0 : i32
    return %c0_i32, %c0_i32_0, %c0_i32_1 : i32, i32, i32
  }
  func.func @transform_16(%arg0: i32) -> (i32, i32, i32) {
    %c0_i32 = arith.constant 0 : i32
    %c0_i32_0 = arith.constant 0 : i32
    %c0_i32_1 = arith.constant 0 : i32
    %c0_i32_2 = arith.constant 0 : i32
    return %c0_i32, %c0_i32_0, %c0_i32_1 : i32, i32, i32
  }
  func.func @transform_17(%arg0: i32) -> (i32, i32, i32) {
    %c0_i32 = arith.constant 0 : i32
    %c0_i32_0 = arith.constant 0 : i32
    %c0_i32_1 = arith.constant 0 : i32
    %c0_i32_2 = arith.constant 0 : i32
    return %c0_i32, %c0_i32_0, %c0_i32_1 : i32, i32, i32
  }
  func.func @transform_18(%arg0: i32) -> (i32, i32, i32) {
    %c0_i32 = arith.constant 0 : i32
    %c0_i32_0 = arith.constant 0 : i32
    %c0_i32_1 = arith.constant 0 : i32
    %c0_i32_2 = arith.constant 0 : i32
    return %c0_i32, %c0_i32_0, %c0_i32_1 : i32, i32, i32
  }
  func.func @transform_19(%arg0: i32) -> (i32, i32, i32) {
    %c0_i32 = arith.constant 0 : i32
    %c0_i32_0 = arith.constant 0 : i32
    %c0_i32_1 = arith.constant 0 : i32
    %c0_i32_2 = arith.constant 0 : i32
    return %c0_i32, %c0_i32_0, %c0_i32_1 : i32, i32, i32
  }
  func.func @transform_20(%arg0: i32) -> (i32, i32) {
    %c0_i32 = arith.constant 0 : i32
    %c0_i32_0 = arith.constant 0 : i32
    %c0_i32_1 = arith.constant 0 : i32
    return %c0_i32, %c0_i32_0 : i32, i32
  }
  func.func @transform_21(%arg0: i32) -> (i32, i32) {
    %c0_i32 = arith.constant 0 : i32
    %c0_i32_0 = arith.constant 0 : i32
    %c0_i32_1 = arith.constant 0 : i32
    return %c0_i32, %c0_i32_0 : i32, i32
  }
  func.func @transform_22(%arg0: i32) -> (i32, i32) {
    %c0_i32 = arith.constant 0 : i32
    %c0_i32_0 = arith.constant 0 : i32
    %c0_i32_1 = arith.constant 0 : i32
    return %c0_i32, %c0_i32_0 : i32, i32
  }
  func.func @transform_23(%arg0: i32) -> (i32, i32) {
    %c0_i32 = arith.constant 0 : i32
    %c0_i32_0 = arith.constant 0 : i32
    %c0_i32_1 = arith.constant 0 : i32
    return %c0_i32, %c0_i32_0 : i32, i32
  }
  func.func @transform_24(%arg0: i32) -> (i32, i32) {
    %c0_i32 = arith.constant 0 : i32
    %c0_i32_0 = arith.constant 0 : i32
    %c0_i32_1 = arith.constant 0 : i32
    return %c0_i32, %c0_i32_0 : i32, i32
  }
}

</mosaic_0001>

<bundles_post_ra>
// kernel: visobert_forward.1
= control target key start
LH: loop header
LB: loop body
LE: loop exit
PB: predicated region body
PF: predicated region fallthrough
CT: control target
= control target key end

     0   :  { %vm84_vm0 = vcmask 261120   ;;  %v5678_v15 = vmov 0.0   ;;  %vm5679_vm1 = vmmov 0   ;;  %vm342_vm2 = vcmask 64512   ;;  %s6701_s0 = inlined_call_operand.vmem [shape: f32[16,32], index: 0, kind: input, shape index: {}]   ;;  %s6702_s4 = inlined_call_operand.vmem [shape: bf16[2,4,32,8], index: 4, kind: input, shape index: {}]   ;;  %s6703_s6 = inlined_call_operand.vmem [shape: bf16[2,4,32,8], index: 6, kind: input, shape index: {}]   ;;  %s6704_s8 = inlined_call_operand.vmem [shape: bf16[2,4,32,8], index: 8, kind: input, shape index: {}]   ;;  %s6705_s2 = inlined_call_operand.vmem [shape: f32[1,32], index: 2, kind: input, shape index: {}]   ;;  %s6706_s3 = inlined_call_operand.vmem [shape: f32[1,32], index: 3, kind: input, shape index: {}]   ;;  %s6707_s7 = inlined_call_operand.vmem [shape: f32[2,4,1,8], index: 7, kind: input, shape index: {}]   ;;  %s6708_s5 = inlined_call_operand.vmem [shape: f32[2,4,1,8], index: 5, kind: input, shape index: {}]   ;;  %s6709_s9 = inlined_call_operand.vmem [shape: f32[2,4,1,8], index: 9, kind: input, shape index: {}]   ;;  %s6710_s1 = inlined_call_operand.vmem [shape: f32[2,1,8], index: 1, kind: input, shape index: {}]   ;;  %s6711_s10 = inlined_call_operand.vmem [shape: bf16[2,4,8,32], index: 10, kind: input, shape index: {}]   ;;  %s6712_s11 = inlined_call_operand.vmem [shape: f32[2,1,32], index: 11, kind: input, shape index: {}]   ;;  %s6713_s14 = inlined_call_operand.vmem [shape: bf16[2,32,64], index: 14, kind: input, shape index: {}]   ;;  %s6714_s12 = inlined_call_operand.vmem [shape: f32[2,1,32], index: 12, kind: input, shape index: {}]   ;;  %s6715_s13 = inlined_call_operand.vmem [shape: f32[2,1,32], index: 13, kind: input, shape index: {}]   ;;  %s6716_s16 = inlined_call_operand.vmem [shape: bf16[2,64,32], index: 16, kind: input, shape index: {}]   ;;  %s6717_s15 = inlined_call_operand.vmem [shape: f32[2,1,64], index: 15, kind: input, shape index: {}]   ;;  %s6718_s17 = inlined_call_operand.vmem [shape: f32[2,1,32], index: 17, kind: input, shape index: {}]   ;;  %s6719_s18 = inlined_call_operand.vmem [shape: f32[2,1,32], index: 18, kind: input, shape index: {}]   ;;  %s6720_s19 = inlined_call_operand.vmem [shape: f32[2,1,32], index: 19, kind: input, shape index: {}]   ;;  %s6721_s20 = inlined_call_operand.vmem [shape: bf16[32,32], index: 20, kind: input, shape index: {}]   ;;  %s6722_s22 = inlined_call_operand.vmem [shape: bf16[32,128], index: 22, kind: input, shape index: {}]   ;;  %s6723_s21 = inlined_call_operand.vmem [shape: f32[1,32], index: 21, kind: input, shape index: {}]   ;;  %s6724_s23 = inlined_call_operand.vmem [shape: f32[1,128], index: 23, kind: input, shape index: {}]   ;;  %s6725_s24 = inlined_call_operand.vmem [shape: f32[16,128], index: 24, kind: output, shape index: {}]  }
   0x1   :  { %6733 = sst [smem:[#allocation2_spill]] %s6701_s0  ;;  %5026 = vmatprep.subr.bf16.mxu0 %v5678_v15  ;;  %5034 = vmatprep.subr.bf16.mxu1 %v5678_v15  ;;  %vm460_vm3 = vcmask 1043456   ;;  %vm2172_vm4 = vcmask 523264  }
   0x2   :  { %6734 = sst [smem:[#allocation3_spill]] %s6702_s4  ;;  %s6742_s27 = sld [smem:[#allocation2_spill]]  ;;  %5030 = vmatprep.mubr.msk.bf16.mxu0 %vm5679_vm1, %v5678_v15  ;;  %5038 = vmatprep.mubr.msk.bf16.mxu1 %vm5679_vm1, %v5678_v15 }
   0x3   :  { %6735 = sst [smem:[#allocation4_spill]] %s6703_s6  ;;  %s6743_s0 = sld [smem:[#allocation3_spill]] }
   0x4   :  { %6736 = sst [smem:[#allocation5_spill]] %s6704_s8  ;;  %s6744_s8 = sld [smem:[#allocation4_spill]] }
   0x5   :  { %6737 = sst [smem:[#allocation6_spill]] %s6705_s2  ;;  %s6747_s30 = sld [smem:[#allocation5_spill]] }
   0x6   :  { %6738 = sst [smem:[#allocation7_spill]] %s6706_s3 }
   0x7   :  { %6739 = sst [smem:[#allocation8_spill]] %s6707_s7  ;;  %s6746_s6 = sld [smem:[#allocation7_spill]] }
   0x8   :  { %6740 = sst [smem:[#allocation9_spill]] %s6708_s5  ;;  %v80_v0 = vld [vmem:[%s6742_s27] sm:$0xff]  ;;  %v81_v1 = vld [vmem:[%s6742_s27 + $0x8] sm:$0xff]  ;;  %s6745_s27 = sld [smem:[#allocation6_spill]] }
   0x9   :  { %6741 = sst [smem:[#allocation10_spill]] %s6709_s9  ;;  %v85_v2 = vsel %vm84_vm0, %v80_v0, 0.0  ;;  %v88_v3 = vsel %vm84_vm0, %v81_v1, 0.0  ;;  %v5516_v14 = vld [vmem:[%s6743_s0] sm:$0xff]   ;;  %v5518_v17 = vld [vmem:[%s6743_s0 + $0x8] sm:$0xff]   ;;  %s6748_s3 = sld [smem:[#allocation8_spill]] }
   0xa   :  { %86 = vadd.xlane.f32.xlu0 %v85_v2  ;;  %v5517_v16 = vld [vmem:[%s6744_s8] sm:$0xff]   ;;  %5027 = vmatpush3.bf16.msra.mxu0 %v5516_v14  ;;  %v5519_v18 = vld [vmem:[%s6744_s8 + $0x8] sm:$0xff]   ;;  %s6749_s28 = sld [smem:[#allocation9_spill]]  ;;  %s6750_s29 = sld [smem:[#allocation10_spill]] }
   0xb   :  { %5035 = vmatpush3.bf16.msra.mxu1 %v5517_v16  ;;  %5028 = vmatprep.subr.bf16.mxu0 %v5678_v15  ;;  %v5520_v35 = vld [vmem:[%s6747_s30] sm:$0xff]   ;;  %v5521_v37 = vld [vmem:[%s6747_s30 + $0x8] sm:$0xff]  }
   0xc   :  { %5036 = vmatprep.subr.bf16.mxu1 %v5678_v15 }
   0xd   :  { %v4544_v31 = vld [vmem:[%s6746_s6] ss:$0 sm:$0xff] }
   0xe   :  { %89 = vadd.xlane.f32.xlu0 %v88_v3  ;;  %5029 = vmatpush3.bf16.msra.mxu0 %v5518_v17  ;;  %v4543_v27 = vld [vmem:[%s6745_s27] ss:$0 sm:$0xff] }
   0xf   :  { %5037 = vmatpush3.bf16.msra.mxu1 %v5519_v18  ;;  %5042 = vmatprep.subr.bf16.mxu0 %v5678_v15  ;;  %v4549_v38 = vld [vmem:[%s6748_s3] ss:$0 sm:$0xff] }
  0x10   :  { %5050 = vmatprep.subr.bf16.mxu1 %v5678_v15  ;;  %v4545_v50 = vld [vmem:[%s6749_s28] ss:$0 sm:$0xff] }
  0x11   :  { %v4553_v53 = vld [vmem:[%s6750_s29] ss:$0 sm:$0xff] }
  0x97   :  { %v87_v4 = vpop.xlane.xlu0 %86 }
  0x98   :  { %v92_v5 = vmul.f32 0.03125, %v87_v4 }
  0x9a   :  { %v94_v6 = vsub.f32 %v80_v0, %v92_v5  ;;  %v5897_v5 = vld [vmem:[%s6710_s1] ss:$0 sm:$0xff] }
  0x9b   :  { %v90_v7 = vpop.xlane.xlu0 %89 }
  0x9c   :  { %v93_v8 = vmul.f32 0.03125, %v90_v7  ;;  %v96_v9 = vmul.f32 %v94_v6, %v94_v6  ;;  %v5902_v7 = vld [vmem:[%s6710_s1 + $0x1] ss:$0 sm:$0xff] }
  0x9e   :  { %v95_v10 = vsub.f32 %v81_v1, %v93_v8  ;;  %v98_v11 = vsel %vm84_vm0, %v96_v9, 0.0 }
  0x9f   :  { %99 = vadd.xlane.f32.xlu1 %v98_v11 }
  0xa0   :  { %v97_v12 = vmul.f32 %v95_v10, %v95_v10 }
  0xa2   :  { %v101_v13 = vsel %vm84_vm0, %v97_v12, 0.0 }
  0xa3   :  { %102 = vadd.xlane.f32.xlu1 %v101_v13 }
 0x12c   :  { %v100_v19 = vpop.xlane.xlu1 %99 }
 0x12d   :  { %v104_v20 = vmul.f32 0.03125, %v100_v19 }
 0x12f   :  { %v106_v21 = vadd.f32 1e-12, %v104_v20 }
 0x130   :  { %v103_v22 = vpop.xlane.xlu1 %102 }
 0x131   :  { %5580 = vrsqrt.f32 %v106_v21  ;;  %v105_v23 = vmul.f32 0.03125, %v103_v22 }
 0x133   :  { %v107_v24 = vadd.f32 1e-12, %v105_v23 }
 0x135   :  { %5582 = vrsqrt.f32 %v107_v24 }
 0x13b   :  { %v5581_v25 = vpop.eup %5580 }
 0x13c   :  { %v110_v26 = vmul.f32 %v5581_v25, %v94_v6 }
 0x13e   :  { %v118_v29 = vmul.f32 %v4543_v27, %v110_v26 }
 0x13f   :  { %v5583_v28 = vpop.eup %5582 }
 0x140   :  { %v111_v30 = vmul.f32 %v5583_v28, %v95_v10  ;;  %v5843_v33 = vadd.f32 %v4544_v31, %v118_v29 }
 0x142   :  { %v119_v32 = vmul.f32 %v4543_v27, %v111_v30  ;;  %v5522_v27 = vld [vmem:[%s6743_s0 + $0x10] sm:$0xff]  }
 0x143   :  { %v5523_v30 = vld [vmem:[%s6744_s8 + $0x10] sm:$0xff]  }
 0x144   :  { %v5845_v34 = vadd.f32 %v4544_v31, %v119_v32  ;;  %v5524_v32 = vld [vmem:[%s6743_s0 + $0x18] sm:$0xff]  }
 0x146   :  { %v5852_v36 = vpack.c.bf16 %v5845_v34, %v5843_v33 }
 0x148   :  { %5031 = vmatmul.mubr.msk.bf16.vlgmr.msra.gmra.mrb[0].mxu0 %vm84_vm0, %v5852_v36  ;;  %5039 = vmatmul.mubr.msk.bf16.vlgmr.msra.gmra.mrb[0].mxu1 %vm84_vm0, %v5852_v36 }
 0x149   :  { %5043 = vmatpush3.bf16.msra.mxu0 %v5520_v35  ;;  %5046 = vmatprep.mubr.msk.bf16.mxu0 %vm5679_vm1, %v5678_v15  ;;  %v5525_v35 = vld [vmem:[%s6744_s8 + $0x18] sm:$0xff]  }
 0x14a   :  { %5044 = vmatprep.subr.bf16.mxu0 %v5678_v15  ;;  %5052 = vmatprep.mubr.msk.bf16.mxu1 %vm5679_vm1, %v5678_v15 }
 0x14d   :  { %5045 = vmatpush3.bf16.msra.mxu0 %v5521_v37  ;;  %v5526_v37 = vld [vmem:[%s6747_s30 + $0x10] sm:$0xff]  }
 0x14e   :  { %5056 = vmatprep.subr.bf16.mxu0 %v5678_v15 }
 0x150   :  { %5047 = vmatmul.mubr.msk.bf16.vlgmr.msra.gmra.mrb[4].mxu0 %vm84_vm0, %v5852_v36 }
 0x151   :  { %5058 = vmatprep.mubr.msk.bf16.mxu0 %vm5679_vm1, %v5678_v15 }
 0x21b   :  { %v189_v39 = vpop.f32.mrb[0].mxu0  ;;  %v253_v40 = vpop.f32.mrb[0].mxu1 }
 0x21c   :  { %v254_v41 = vadd.f32 %v4549_v38, %v253_v40  ;;  %v5032_v42 = vpop.f32.mrb[1].mxu0  ;;  %v5040_v43 = vpop.f32.mrb[1].mxu1  ;;  %v190_v54 = vadd.f32 %v4545_v50, %v189_v39 }
 0x21d   :  { %v192_v44 = vpop.f32.mrb[2].mxu0  ;;  %v256_v45 = vpop.f32.mrb[2].mxu1 }
 0x21e   :  { %v326_v46 = vpack.c.bf16 %v254_v41, %v254_v41  ;;  %v257_v47 = vadd.f32 %v4549_v38, %v256_v45  ;;  %v5033_v48 = vpop.f32.mrb[3].mxu0  ;;  %v5041_v49 = vpop.f32.mrb[3].mxu1  ;;  %v193_v57 = vadd.f32 %v4545_v50, %v192_v44  ;;  %v324_v61 = vpack.c.bf16 %v190_v54, %v190_v54  ;;  %v5527_v38 = vld [vmem:[%s6747_s30 + $0x18] sm:$0xff]  }
 0x21f   :  { %v4577_v48 = vld [vmem:[%s6748_s3 + $0x1] ss:$0 sm:$0xff] }
 0x220   :  { %v347_v51 = vsel %vm342_vm2, %v326_v46, 0  ;;  %v327_v52 = vpack.c.bf16 %v257_v47, %v257_v47  ;;  %v325_v1 = vpack.c.bf16 %v193_v57, %v193_v57 }
 0x221   :  { %5051 = vmatpush3.bf16.xpose.msra.mxu1 %v347_v51 }
 0x222   :  { %v393_v55 = vsel %vm342_vm2, %v327_v52, 0  ;;  %5062 = vmatprep.subr.bf16.mxu1 %v5678_v15 }
 0x223   :  { %v317_v56 = vpop.f32.mrb[4].mxu0  ;;  %5057 = vmatpush3.bf16.xpose.msra.mxu0 %v393_v55 }
 0x224   :  { %v318_v58 = vadd.f32 %v4553_v53, %v317_v56  ;;  %v5048_v59 = vpop.f32.mrb[5].mxu0  ;;  %5068 = vmatprep.subr.bf16.mxu0 %v5678_v15 }
 0x225   :  { %v320_v60 = vpop.f32.mrb[6].mxu0  ;;  %v4568_v59 = vld [vmem:[%s6749_s28 + $0x1] ss:$0 sm:$0xff] }
 0x226   :  { %v328_v62 = vpack.c.bf16 %v318_v58, %v318_v58  ;;  %v321_v63 = vadd.f32 %v4553_v53, %v320_v60  ;;  %v5049_v0 = vpop.f32.mrb[7].mxu0  ;;  %v4586_v60 = vld [vmem:[%s6750_s29 + $0x1] ss:$0 sm:$0xff] }
 0x228   :  { %v462_v2 = vsel %vm460_vm3, %v328_v62, 0  ;;  %v329_v3 = vpack.c.bf16 %v321_v63, %v321_v63  ;;  %5053 = vmatmul.mubr.msk.bf16.vlgmr.msra.gmra.mrb[4].mxu1 %vm342_vm2, %v324_v61 }
 0x229   :  { %5063 = vmatpush3.bf16.msra.mxu1 %v462_v2  ;;  %5064 = vmatprep.mubr.msk.bf16.mxu1 %vm5679_vm1, %v5678_v15 }
 0x22a   :  { %v508_v4 = vsel %vm460_vm3, %v329_v3, 0  ;;  %5059 = vmatmul.mubr.msk.bf16.vlgmr.msra.gmra.mrb[8].mxu0 %vm342_vm2, %v325_v1  ;;  %5074 = vmatprep.subr.bf16.mxu1 %v5678_v15 }
 0x22b   :  { %5069 = vmatpush3.bf16.msra.mxu0 %v508_v4  ;;  %5070 = vmatprep.mubr.msk.bf16.mxu0 %vm5679_vm1, %v5678_v15 }
 0x22c   :  { %5082 = vmatprep.subr.bf16.mxu0 %v5678_v15 }
 0x2fb   :  { %v383_v6 = vpop.f32.mrb[4].mxu1 }
 0x2fc   :  { %v384_v8 = vadd.f32 %v5897_v5, %v383_v6  ;;  %v5054_v9 = vpop.f32.mrb[5].mxu1 }
 0x2fd   :  { %v386_v10 = vpop.f32.mrb[6].mxu1  ;;  %v429_v11 = vpop.f32.mrb[8].mxu0 }
 0x2fe   :  { %v430_v12 = vadd.f32 %v5902_v7, %v429_v11  ;;  %v5055_v13 = vpop.f32.mrb[7].mxu1  ;;  %v5060_v14 = vpop.f32.mrb[9].mxu0  ;;  %v435_v16 = vsel %vm342_vm2, %v384_v8, -inf }
 0x2ff   :  { %436 = vmax.xlane.f32.xlu1 %v435_v16  ;;  %v432_v17 = vpop.f32.mrb[10].mxu0 }
 0x300   :  { %v5061_v18 = vpop.f32.mrb[11].mxu0  ;;  %v438_v19 = vsel %vm342_vm2, %v430_v12, -inf }
 0x301   :  { %439 = vmax.xlane.f32.xlu0 %v438_v19 }
 0x38c   :  { %v437_v20 = vpop.xlane.xlu1 %436 }
 0x38d   :  { %v441_v21 = vsub.f32 %v384_v8, %v437_v20 }
 0x38e   :  { %v440_v22 = vpop.xlane.xlu0 %439 }
 0x38f   :  { %v443_v23 = vmul.f32 1.442695, %v441_v21  ;;  %v442_v24 = vsub.f32 %v430_v12, %v440_v22 }
 0x391   :  { %5584 = vpow2.f32 %v443_v23  ;;  %v445_v25 = vmul.f32 1.442695, %v442_v24 }
 0x393   :  { %5586 = vpow2.f32 %v445_v25 }
 0x39b   :  { %v5908_v26 = vpop.eup %5584 }
 0x39c   :  { %v455_v28 = vpack.c.bf16 %v5908_v26, %v5908_v26 }
 0x39d   :  { %v5915_v29 = vpop.eup %5586 }
 0x39e   :  { %5065 = vmatmul.mubr.msk.bf16.vlgmr.msra.gmra.mrb[8].mxu1 %vm342_vm2, %v455_v28  ;;  %v456_v31 = vpack.c.bf16 %v5915_v29, %v5915_v29 }
 0x39f   :  { %5075 = vmatpush3.bf16.msra.mxu1 %v5522_v27  ;;  %5078 = vmatprep.mubr.msk.bf16.mxu1 %vm5679_vm1, %v5678_v15 }
 0x3a0   :  { %5071 = vmatmul.mubr.msk.bf16.vlgmr.msra.gmra.mrb[12].mxu0 %vm342_vm2, %v456_v31  ;;  %5076 = vmatprep.subr.bf16.mxu1 %v5678_v15  ;;  %v447_v31 = vsel %vm342_vm2, %v5908_v26, 0.0  ;;  %v553_v26 = vld [vmem:[%s6711_s10] sm:$0xf] }
 0x3a1   :  { %5083 = vmatpush3.bf16.msra.mxu0 %v5523_v30  ;;  %5086 = vmatprep.mubr.msk.bf16.mxu0 %vm5679_vm1, %v5678_v15 }
 0x3a2   :  { %5084 = vmatprep.subr.bf16.mxu0 %v5678_v15 }
 0x3a3   :  { %5077 = vmatpush3.bf16.msra.mxu1 %v5524_v32  ;;  %v450_v32 = vsel %vm342_vm2, %v5915_v29, 0.0 }
 0x3a4   :  { %5090 = vmatprep.subr.bf16.mxu1 %v5678_v15 }
 0x3a5   :  { %5085 = vmatpush3.bf16.msra.mxu0 %v5525_v35 }
 0x3a6   :  { %5079 = vmatmul.mubr.msk.bf16.vlgmr.msra.gmra.mrb[12].mxu1 %vm84_vm0, %v5852_v36  ;;  %5098 = vmatprep.subr.bf16.mxu0 %v5678_v15 }
 0x3a7   :  { %5091 = vmatpush3.bf16.msra.mxu1 %v5526_v37  ;;  %5094 = vmatprep.mubr.msk.bf16.mxu1 %vm5679_vm1, %v5678_v15 }
 0x3a8   :  { %5087 = vmatmul.mubr.msk.bf16.vlgmr.msra.gmra.mrb[16].mxu0 %vm84_vm0, %v5852_v36  ;;  %5092 = vmatprep.subr.bf16.mxu1 %v5678_v15 }
 0x3a9   :  { %5100 = vmatprep.mubr.msk.bf16.mxu0 %vm5679_vm1, %v5678_v15 }
 0x3ab   :  { %5093 = vmatpush3.bf16.msra.mxu1 %v5527_v38 }
 0x3ac   :  { %5104 = vmatprep.subr.bf16.mxu1 %v5678_v15 }
 0x3ae   :  { %5095 = vmatmul.mubr.msk.bf16.vlgmr.msra.gmra.mrb[16].mxu1 %vm84_vm0, %v5852_v36 }
 0x3af   :  { %5106 = vmatprep.mubr.msk.bf16.mxu1 %vm5679_vm1, %v5678_v15 }
 0x471   :  { %v5958_v39 = vpop.f32.mrb[8].mxu1 }
 0x472   :  { %v5066_v40 = vpop.f32.mrb[9].mxu1 }
 0x473   :  { %v501_v41 = vpop.f32.mrb[10].mxu1  ;;  %v5960_v42 = vpop.f32.mrb[12].mxu0 }
 0x474   :  { %v5067_v43 = vpop.f32.mrb[11].mxu1  ;;  %v5072_v44 = vpop.f32.mrb[13].mxu0 }
 0x475   :  { %v547_v45 = vpop.f32.mrb[14].mxu0 }
 0x476   :  { %v5073_v46 = vpop.f32.mrb[15].mxu0 }
 0x479   :  { %v613_v47 = vpop.f32.mrb[12].mxu1 }
 0x47a   :  { %v5080_v49 = vpop.f32.mrb[13].mxu1  ;;  %v614_v0 = vadd.f32 %v4568_v59, %v613_v47 }
 0x47b   :  { %v616_v50 = vpop.f32.mrb[14].mxu1  ;;  %v679_v51 = vpop.f32.mrb[16].mxu0 }
 0x47c   :  { %v680_v52 = vadd.f32 %v4577_v48, %v679_v51  ;;  %v5081_v53 = vpop.f32.mrb[15].mxu1  ;;  %v5088_v54 = vpop.f32.mrb[17].mxu0  ;;  %v617_v6 = vadd.f32 %v4568_v59, %v616_v50  ;;  %v752_v11 = vpack.c.bf16 %v614_v0, %v614_v0 }
 0x47d   :  { %v682_v55 = vpop.f32.mrb[18].mxu0  ;;  %v1020_v53 = vsel %vm460_vm3, %v553_v26, 0 }
 0x47e   :  { %v754_v56 = vpack.c.bf16 %v680_v52, %v680_v52  ;;  %v683_v57 = vadd.f32 %v4577_v48, %v682_v55  ;;  %v5089_v58 = vpop.f32.mrb[19].mxu0  ;;  %v753_v13 = vpack.c.bf16 %v617_v6, %v617_v6 }
 0x480   :  { %v762_v61 = vsel %vm342_vm2, %v754_v56, 0  ;;  %v755_v62 = vpack.c.bf16 %v683_v57, %v683_v57  ;;  %v5528_v57 = vld [vmem:[%s6744_s8 + $0x20] sm:$0xff]  }
 0x481   :  { %v745_v63 = vpop.f32.mrb[16].mxu1  ;;  %5099 = vmatpush3.bf16.xpose.msra.mxu0 %v762_v61 }
 0x482   :  { %v808_v1 = vsel %vm342_vm2, %v755_v62, 0  ;;  %v746_v2 = vadd.f32 %v4586_v60, %v745_v63  ;;  %v5096_v3 = vpop.f32.mrb[17].mxu1  ;;  %5110 = vmatprep.subr.bf16.mxu0 %v5678_v15 }
 0x483   :  { %v748_v4 = vpop.f32.mrb[18].mxu1  ;;  %5105 = vmatpush3.bf16.xpose.msra.mxu1 %v808_v1 }
 0x484   :  { %v756_v8 = vpack.c.bf16 %v746_v2, %v746_v2  ;;  %v749_v9 = vadd.f32 %v4586_v60, %v748_v4  ;;  %v5097_v10 = vpop.f32.mrb[19].mxu1  ;;  %5116 = vmatprep.subr.bf16.mxu1 %v5678_v15 }
 0x485   :  { %v5530_v10 = vld [vmem:[%s6743_s0 + $0x20] sm:$0xff]  }
 0x486   :  { %v757_v12 = vpack.c.bf16 %v749_v9, %v749_v9  ;;  %v876_v14 = vsel %vm460_vm3, %v756_v8, 0 }
 0x488   :  { %5101 = vmatmul.mubr.msk.bf16.vlgmr.msra.gmra.mrb[20].mxu0 %vm342_vm2, %v752_v11  ;;  %v922_v16 = vsel %vm460_vm3, %v757_v12, 0 }
 0x489   :  { %5111 = vmatpush3.bf16.msra.mxu0 %v876_v14  ;;  %5112 = vmatprep.mubr.msk.bf16.mxu0 %vm5679_vm1, %v5678_v15 }
 0x48a   :  { %5107 = vmatmul.mubr.msk.bf16.vlgmr.msra.gmra.mrb[20].mxu1 %vm342_vm2, %v753_v13  ;;  %5122 = vmatprep.subr.bf16.mxu0 %v5678_v15  ;;  %v5531_v13 = vld [vmem:[%s6743_s0 + $0x28] sm:$0xff]  }
 0x48b   :  { %5117 = vmatpush3.bf16.msra.mxu1 %v922_v16  ;;  %5118 = vmatprep.mubr.msk.bf16.mxu1 %vm5679_vm1, %v5678_v15 }
 0x48c   :  { %5128 = vmatprep.subr.bf16.mxu1 %v5678_v15 }
 0x55b   :  { %v798_v17 = vpop.f32.mrb[20].mxu0 }
 0x55c   :  { %v799_v18 = vadd.f32 %v5897_v5, %v798_v17  ;;  %v5102_v19 = vpop.f32.mrb[21].mxu0 }
 0x55d   :  { %v801_v20 = vpop.f32.mrb[22].mxu0  ;;  %v844_v21 = vpop.f32.mrb[20].mxu1 }
 0x55e   :  { %v845_v22 = vadd.f32 %v5902_v7, %v844_v21  ;;  %v5103_v23 = vpop.f32.mrb[23].mxu0  ;;  %v5108_v24 = vpop.f32.mrb[21].mxu1  ;;  %v850_v25 = vsel %vm342_vm2, %v799_v18, -inf  ;;  %v4611_v20 = vld [vmem:[%s6748_s3 + $0x2] ss:$0 sm:$0xff]  ;;  %v5533_v21 = vld [vmem:[%s6747_s30 + $0x28] sm:$0xff]  }
 0x55f   :  { %v847_v27 = vpop.f32.mrb[22].mxu1  ;;  %851 = vmax.xlane.f32.xlu0 %v850_v25 }
 0x560   :  { %v5109_v28 = vpop.f32.mrb[23].mxu1  ;;  %v853_v30 = vsel %vm342_vm2, %v845_v22, -inf }
 0x561   :  { %854 = vmax.xlane.f32.xlu1 %v853_v30 }
 0x563   :  { %448 = vadd.xlane.f32.xlu0 %v447_v31 }
 0x565   :  { %451 = vadd.xlane.f32.xlu1 %v450_v32 }
 0x5ec   :  { %v852_v35 = vpop.xlane.xlu0 %851 }
 0x5ed   :  { %v856_v37 = vsub.f32 %v799_v18, %v852_v35  ;;  %v5532_v18 = vld [vmem:[%s6747_s30 + $0x20] sm:$0xff]  }
 0x5ee   :  { %v855_v38 = vpop.xlane.xlu1 %854 }
 0x5ef   :  { %v858_v40 = vmul.f32 1.442695, %v856_v37  ;;  %v857_v41 = vsub.f32 %v845_v22, %v855_v38 }
 0x5f0   :  { %v449_v43 = vpop.xlane.xlu0 %448 }
 0x5f1   :  { %5588 = vpow2.f32 %v858_v40  ;;  %v860_v44 = vmul.f32 1.442695, %v857_v41 }
 0x5f2   :  { %5590 = vrcp.f32 %v449_v43  ;;  %v452_v45 = vpop.xlane.xlu1 %451 }
 0x5f3   :  { %5592 = vpow2.f32 %v860_v44 }
 0x5f4   :  { %5594 = vrcp.f32 %v452_v45  ;;  %v4602_v45 = vld [vmem:[%s6749_s28 + $0x2] ss:$0 sm:$0xff] }
 0x5fb   :  { %v5589_v46 = vpop.eup %5588 }
 0x5fc   :  { %v5591_v47 = vpop.eup %5590  ;;  %v862_v29 = vsel %vm342_vm2, %v5589_v46, 0.0  ;;  %v870_v48 = vpack.c.bf16 %v5589_v46, %v5589_v46 }
 0x5fd   :  { %v5593_v49 = vpop.eup %5592  ;;  %863 = vadd.xlane.f32.xlu0 %v862_v29  ;;  %v550_v54 = vmul.f32 %v5591_v47, %v5958_v39  ;;  %v5529_v39 = vld [vmem:[%s6744_s8 + $0x28] sm:$0xff]  }
 0x5fe   :  { %v5595_v50 = vpop.eup %5594  ;;  %5113 = vmatmul.mubr.msk.bf16.vlgmr.msra.gmra.mrb[24].mxu0 %vm342_vm2, %v870_v48  ;;  %v865_v51 = vsel %vm342_vm2, %v5593_v49, 0.0  ;;  %v871_v52 = vpack.c.bf16 %v5593_v49, %v5593_v49 }
 0x5ff   :  { %v551_v55 = vmul.f32 %v5595_v50, %v5960_v42  ;;  %866 = vadd.xlane.f32.xlu1 %v865_v51  ;;  %5124 = vmatprep.mubr.msk.bf16.mxu0 %vm5679_vm1, %v5678_v15  ;;  %v4594_v42 = vld [vmem:[%s6711_s10 + $0x4] sm:$0xf] }
 0x600   :  { %5119 = vmatmul.mubr.msk.bf16.vlgmr.msra.gmra.mrb[24].mxu1 %vm342_vm2, %v871_v52  ;;  %v973_v58 = vsel %vm460_vm3, %v4594_v42, 0  ;;  %v4620_v52 = vld [vmem:[%s6750_s29 + $0x2] ss:$0 sm:$0xff] }
 0x601   :  { %5129 = vmatpush3.bf16.msra.mxu1 %v1020_v53  ;;  %5130 = vmatprep.mubr.msk.bf16.mxu1 %vm5679_vm1, %v5678_v15  ;;  %v552_v56 = vpack.c.bf16 %v551_v55, %v550_v54 }
 0x602   :  { %5142 = vmatprep.subr.bf16.mxu1 %v5678_v15  ;;  %5123 = vmatpush3.bf16.msra.mxu0 %v973_v58 }
 0x603   :  { %5134 = vmatprep.subr.bf16.mxu0 %v5678_v15 }
 0x608   :  { %5131 = vmatmul.mubr.msk.bf16.vlgmr.msra.gmra.mrb[28].mxu1 %vm342_vm2, %v552_v56 }
 0x609   :  { %5143 = vmatpush3.bf16.msra.mxu1 %v5528_v57  ;;  %5146 = vmatprep.mubr.msk.bf16.mxu1 %vm5679_vm1, %v5678_v15 }
 0x60a   :  { %5144 = vmatprep.subr.bf16.mxu1 %v5678_v15 }
 0x60d   :  { %5145 = vmatpush3.bf16.msra.mxu1 %v5529_v39 }
 0x60e   :  { %5158 = vmatprep.subr.bf16.mxu1 %v5678_v15 }
 0x610   :  { %5147 = vmatmul.mubr.msk.bf16.vlgmr.msra.gmra.mrb[32].mxu1 %vm84_vm0, %v5852_v36 }
 0x611   :  { %5160 = vmatprep.mubr.msk.bf16.mxu1 %vm5679_vm1, %v5678_v15 }
 0x68a   :  { %v864_v59 = vpop.xlane.xlu0 %863 }
 0x68b   :  { %5596 = vrcp.f32 %v864_v59 }
 0x68c   :  { %v867_v60 = vpop.xlane.xlu1 %866 }
 0x68d   :  { %5598 = vrcp.f32 %v867_v60 }
 0x695   :  { %v5597_v62 = vpop.eup %5596 }
 0x697   :  { %v5599_v0 = vpop.eup %5598 }
 0x6d1   :  { %v912_v61 = vpop.f32.mrb[24].mxu0 }
 0x6d2   :  { %v5114_v63 = vpop.f32.mrb[25].mxu0  ;;  %v964_v3 = vmul.f32 %v5597_v62, %v912_v61 }
 0x6d3   :  { %v915_v1 = vpop.f32.mrb[26].mxu0  ;;  %v958_v2 = vpop.f32.mrb[24].mxu1 }
 0x6d4   :  { %v965_v4 = vmul.f32 %v5599_v0, %v958_v2  ;;  %v5115_v6 = vpop.f32.mrb[27].mxu0  ;;  %v5120_v8 = vpop.f32.mrb[25].mxu1 }
 0x6d5   :  { %v961_v9 = vpop.f32.mrb[26].mxu1 }
 0x6d6   :  { %v966_v11 = vpack.c.bf16 %v965_v4, %v964_v3  ;;  %v5121_v12 = vpop.f32.mrb[27].mxu1 }
 0x6d8   :  { %5125 = vmatmul.mubr.msk.bf16.vlgmr.msra.gmra.mrb[28].mxu0 %vm342_vm2, %v966_v11 }
 0x6d9   :  { %5135 = vmatpush3.bf16.msra.mxu0 %v5530_v10  ;;  %5138 = vmatprep.mubr.msk.bf16.mxu0 %vm5679_vm1, %v5678_v15 }
 0x6da   :  { %5136 = vmatprep.subr.bf16.mxu0 %v5678_v15 }
 0x6db   :  { %v1056_v14 = vpop.f32.mrb[28].mxu1 }
 0x6dc   :  { %v5132_v16 = vpop.f32.mrb[29].mxu1 }
 0x6dd   :  { %5137 = vmatpush3.bf16.msra.mxu0 %v5531_v13  ;;  %v1059_v17 = vpop.f32.mrb[30].mxu1 }
 0x6de   :  { %v5133_v19 = vpop.f32.mrb[31].mxu1  ;;  %5150 = vmatprep.subr.bf16.mxu0 %v5678_v15 }
 0x6e0   :  { %5139 = vmatmul.mubr.msk.bf16.vlgmr.msra.gmra.mrb[32].mxu0 %vm84_vm0, %v5852_v36 }
 0x6e1   :  { %5151 = vmatpush3.bf16.msra.mxu0 %v5532_v18  ;;  %5154 = vmatprep.mubr.msk.bf16.mxu0 %vm5679_vm1, %v5678_v15 }
 0x6e2   :  { %5152 = vmatprep.subr.bf16.mxu0 %v5678_v15 }
 0x6e3   :  { %v1188_v22 = vpop.f32.mrb[32].mxu1 }
 0x6e4   :  { %v1189_v23 = vadd.f32 %v4611_v20, %v1188_v22  ;;  %v5148_v24 = vpop.f32.mrb[33].mxu1  ;;  %v5534_v22 = vld [vmem:[%s6743_s0 + $0x30] sm:$0xff]  }
 0x6e5   :  { %5153 = vmatpush3.bf16.msra.mxu0 %v5533_v21  ;;  %v1191_v25 = vpop.f32.mrb[34].mxu1 }
 0x6e6   :  { %v1263_v27 = vpack.c.bf16 %v1189_v23, %v1189_v23  ;;  %v1192_v28 = vadd.f32 %v4611_v20, %v1191_v25  ;;  %v5149_v30 = vpop.f32.mrb[35].mxu1  ;;  %5164 = vmatprep.subr.bf16.mxu0 %v5678_v15  ;;  %v5535_v25 = vld [vmem:[%s6743_s0 + $0x38] sm:$0xff]  }
 0x6e7   :  { %v4628_v30 = vld [vmem:[%s6711_s10 + $0x8] sm:$0xf] }
 0x6e8   :  { %v1271_v31 = vsel %vm342_vm2, %v1263_v27, 0  ;;  %5155 = vmatmul.mubr.msk.bf16.vlgmr.msra.gmra.mrb[36].mxu0 %vm84_vm0, %v5852_v36  ;;  %v1264_v32 = vpack.c.bf16 %v1192_v28, %v1192_v28  ;;  %v5536_v27 = vld [vmem:[%s6747_s30 + $0x30] sm:$0xff]   ;;  %v5537_v28 = vld [vmem:[%s6747_s30 + $0x38] sm:$0xff]  }
 0x6e9   :  { %5159 = vmatpush3.bf16.xpose.msra.mxu1 %v1271_v31  ;;  %5166 = vmatprep.mubr.msk.bf16.mxu0 %vm5679_vm1, %v5678_v15  ;;  %v1482_v31 = vsel %vm460_vm3, %v4628_v30, 0 }
 0x6ea   :  { %5170 = vmatprep.subr.bf16.mxu1 %v5678_v15  ;;  %v1317_v35 = vsel %vm342_vm2, %v1264_v32, 0 }
 0x6ee   :  { %5165 = vmatpush3.bf16.xpose.msra.mxu0 %v1317_v35 }
 0x6ef   :  { %5176 = vmatprep.subr.bf16.mxu0 %v5678_v15 }
 0x7ab   :  { %v1009_v37 = vpop.f32.mrb[28].mxu0 }
 0x7ac   :  { %v6062_v38 = vadd.f32 %v1056_v14, %v1009_v37  ;;  %v5126_v40 = vpop.f32.mrb[29].mxu0 }
 0x7ad   :  { %v1012_v41 = vpop.f32.mrb[30].mxu0 }
 0x7ae   :  { %v6064_v43 = vadd.f32 %v1059_v17, %v1012_v41  ;;  %v5127_v44 = vpop.f32.mrb[31].mxu0 }
 0x7b3   :  { %v1122_v46 = vpop.f32.mrb[32].mxu0 }
 0x7b4   :  { %v1123_v26 = vadd.f32 %v4602_v45, %v1122_v46  ;;  %v5140_v47 = vpop.f32.mrb[33].mxu0 }
 0x7b5   :  { %v1125_v29 = vpop.f32.mrb[34].mxu0 }
 0x7b6   :  { %v1261_v48 = vpack.c.bf16 %v1123_v26, %v1123_v26  ;;  %v1126_v49 = vadd.f32 %v4602_v45, %v1125_v29  ;;  %v5141_v50 = vpop.f32.mrb[35].mxu0 }
 0x7b7   :  { %v5538_v50 = vld [vmem:[%s6744_s8 + $0x30] sm:$0xff]  }
 0x7b8   :  { %v1262_v51 = vpack.c.bf16 %v1126_v49, %v1126_v49  ;;  %5161 = vmatmul.mubr.msk.bf16.vlgmr.msra.gmra.mrb[36].mxu1 %vm342_vm2, %v1261_v48 }
 0x7b9   :  { %5172 = vmatprep.mubr.msk.bf16.mxu1 %vm5679_vm1, %v5678_v15 }
 0x7ba   :  { %5167 = vmatmul.mubr.msk.bf16.vlgmr.msra.gmra.mrb[40].mxu0 %vm342_vm2, %v1262_v51 }
 0x7bb   :  { %v1254_v53 = vpop.f32.mrb[36].mxu0  ;;  %5178 = vmatprep.mubr.msk.bf16.mxu0 %vm5679_vm1, %v5678_v15 }
 0x7bc   :  { %v1255_v54 = vadd.f32 %v4620_v52, %v1254_v53  ;;  %v5156_v55 = vpop.f32.mrb[37].mxu0  ;;  %v5539_v53 = vld [vmem:[%s6744_s8 + $0x38] sm:$0xff]  }
 0x7bd   :  { %v1257_v56 = vpop.f32.mrb[38].mxu0 }
 0x7be   :  { %v1265_v57 = vpack.c.bf16 %v1255_v54, %v1255_v54  ;;  %v1258_v39 = vadd.f32 %v4620_v52, %v1257_v56  ;;  %v5157_v42 = vpop.f32.mrb[39].mxu0 }
 0x7c0   :  { %v1385_v58 = vsel %vm460_vm3, %v1265_v57, 0  ;;  %v1266_v59 = vpack.c.bf16 %v1258_v39, %v1258_v39 }
 0x7c1   :  { %5171 = vmatpush3.bf16.msra.mxu1 %v1385_v58 }
 0x7c2   :  { %v1431_v60 = vsel %vm460_vm3, %v1266_v59, 0  ;;  %5182 = vmatprep.subr.bf16.mxu1 %v5678_v15 }
 0x7c3   :  { %5177 = vmatpush3.bf16.msra.mxu0 %v1431_v60 }
 0x7c4   :  { %5188 = vmatprep.subr.bf16.mxu0 %v5678_v15 }
 0x88b   :  { %v1307_v61 = vpop.f32.mrb[36].mxu1 }
 0x88c   :  { %v1308_v62 = vadd.f32 %v5897_v5, %v1307_v61  ;;  %v5162_v63 = vpop.f32.mrb[37].mxu1 }
 0x88d   :  { %v1310_v0 = vpop.f32.mrb[38].mxu1  ;;  %v1353_v1 = vpop.f32.mrb[40].mxu0 }
 0x88e   :  { %v1354_v2 = vadd.f32 %v5902_v7, %v1353_v1  ;;  %v5163_v3 = vpop.f32.mrb[39].mxu1  ;;  %v5168_v4 = vpop.f32.mrb[41].mxu0  ;;  %v1359_v6 = vsel %vm342_vm2, %v1308_v62, -inf }
 0x88f   :  { %1360 = vmax.xlane.f32.xlu0 %v1359_v6  ;;  %v1356_v8 = vpop.f32.mrb[42].mxu0  ;;  %v4653_v6 = vld [vmem:[%s6750_s29 + $0x3] ss:$0 sm:$0xff] }
 0x890   :  { %v5169_v9 = vpop.f32.mrb[43].mxu0  ;;  %v1362_v10 = vsel %vm342_vm2, %v1354_v2, -inf }
 0x891   :  { %1363 = vmax.xlane.f32.xlu1 %v1362_v10 }
 0x91c   :  { %v1361_v11 = vpop.xlane.xlu0 %1360 }
 0x91d   :  { %v1365_v12 = vsub.f32 %v1308_v62, %v1361_v11 }
 0x91e   :  { %v1364_v13 = vpop.xlane.xlu1 %1363 }
 0x91f   :  { %v1367_v14 = vmul.f32 1.442695, %v1365_v12  ;;  %v1366_v16 = vsub.f32 %v1354_v2, %v1364_v13 }
 0x921   :  { %5600 = vpow2.f32 %v1367_v14  ;;  %v1369_v17 = vmul.f32 1.442695, %v1366_v16 }
 0x923   :  { %5602 = vpow2.f32 %v1369_v17 }
 0x92b   :  { %v5601_v18 = vpop.eup %5600 }
 0x92c   :  { %v1371_v19 = vsel %vm342_vm2, %v5601_v18, 0.0  ;;  %v1379_v20 = vpack.c.bf16 %v5601_v18, %v5601_v18 }
 0x92d   :  { %v5603_v21 = vpop.eup %5602  ;;  %1372 = vadd.xlane.f32.xlu0 %v1371_v19 }
 0x92e   :  { %5173 = vmatmul.mubr.msk.bf16.vlgmr.msra.gmra.mrb[40].mxu1 %vm342_vm2, %v1379_v20  ;;  %v1374_v23 = vsel %vm342_vm2, %v5603_v21, 0.0  ;;  %v1380_v24 = vpack.c.bf16 %v5603_v21, %v5603_v21 }
 0x92f   :  { %1375 = vadd.xlane.f32.xlu1 %v1374_v23  ;;  %5184 = vmatprep.mubr.msk.bf16.mxu1 %vm5679_vm1, %v5678_v15 }
 0x930   :  { %5179 = vmatmul.mubr.msk.bf16.vlgmr.msra.gmra.mrb[44].mxu0 %vm342_vm2, %v1380_v24  ;;  %5183 = vmatpush3.bf16.msra.mxu1 %v1482_v31 }
 0x931   :  { %5189 = vmatpush3.bf16.msra.mxu0 %v5534_v22  ;;  %5192 = vmatprep.mubr.msk.bf16.mxu0 %vm5679_vm1, %v5678_v15 }
 0x932   :  { %5190 = vmatprep.subr.bf16.mxu0 %v5678_v15  ;;  %5196 = vmatprep.subr.bf16.mxu1 %v5678_v15 }
 0x935   :  { %5191 = vmatpush3.bf16.msra.mxu0 %v5535_v25 }
 0x936   :  { %5204 = vmatprep.subr.bf16.mxu0 %v5678_v15 }
 0x938   :  { %5193 = vmatmul.mubr.msk.bf16.vlgmr.msra.gmra.mrb[48].mxu0 %vm84_vm0, %v5852_v36 }
 0x939   :  { %5205 = vmatpush3.bf16.msra.mxu0 %v5536_v27  ;;  %5208 = vmatprep.mubr.msk.bf16.mxu0 %vm5679_vm1, %v5678_v15 }
 0x93a   :  { %5206 = vmatprep.subr.bf16.mxu0 %v5678_v15 }
 0x93d   :  { %5207 = vmatpush3.bf16.msra.mxu0 %v5537_v28 }
 0x93e   :  { %5218 = vmatprep.subr.bf16.mxu0 %v5678_v15 }
 0x940   :  { %5209 = vmatmul.mubr.msk.bf16.vlgmr.msra.gmra.mrb[52].mxu0 %vm84_vm0, %v5852_v36 }
 0x941   :  { %5220 = vmatprep.mubr.msk.bf16.mxu0 %vm5679_vm1, %v5678_v15 }
 0x9ba   :  { %v1373_v32 = vpop.xlane.xlu0 %1372 }
 0x9bb   :  { %5604 = vrcp.f32 %v1373_v32 }
 0x9bc   :  { %v1376_v35 = vpop.xlane.xlu1 %1375 }
 0x9bd   :  { %5606 = vrcp.f32 %v1376_v35 }
 0x9c5   :  { %v5605_v40 = vpop.eup %5604 }
 0x9c7   :  { %v5607_v44 = vpop.eup %5606 }
 0xa01   :  { %v1421_v37 = vpop.f32.mrb[40].mxu1 }
 0xa02   :  { %v5174_v41 = vpop.f32.mrb[41].mxu1  ;;  %v1473_v26 = vmul.f32 %v5605_v40, %v1421_v37 }
 0xa03   :  { %v1424_v45 = vpop.f32.mrb[42].mxu1  ;;  %v1467_v46 = vpop.f32.mrb[44].mxu0 }
 0xa04   :  { %v1474_v47 = vmul.f32 %v5607_v44, %v1467_v46  ;;  %v5175_v29 = vpop.f32.mrb[43].mxu1  ;;  %v5180_v48 = vpop.f32.mrb[45].mxu0 }
 0xa05   :  { %v1470_v49 = vpop.f32.mrb[46].mxu0 }
 0xa06   :  { %v1475_v51 = vpack.c.bf16 %v1474_v47, %v1473_v26  ;;  %v5181_v52 = vpop.f32.mrb[47].mxu0 }
 0xa08   :  { %5185 = vmatmul.mubr.msk.bf16.vlgmr.msra.gmra.mrb[44].mxu1 %vm342_vm2, %v1475_v51 }
 0xa09   :  { %5197 = vmatpush3.bf16.msra.mxu1 %v5538_v50  ;;  %5200 = vmatprep.mubr.msk.bf16.mxu1 %vm5679_vm1, %v5678_v15 }
 0xa0a   :  { %5198 = vmatprep.subr.bf16.mxu1 %v5678_v15 }
 0xa0b   :  { %v1586_v54 = vpop.f32.mrb[48].mxu0 }
 0xa0c   :  { %v5194_v55 = vpop.f32.mrb[49].mxu0 }
 0xa0d   :  { %v1589_v56 = vpop.f32.mrb[50].mxu0  ;;  %5199 = vmatpush3.bf16.msra.mxu1 %v5539_v53 }
 0xa0e   :  { %v5195_v57 = vpop.f32.mrb[51].mxu0  ;;  %5212 = vmatprep.subr.bf16.mxu1 %v5678_v15 }
 0xa10   :  { %5201 = vmatmul.mubr.msk.bf16.vlgmr.msra.gmra.mrb[48].mxu1 %vm84_vm0, %v5852_v36  ;;  %v4644_v36 = vld [vmem:[%s6748_s3 + $0x3] ss:$0 sm:$0xff] }
 0xa11   :  { %5214 = vmatprep.mubr.msk.bf16.mxu1 %vm5679_vm1, %v5678_v15 }
 0xa13   :  { %v1718_v39 = vpop.f32.mrb[52].mxu0 }
 0xa14   :  { %v5210_v42 = vpop.f32.mrb[53].mxu0  ;;  %v1719_v11 = vadd.f32 %v4653_v6, %v1718_v39 }
 0xa15   :  { %v1721_v58 = vpop.f32.mrb[54].mxu0 }
 0xa16   :  { %v5211_v59 = vpop.f32.mrb[55].mxu0  ;;  %v1722_v16 = vadd.f32 %v4653_v6, %v1721_v58  ;;  %v1729_v19 = vpack.c.bf16 %v1719_v11, %v1719_v11 }
 0xa18   :  { %v1730_v21 = vpack.c.bf16 %v1722_v16, %v1722_v16  ;;  %v1849_v23 = vsel %vm460_vm3, %v1729_v19, 0 }
 0xa1a   :  { %v1895_v24 = vsel %vm460_vm3, %v1730_v21, 0 }
 0xadb   :  { %v1518_v60 = vpop.f32.mrb[44].mxu1 }
 0xadc   :  { %v6139_v61 = vadd.f32 %v1518_v60, %v6062_v38  ;;  %v5186_v62 = vpop.f32.mrb[45].mxu1 }
 0xadd   :  { %v1521_v63 = vpop.f32.mrb[46].mxu1 }
 0xade   :  { %v6142_v0 = vadd.f32 %v1521_v63, %v6064_v43  ;;  %v5187_v1 = vpop.f32.mrb[47].mxu1  ;;  %v4635_v43 = vld [vmem:[%s6749_s28 + $0x3] ss:$0 sm:$0xff] }
 0xadf   :  { %v1587_v14 = vadd.f32 %v4635_v43, %v1586_v54  ;;  %v1590_v18 = vadd.f32 %v4635_v43, %v1589_v56  ;;  %v4661_v54 = vld [vmem:[%s6711_s10 + $0xc] sm:$0xf] }
 0xae0   :  { %v1946_v55 = vsel %vm460_vm3, %v4661_v54, 0  ;;  %v4666_v54 = vld [vmem:[%s6717_s15] ss:$0 sm:$0xff] }
 0xae1   :  { %v1725_v20 = vpack.c.bf16 %v1587_v14, %v1587_v14  ;;  %v1726_v22 = vpack.c.bf16 %v1590_v18, %v1590_v18 }
 0xae3   :  { %v1652_v2 = vpop.f32.mrb[48].mxu1 }
 0xae4   :  { %v1653_v3 = vadd.f32 %v4644_v36, %v1652_v2  ;;  %v5202_v4 = vpop.f32.mrb[49].mxu1 }
 0xae5   :  { %v1655_v8 = vpop.f32.mrb[50].mxu1 }
 0xae6   :  { %v1727_v38 = vpack.c.bf16 %v1653_v3, %v1653_v3  ;;  %v1656_v9 = vadd.f32 %v4644_v36, %v1655_v8  ;;  %v5203_v10 = vpop.f32.mrb[51].mxu1 }
 0xae8   :  { %v1735_v12 = vsel %vm342_vm2, %v1727_v38, 0  ;;  %v1728_v13 = vpack.c.bf16 %v1656_v9, %v1656_v9  ;;  %v4663_v38 = vld [vmem:[%s6712_s11] ss:$0 sm:$0xff] }
 0xae9   :  { %5213 = vmatpush3.bf16.xpose.msra.mxu1 %v1735_v12 }
 0xaea   :  { %v1781_v17 = vsel %vm342_vm2, %v1728_v13, 0  ;;  %5224 = vmatprep.subr.bf16.mxu1 %v5678_v15 }
 0xaeb   :  { %5219 = vmatpush3.bf16.xpose.msra.mxu0 %v1781_v17 }
 0xaec   :  { %5230 = vmatprep.subr.bf16.mxu0 %v5678_v15 }
 0xaf0   :  { %5215 = vmatmul.mubr.msk.bf16.vlgmr.msra.gmra.mrb[52].mxu1 %vm342_vm2, %v1725_v20 }
 0xaf1   :  { %5225 = vmatpush3.bf16.msra.mxu1 %v1849_v23  ;;  %5226 = vmatprep.mubr.msk.bf16.mxu1 %vm5679_vm1, %v5678_v15 }
 0xaf2   :  { %5221 = vmatmul.mubr.msk.bf16.vlgmr.msra.gmra.mrb[56].mxu0 %vm342_vm2, %v1726_v22  ;;  %5236 = vmatprep.subr.bf16.mxu1 %v5678_v15 }
 0xaf3   :  { %5231 = vmatpush3.bf16.msra.mxu0 %v1895_v24  ;;  %5232 = vmatprep.mubr.msk.bf16.mxu0 %vm5679_vm1, %v5678_v15 }
 0xaf4   :  { %5242 = vmatprep.subr.bf16.mxu0 %v5678_v15 }
 0xbc3   :  { %v1771_v25 = vpop.f32.mrb[52].mxu1 }
 0xbc4   :  { %v1772_v27 = vadd.f32 %v5897_v5, %v1771_v25  ;;  %v5216_v28 = vpop.f32.mrb[53].mxu1 }
 0xbc5   :  { %v1774_v30 = vpop.f32.mrb[54].mxu1  ;;  %v1817_v31 = vpop.f32.mrb[56].mxu0  ;;  %v5541_v28 = vld [vmem:[%s6713_s14 + $0x8] sm:$0xff]  }
 0xbc6   :  { %v1818_v32 = vadd.f32 %v5902_v7, %v1817_v31  ;;  %v5217_v35 = vpop.f32.mrb[55].mxu1  ;;  %v5222_v37 = vpop.f32.mrb[57].mxu0  ;;  %v1823_v40 = vsel %vm342_vm2, %v1772_v27, -inf }
 0xbc7   :  { %1824 = vmax.xlane.f32.xlu0 %v1823_v40  ;;  %v1820_v41 = vpop.f32.mrb[58].mxu0 }
 0xbc8   :  { %v5223_v44 = vpop.f32.mrb[59].mxu0  ;;  %v1826_v45 = vsel %vm342_vm2, %v1818_v32, -inf }
 0xbc9   :  { %1827 = vmax.xlane.f32.xlu1 %v1826_v45  ;;  %v4664_v44 = vld [vmem:[%s6714_s12] ss:$0 sm:$0xff] }
 0xc54   :  { %v1825_v46 = vpop.xlane.xlu0 %1824 }
 0xc55   :  { %v1829_v26 = vsub.f32 %v1772_v27, %v1825_v46 }
 0xc56   :  { %v1828_v47 = vpop.xlane.xlu1 %1827 }
 0xc57   :  { %v1831_v29 = vmul.f32 1.442695, %v1829_v26  ;;  %v1830_v5 = vsub.f32 %v1818_v32, %v1828_v47 }
 0xc59   :  { %5608 = vpow2.f32 %v1831_v29  ;;  %v1833_v48 = vmul.f32 1.442695, %v1830_v5  ;;  %v4665_v29 = vld [vmem:[%s6715_s13] ss:$0 sm:$0xff] }
 0xc5b   :  { %5610 = vpow2.f32 %v1833_v48 }
 0xc63   :  { %v5609_v49 = vpop.eup %5608 }
 0xc64   :  { %v1835_v7 = vsel %vm342_vm2, %v5609_v49, 0.0  ;;  %v1843_v50 = vpack.c.bf16 %v5609_v49, %v5609_v49 }
 0xc65   :  { %v5611_v51 = vpop.eup %5610  ;;  %1836 = vadd.xlane.f32.xlu0 %v1835_v7 }
 0xc66   :  { %5227 = vmatmul.mubr.msk.bf16.vlgmr.msra.gmra.mrb[56].mxu1 %vm342_vm2, %v1843_v50  ;;  %v1838_v52 = vsel %vm342_vm2, %v5611_v51, 0.0  ;;  %v1844_v53 = vpack.c.bf16 %v5611_v51, %v5611_v51  ;;  %v5542_v50 = vld [vmem:[%s6716_s16] sm:$0xff]   ;;  %v5543_v51 = vld [vmem:[%s6716_s16 + $0x8] sm:$0xff]  }
 0xc67   :  { %1839 = vadd.xlane.f32.xlu1 %v1838_v52  ;;  %5238 = vmatprep.mubr.msk.bf16.mxu1 %vm5679_vm1, %v5678_v15  ;;  %v5544_v52 = vld [vmem:[%s6716_s16 + $0x10] sm:$0xff]  }
 0xc68   :  { %5233 = vmatmul.mubr.msk.bf16.vlgmr.msra.gmra.mrb[60].mxu0 %vm342_vm2, %v1844_v53  ;;  %5237 = vmatpush3.bf16.msra.mxu1 %v1946_v55  ;;  %v5545_v53 = vld [vmem:[%s6716_s16 + $0x18] sm:$0xff]  }
 0xc69   :  { %5246 = vmatprep.mubr.msk.bf16.mxu0 %vm5679_vm1, %v5678_v15  ;;  %5250 = vmatprep.subr.bf16.mxu1 %v5678_v15 }
 0xcf2   :  { %v1837_v56 = vpop.xlane.xlu0 %1836 }
 0xcf3   :  { %5612 = vrcp.f32 %v1837_v56 }
 0xcf4   :  { %v1840_v57 = vpop.xlane.xlu1 %1839 }
 0xcf5   :  { %5614 = vrcp.f32 %v1840_v57 }
 0xcfd   :  { %v5613_v42 = vpop.eup %5612 }
 0xcff   :  { %v5615_v59 = vpop.eup %5614 }
 0xd39   :  { %v1885_v39 = vpop.f32.mrb[56].mxu1 }
 0xd3a   :  { %v5228_v58 = vpop.f32.mrb[57].mxu1  ;;  %v1937_v63 = vmul.f32 %v5613_v42, %v1885_v39 }
 0xd3b   :  { %v1888_v60 = vpop.f32.mrb[58].mxu1  ;;  %v1931_v62 = vpop.f32.mrb[60].mxu0 }
 0xd3c   :  { %v1938_v1 = vmul.f32 %v5615_v59, %v1931_v62  ;;  %v5229_v36 = vpop.f32.mrb[59].mxu1  ;;  %v5234_v2 = vpop.f32.mrb[61].mxu0 }
 0xd3d   :  { %v1934_v3 = vpop.f32.mrb[62].mxu0 }
 0xd3e   :  { %v1939_v4 = vpack.c.bf16 %v1938_v1, %v1937_v63  ;;  %v5235_v6 = vpop.f32.mrb[63].mxu0 }
 0xd40   :  { %5239 = vmatmul.mubr.msk.bf16.vlgmr.msra.gmra.mrb[60].mxu1 %vm342_vm2, %v1939_v4 }
 0xd41   :  { %5258 = vmatprep.mubr.msk.bf16.mxu1 %vm5679_vm1, %v5678_v15  ;;  %5251 = vmatpush3.bf16.msra.mxu1 %v5542_v50 }
 0xd42   :  { %5252 = vmatprep.subr.bf16.mxu1 %v5678_v15 }
 0xd45   :  { %5253 = vmatpush3.bf16.msra.mxu1 %v5543_v51 }
 0xd46   :  { %5254 = vmatprep.subr.bf16.mxu1 %v5678_v15 }
 0xd49   :  { %5255 = vmatpush3.bf16.msra.mxu1 %v5544_v52 }
 0xd4a   :  { %5256 = vmatprep.subr.bf16.mxu1 %v5678_v15 }
 0xd4d   :  { %5257 = vmatpush3.bf16.msra.mxu1 %v5545_v53 }
 0xd4e   :  { %5278 = vmatprep.subr.bf16.mxu1 %v5678_v15 }
 0xe13   :  { %v1982_v8 = vpop.f32.mrb[60].mxu1 }
 0xe14   :  { %v1989_v9 = vadd.f32 %v1982_v8, %v6139_v61  ;;  %v5240_v10 = vpop.f32.mrb[61].mxu1 }
 0xe15   :  { %v1985_v43 = vpop.f32.mrb[62].mxu1 }
 0xe16   :  { %v1998_v11 = vadd.f32 %v4663_v38, %v1989_v9  ;;  %v1990_v12 = vadd.f32 %v1985_v43, %v6142_v0  ;;  %v5241_v13 = vpop.f32.mrb[63].mxu1 }
 0xe18   :  { %v1999_v14 = vadd.f32 %v4663_v38, %v1990_v12  ;;  %v2000_v16 = vadd.f32 %v1998_v11, %v5843_v33 }
 0xe1a   :  { %v2004_v17 = vsel %vm84_vm0, %v2000_v16, 0.0  ;;  %v2001_v18 = vadd.f32 %v1999_v14, %v5845_v34  ;;  %v5540_v34 = vld [vmem:[%s6713_s14] sm:$0xff]  }
 0xe1b   :  { %2005 = vadd.xlane.f32.xlu0 %v2004_v17  ;;  %5243 = vmatpush3.bf16.msra.mxu0 %v5540_v34 }
 0xe1c   :  { %v2007_v19 = vsel %vm84_vm0, %v2001_v18, 0.0  ;;  %5244 = vmatprep.subr.bf16.mxu0 %v5678_v15 }
 0xe1d   :  { %2008 = vadd.xlane.f32.xlu1 %v2007_v19 }
 0xe1f   :  { %5245 = vmatpush3.bf16.msra.mxu0 %v5541_v28 }
 0xe20   :  { %5262 = vmatprep.subr.bf16.mxu0 %v5678_v15 }
 0xea8   :  { %v2006_v20 = vpop.xlane.xlu0 %2005 }
 0xea9   :  { %v2010_v21 = vmul.f32 0.03125, %v2006_v20 }
 0xeaa   :  { %v2009_v61 = vpop.xlane.xlu1 %2008 }
 0xeab   :  { %v2012_v22 = vsub.f32 %v2000_v16, %v2010_v21  ;;  %v2011_v23 = vmul.f32 0.03125, %v2009_v61  ;;  %v4670_v16 = vld [vmem:[%s6718_s17] ss:$0 sm:$0xff] }
 0xead   :  { %v2013_v24 = vsub.f32 %v2001_v18, %v2011_v23  ;;  %v2014_v25 = vmul.f32 %v2012_v22, %v2012_v22 }
 0xeaf   :  { %v2016_v0 = vsel %vm84_vm0, %v2014_v25, 0.0  ;;  %v2015_v27 = vmul.f32 %v2013_v24, %v2013_v24 }
 0xeb0   :  { %2017 = vadd.xlane.f32.xlu0 %v2016_v0 }
 0xeb1   :  { %v2019_v33 = vsel %vm84_vm0, %v2015_v27, 0.0 }
 0xeb2   :  { %2020 = vadd.xlane.f32.xlu1 %v2019_v33 }
 0xf3d   :  { %v2018_v30 = vpop.xlane.xlu0 %2017 }
 0xf3e   :  { %v2022_v31 = vmul.f32 0.03125, %v2018_v30 }
 0xf3f   :  { %v2021_v32 = vpop.xlane.xlu1 %2020 }
 0xf40   :  { %v2024_v35 = vadd.f32 1e-12, %v2022_v31  ;;  %v2023_v37 = vmul.f32 0.03125, %v2021_v32 }
 0xf42   :  { %5616 = vrsqrt.f32 %v2024_v35  ;;  %v2025_v40 = vadd.f32 1e-12, %v2023_v37 }
 0xf44   :  { %5618 = vrsqrt.f32 %v2025_v40  ;;  %v5546_v40 = vld [vmem:[%s6743_s0 + $0x40] sm:$0xff]  }
 0xf4c   :  { %v5617_v41 = vpop.eup %5616 }
 0xf4d   :  { %v2028_v45 = vmul.f32 %v5617_v41, %v2012_v22  ;;  %v5547_v41 = vld [vmem:[%s6747_s30 + $0x40] sm:$0xff]  }
 0xf4e   :  { %v5619_v46 = vpop.eup %5618 }
 0xf4f   :  { %v2036_v26 = vmul.f32 %v4664_v44, %v2028_v45  ;;  %v2029_v47 = vmul.f32 %v5619_v46, %v2013_v24  ;;  %v5549_v45 = vld [vmem:[%s6747_s30 + $0x48] sm:$0xff]  }
 0xf51   :  { %v2037_v5 = vmul.f32 %v4664_v44, %v2029_v47  ;;  %v2044_v48 = vadd.f32 %v4665_v29, %v2036_v26  ;;  %v5548_v44 = vld [vmem:[%s6743_s0 + $0x48] sm:$0xff]  }
 0xf53   :  { %v2045_v49 = vadd.f32 %v4665_v29, %v2037_v5 }
 0xf55   :  { %v2046_v7 = vpack.c.bf16 %v2045_v49, %v2044_v48 }
 0xf57   :  { %5247 = vmatmul.mubr.msk.bf16.vlgmr.msra.gmra.mrb[64].mxu0 %vm84_vm0, %v2046_v7  ;;  %v4676_v7 = vld [vmem:[%s6719_s18] ss:$0 sm:$0xff] }
 0xf58   :  { %5266 = vmatprep.mubr.msk.bf16.mxu0 %vm5679_vm1, %v5678_v15  ;;  %5263 = vmatpush3.bf16.msra.mxu0 %v5546_v40 }
 0xf59   :  { %5264 = vmatprep.subr.bf16.mxu0 %v5678_v15 }
 0xf5c   :  { %5265 = vmatpush3.bf16.msra.mxu0 %v5548_v44 }
 0xf5d   :  { %5270 = vmatprep.subr.bf16.mxu0 %v5678_v15 }
0x102a   :  { %v2107_v55 = vpop.f32.mrb[64].mxu0 }
0x102b   :  { %v2108_v56 = vadd.f32 %v4666_v54, %v2107_v55  ;;  %v5248_v57 = vpop.f32.mrb[65].mxu0 }
0x102c   :  { %v2110_v39 = vpop.f32.mrb[66].mxu0 }
0x102d   :  { %v2114_v42 = vmul.f32 %v2108_v56, %v2108_v56  ;;  %v2111_v58 = vadd.f32 %v4666_v54, %v2110_v39  ;;  %v5249_v59 = vpop.f32.mrb[67].mxu0  ;;  %v4677_v54 = vld [vmem:[%s6720_s19] ss:$0 sm:$0xff] }
0x102e   :  { %v5550_v39 = vld [vmem:[%s6744_s8 + $0x40] sm:$0xff]  }
0x102f   :  { %v2116_v60 = vmul.f32 %v2114_v42, %v2108_v56  ;;  %v2115_v62 = vmul.f32 %v2111_v58, %v2111_v58 }
0x1031   :  { %v2118_v63 = vmul.f32 0.044715, %v2116_v60  ;;  %v2117_v1 = vmul.f32 %v2115_v62, %v2111_v58 }
0x1033   :  { %v2120_v36 = vadd.f32 %v2118_v63, %v2108_v56  ;;  %v2119_v2 = vmul.f32 0.044715, %v2117_v1 }
0x1035   :  { %v2122_v3 = vmul.f32 0.7978846, %v2120_v36  ;;  %v2121_v4 = vadd.f32 %v2119_v2, %v2111_v58 }
0x1037   :  { %5620 = vtanh.f32 %v2122_v3  ;;  %v2123_v6 = vmul.f32 0.7978846, %v2121_v4  ;;  %v4692_v4 = vld [vmem:[%s6748_s3 + $0x4] ss:$0 sm:$0xff] }
0x1039   :  { %5622 = vtanh.f32 %v2123_v6 }
0x1041   :  { %v5621_v8 = vpop.eup %5620 }
0x1042   :  { %v2126_v38 = vadd.f32 1.0, %v5621_v8 }
0x1043   :  { %v5623_v9 = vpop.eup %5622 }
0x1044   :  { %v2128_v10 = vmul.f32 0.5, %v2126_v38  ;;  %v2127_v43 = vadd.f32 1.0, %v5623_v9  ;;  %v4701_v9 = vld [vmem:[%s6750_s29 + $0x4] ss:$0 sm:$0xff] }
0x1046   :  { %v2129_v11 = vmul.f32 0.5, %v2127_v43  ;;  %v2130_v12 = vmul.f32 %v2128_v10, %v2108_v56 }
0x1048   :  { %v2131_v13 = vmul.f32 %v2129_v11, %v2111_v58  ;;  %v5551_v58 = vld [vmem:[%s6744_s8 + $0x48] sm:$0xff]  }
0x104a   :  { %v2132_v14 = vpack.c.bf16 %v2131_v13, %v2130_v12  ;;  %v4683_v13 = vld [vmem:[%s6749_s28 + $0x4] ss:$0 sm:$0xff] }
0x104c   :  { %5259 = vmatmul.mubr.msk.bf16.vlgmr.msra.gmra.mrb[64].mxu1 %vm2172_vm4, %v2132_v14 }
0x104d   :  { %5282 = vmatprep.mubr.msk.bf16.mxu1 %vm5679_vm1, %v5678_v15  ;;  %5279 = vmatpush3.bf16.msra.mxu1 %v5547_v41 }
0x104e   :  { %5280 = vmatprep.subr.bf16.mxu1 %v5678_v15 }
0x1051   :  { %5281 = vmatpush3.bf16.msra.mxu1 %v5549_v45 }
0x1052   :  { %5292 = vmatprep.subr.bf16.mxu1 %v5678_v15 }
0x111f   :  { %v2210_v17 = vpop.f32.mrb[64].mxu1 }
0x1120   :  { %v2211_v18 = vadd.f32 %v4670_v16, %v2210_v17  ;;  %v5260_v19 = vpop.f32.mrb[65].mxu1 }
0x1121   :  { %v2213_v20 = vpop.f32.mrb[66].mxu1 }
0x1122   :  { %v2214_v21 = vadd.f32 %v4670_v16, %v2213_v20  ;;  %v5261_v61 = vpop.f32.mrb[67].mxu1  ;;  %v2217_v22 = vadd.f32 %v2211_v18, %v2044_v48 }
0x1124   :  { %v2221_v23 = vsel %vm84_vm0, %v2217_v22, 0.0  ;;  %v2218_v24 = vadd.f32 %v2214_v21, %v2045_v49 }
0x1125   :  { %2222 = vadd.xlane.f32.xlu0 %v2221_v23 }
0x1126   :  { %v2224_v25 = vsel %vm84_vm0, %v2218_v24, 0.0 }
0x1127   :  { %2225 = vadd.xlane.f32.xlu1 %v2224_v25 }
0x11b2   :  { %v2223_v0 = vpop.xlane.xlu0 %2222 }
0x11b3   :  { %v2227_v27 = vmul.f32 0.03125, %v2223_v0 }
0x11b4   :  { %v2226_v33 = vpop.xlane.xlu1 %2225 }
0x11b5   :  { %v2229_v34 = vsub.f32 %v2217_v22, %v2227_v27  ;;  %v2228_v28 = vmul.f32 0.03125, %v2226_v33  ;;  %v6320_v33 = vld [vmem:[%s6710_s1] ss:$0 sm:$0xff] }
0x11b7   :  { %v2230_v30 = vsub.f32 %v2218_v24, %v2228_v28  ;;  %v2231_v31 = vmul.f32 %v2229_v34, %v2229_v34 }
0x11b9   :  { %v2233_v32 = vsel %vm84_vm0, %v2231_v31, 0.0  ;;  %v2232_v35 = vmul.f32 %v2230_v30, %v2230_v30 }
0x11ba   :  { %2234 = vadd.xlane.f32.xlu0 %v2233_v32  ;;  %v6326_v32 = vld [vmem:[%s6710_s1 + $0x1] ss:$0 sm:$0xff] }
0x11bb   :  { %v2236_v37 = vsel %vm84_vm0, %v2232_v35, 0.0 }
0x11bc   :  { %2237 = vadd.xlane.f32.xlu1 %v2236_v37 }
0x1247   :  { %v2235_v46 = vpop.xlane.xlu0 %2234 }
0x1248   :  { %v2239_v26 = vmul.f32 0.03125, %v2235_v46 }
0x1249   :  { %v2238_v47 = vpop.xlane.xlu1 %2237 }
0x124a   :  { %v2241_v29 = vadd.f32 1e-12, %v2239_v26  ;;  %v2240_v5 = vmul.f32 0.03125, %v2238_v47 }
0x124c   :  { %5624 = vrsqrt.f32 %v2241_v29  ;;  %v2242_v48 = vadd.f32 1e-12, %v2240_v5 }
0x124e   :  { %5626 = vrsqrt.f32 %v2242_v48 }
0x1256   :  { %v5625_v49 = vpop.eup %5624 }
0x1257   :  { %v2245_v50 = vmul.f32 %v5625_v49, %v2229_v34 }
0x1258   :  { %v5627_v51 = vpop.eup %5626 }
0x1259   :  { %v2253_v52 = vmul.f32 %v4676_v7, %v2245_v50  ;;  %v2246_v53 = vmul.f32 %v5627_v51, %v2230_v30  ;;  %v5552_v50 = vld [vmem:[%s6743_s0 + $0x50] sm:$0xff]  }
0x125b   :  { %v2254_v55 = vmul.f32 %v4676_v7, %v2246_v53  ;;  %v6266_v56 = vadd.f32 %v4677_v54, %v2253_v52  ;;  %v5553_v53 = vld [vmem:[%s6744_s8 + $0x50] sm:$0xff]  }
0x125d   :  { %v6268_v57 = vadd.f32 %v4677_v54, %v2254_v55  ;;  %v5554_v55 = vld [vmem:[%s6743_s0 + $0x58] sm:$0xff]  }
0x125f   :  { %v6275_v42 = vpack.c.bf16 %v6268_v57, %v6266_v56 }
0x1261   :  { %5267 = vmatmul.mubr.msk.bf16.vlgmr.msra.gmra.mrb[68].mxu0 %vm84_vm0, %v6275_v42  ;;  %5283 = vmatmul.mubr.msk.bf16.vlgmr.msra.gmra.mrb[68].mxu1 %vm84_vm0, %v6275_v42 }
0x1262   :  { %5271 = vmatpush3.bf16.msra.mxu0 %v5550_v39  ;;  %5274 = vmatprep.mubr.msk.bf16.mxu0 %vm5679_vm1, %v5678_v15  ;;  %v5555_v39 = vld [vmem:[%s6744_s8 + $0x58] sm:$0xff]  }
0x1263   :  { %5272 = vmatprep.subr.bf16.mxu0 %v5678_v15  ;;  %5294 = vmatprep.mubr.msk.bf16.mxu1 %vm5679_vm1, %v5678_v15 }
0x1266   :  { %5273 = vmatpush3.bf16.msra.mxu0 %v5551_v58  ;;  %v5556_v58 = vld [vmem:[%s6747_s30 + $0x50] sm:$0xff]  }
0x1267   :  { %5286 = vmatprep.subr.bf16.mxu0 %v5678_v15 }
0x1269   :  { %5275 = vmatmul.mubr.msk.bf16.vlgmr.msra.gmra.mrb[72].mxu0 %vm84_vm0, %v6275_v42 }
0x126a   :  { %5288 = vmatprep.mubr.msk.bf16.mxu0 %vm5679_vm1, %v5678_v15 }
0x1334   :  { %v2326_v59 = vpop.f32.mrb[68].mxu0  ;;  %v2458_v60 = vpop.f32.mrb[68].mxu1 }
0x1335   :  { %v5268_v62 = vpop.f32.mrb[69].mxu0  ;;  %v5284_v63 = vpop.f32.mrb[69].mxu1  ;;  %v2459_v14 = vadd.f32 %v4701_v9, %v2458_v60  ;;  %v2327_v18 = vadd.f32 %v4683_v13, %v2326_v59  ;;  %v5557_v59 = vld [vmem:[%s6747_s30 + $0x58] sm:$0xff]  }
0x1336   :  { %v2329_v1 = vpop.f32.mrb[70].mxu0  ;;  %v2461_v36 = vpop.f32.mrb[70].mxu1 }
0x1337   :  { %v5269_v2 = vpop.f32.mrb[71].mxu0  ;;  %v5285_v3 = vpop.f32.mrb[71].mxu1  ;;  %v2462_v19 = vadd.f32 %v4701_v9, %v2461_v36  ;;  %v2469_v21 = vpack.c.bf16 %v2459_v14, %v2459_v14  ;;  %v2330_v61 = vadd.f32 %v4683_v13, %v2329_v1  ;;  %v2465_v22 = vpack.c.bf16 %v2327_v18, %v2327_v18  ;;  %v4715_v18 = vld [vmem:[%s6749_s28 + $0x5] ss:$0 sm:$0xff] }
0x1339   :  { %v2470_v23 = vpack.c.bf16 %v2462_v19, %v2462_v19  ;;  %v2589_v24 = vsel %vm460_vm3, %v2469_v21, 0  ;;  %v2466_v25 = vpack.c.bf16 %v2330_v61, %v2330_v61  ;;  %v4733_v19 = vld [vmem:[%s6750_s29 + $0x5] ss:$0 sm:$0xff] }
0x133b   :  { %v2635_v0 = vsel %vm460_vm3, %v2470_v23, 0 }
0x133c   :  { %v2392_v6 = vpop.f32.mrb[72].mxu0 }
0x133d   :  { %v2393_v8 = vadd.f32 %v4692_v4, %v2392_v6  ;;  %v5276_v38 = vpop.f32.mrb[73].mxu0 }
0x133e   :  { %v2395_v10 = vpop.f32.mrb[74].mxu0 }
0x133f   :  { %v2467_v43 = vpack.c.bf16 %v2393_v8, %v2393_v8  ;;  %v2396_v11 = vadd.f32 %v4692_v4, %v2395_v10  ;;  %v5277_v12 = vpop.f32.mrb[75].mxu0  ;;  %v4724_v8 = vld [vmem:[%s6748_s3 + $0x5] ss:$0 sm:$0xff] }
0x1341   :  { %v2475_v16 = vsel %vm342_vm2, %v2467_v43, 0  ;;  %v2468_v17 = vpack.c.bf16 %v2396_v11, %v2396_v11 }
0x1342   :  { %5287 = vmatpush3.bf16.xpose.msra.mxu0 %v2475_v16 }
0x1343   :  { %v2521_v20 = vsel %vm342_vm2, %v2468_v17, 0  ;;  %5298 = vmatprep.subr.bf16.mxu0 %v5678_v15 }
0x1344   :  { %5293 = vmatpush3.bf16.xpose.msra.mxu1 %v2521_v20 }
0x1345   :  { %5304 = vmatprep.subr.bf16.mxu1 %v5678_v15 }
0x1349   :  { %5289 = vmatmul.mubr.msk.bf16.vlgmr.msra.gmra.mrb[76].mxu0 %vm342_vm2, %v2465_v22 }
0x134a   :  { %5299 = vmatpush3.bf16.msra.mxu0 %v2589_v24  ;;  %5300 = vmatprep.mubr.msk.bf16.mxu0 %vm5679_vm1, %v5678_v15 }
0x134b   :  { %5295 = vmatmul.mubr.msk.bf16.vlgmr.msra.gmra.mrb[72].mxu1 %vm342_vm2, %v2466_v25  ;;  %5310 = vmatprep.subr.bf16.mxu0 %v5678_v15 }
0x134c   :  { %5305 = vmatpush3.bf16.msra.mxu1 %v2635_v0  ;;  %5306 = vmatprep.mubr.msk.bf16.mxu1 %vm5679_vm1, %v5678_v15 }
0x134d   :  { %5318 = vmatprep.subr.bf16.mxu1 %v5678_v15 }
0x141c   :  { %v2511_v27 = vpop.f32.mrb[76].mxu0 }
0x141d   :  { %v2512_v34 = vadd.f32 %v6320_v33, %v2511_v27  ;;  %v5290_v28 = vpop.f32.mrb[77].mxu0 }
0x141e   :  { %v2514_v30 = vpop.f32.mrb[78].mxu0  ;;  %v2557_v31 = vpop.f32.mrb[72].mxu1 }
0x141f   :  { %v2558_v35 = vadd.f32 %v6326_v32, %v2557_v31  ;;  %v5291_v37 = vpop.f32.mrb[79].mxu0  ;;  %v5296_v40 = vpop.f32.mrb[73].mxu1  ;;  %v2563_v41 = vsel %vm342_vm2, %v2512_v34, -inf }
0x1420   :  { %v2560_v44 = vpop.f32.mrb[74].mxu1  ;;  %2564 = vmax.xlane.f32.xlu1 %v2563_v41 }
0x1421   :  { %v5297_v45 = vpop.f32.mrb[75].mxu1  ;;  %v2566_v46 = vsel %vm342_vm2, %v2558_v35, -inf }
0x1422   :  { %2567 = vmax.xlane.f32.xlu0 %v2566_v46 }
0x14ad   :  { %v2565_v26 = vpop.xlane.xlu1 %2564 }
0x14ae   :  { %v2569_v47 = vsub.f32 %v2512_v34, %v2565_v26 }
0x14af   :  { %v2568_v29 = vpop.xlane.xlu0 %2567 }
0x14b0   :  { %v2571_v5 = vmul.f32 1.442695, %v2569_v47  ;;  %v2570_v48 = vsub.f32 %v2558_v35, %v2568_v29 }
0x14b2   :  { %5628 = vpow2.f32 %v2571_v5  ;;  %v2573_v49 = vmul.f32 1.442695, %v2570_v48 }
0x14b4   :  { %5630 = vpow2.f32 %v2573_v49 }
0x14bc   :  { %v6331_v7 = vpop.eup %5628 }
0x14bd   :  { %v2583_v51 = vpack.c.bf16 %v6331_v7, %v6331_v7 }
0x14be   :  { %v6338_v52 = vpop.eup %5630 }
0x14bf   :  { %5301 = vmatmul.mubr.msk.bf16.vlgmr.msra.gmra.mrb[80].mxu0 %vm342_vm2, %v2583_v51  ;;  %v2584_v54 = vpack.c.bf16 %v6338_v52, %v6338_v52 }
0x14c0   :  { %5311 = vmatpush3.bf16.msra.mxu0 %v5552_v50  ;;  %5314 = vmatprep.mubr.msk.bf16.mxu0 %vm5679_vm1, %v5678_v15 }
0x14c1   :  { %5307 = vmatmul.mubr.msk.bf16.vlgmr.msra.gmra.mrb[76].mxu1 %vm342_vm2, %v2584_v54  ;;  %5312 = vmatprep.subr.bf16.mxu0 %v5678_v15  ;;  %v2575_v54 = vsel %vm342_vm2, %v6331_v7, 0.0  ;;  %v4709_v7 = vld [vmem:[%s6711_s10 + $0x10] sm:$0xf] }
0x14c2   :  { %5319 = vmatpush3.bf16.msra.mxu1 %v5553_v53  ;;  %5322 = vmatprep.mubr.msk.bf16.mxu1 %vm5679_vm1, %v5678_v15 }
0x14c3   :  { %5320 = vmatprep.subr.bf16.mxu1 %v5678_v15 }
0x14c4   :  { %5313 = vmatpush3.bf16.msra.mxu0 %v5554_v55  ;;  %v2578_v55 = vsel %vm342_vm2, %v6338_v52, 0.0 }
0x14c5   :  { %5326 = vmatprep.subr.bf16.mxu0 %v5678_v15 }
0x14c6   :  { %5321 = vmatpush3.bf16.msra.mxu1 %v5555_v39 }
0x14c7   :  { %5315 = vmatmul.mubr.msk.bf16.vlgmr.msra.gmra.mrb[84].mxu0 %vm84_vm0, %v6275_v42  ;;  %5334 = vmatprep.subr.bf16.mxu1 %v5678_v15 }
0x14c8   :  { %5327 = vmatpush3.bf16.msra.mxu0 %v5556_v58  ;;  %5330 = vmatprep.mubr.msk.bf16.mxu0 %vm5679_vm1, %v5678_v15 }
0x14c9   :  { %5323 = vmatmul.mubr.msk.bf16.vlgmr.msra.gmra.mrb[80].mxu1 %vm84_vm0, %v6275_v42  ;;  %5328 = vmatprep.subr.bf16.mxu0 %v5678_v15 }
0x14ca   :  { %5336 = vmatprep.mubr.msk.bf16.mxu1 %vm5679_vm1, %v5678_v15 }
0x14cc   :  { %5329 = vmatpush3.bf16.msra.mxu0 %v5557_v59 }
0x14cd   :  { %5340 = vmatprep.subr.bf16.mxu0 %v5678_v15 }
0x14cf   :  { %5331 = vmatmul.mubr.msk.bf16.vlgmr.msra.gmra.mrb[88].mxu0 %vm84_vm0, %v6275_v42 }
0x14d0   :  { %5342 = vmatprep.mubr.msk.bf16.mxu0 %vm5679_vm1, %v5678_v15 }
0x1592   :  { %v6381_v60 = vpop.f32.mrb[80].mxu0 }
0x1593   :  { %v5302_v62 = vpop.f32.mrb[81].mxu0 }
0x1594   :  { %v2628_v63 = vpop.f32.mrb[82].mxu0  ;;  %v6383_v1 = vpop.f32.mrb[76].mxu1 }
0x1595   :  { %v5303_v36 = vpop.f32.mrb[83].mxu0  ;;  %v5308_v2 = vpop.f32.mrb[77].mxu1 }
0x1596   :  { %v2674_v3 = vpop.f32.mrb[78].mxu1 }
0x1597   :  { %v5309_v4 = vpop.f32.mrb[79].mxu1 }
0x159a   :  { %v2741_v6 = vpop.f32.mrb[84].mxu0 }
0x159b   :  { %v5316_v38 = vpop.f32.mrb[85].mxu0  ;;  %v2742_v22 = vadd.f32 %v4715_v18, %v2741_v6 }
0x159c   :  { %v2744_v9 = vpop.f32.mrb[86].mxu0  ;;  %v2807_v10 = vpop.f32.mrb[80].mxu1 }
0x159d   :  { %v2808_v43 = vadd.f32 %v4724_v8, %v2807_v10  ;;  %v5317_v11 = vpop.f32.mrb[87].mxu0  ;;  %v5324_v12 = vpop.f32.mrb[81].mxu1  ;;  %v2745_v27 = vadd.f32 %v4715_v18, %v2744_v9  ;;  %v2880_v31 = vpack.c.bf16 %v2742_v22, %v2742_v22 }
0x159e   :  { %v2810_v13 = vpop.f32.mrb[82].mxu1  ;;  %v3148_v11 = vsel %vm460_vm3, %v4709_v7, 0 }
0x159f   :  { %v2882_v14 = vpack.c.bf16 %v2808_v43, %v2808_v43  ;;  %v2811_v16 = vadd.f32 %v4724_v8, %v2810_v13  ;;  %v5325_v17 = vpop.f32.mrb[83].mxu1  ;;  %v2881_v37 = vpack.c.bf16 %v2745_v27, %v2745_v27 }
0x15a1   :  { %v2890_v20 = vsel %vm342_vm2, %v2882_v14, 0  ;;  %v2883_v21 = vpack.c.bf16 %v2811_v16, %v2811_v16  ;;  %v5558_v16 = vld [vmem:[%s6744_s8 + $0x60] sm:$0xff]  }
0x15a2   :  { %v2873_v61 = vpop.f32.mrb[88].mxu0  ;;  %5335 = vmatpush3.bf16.xpose.msra.mxu1 %v2890_v20 }
0x15a3   :  { %v2936_v23 = vsel %vm342_vm2, %v2883_v21, 0  ;;  %v2874_v24 = vadd.f32 %v4733_v19, %v2873_v61  ;;  %v5332_v25 = vpop.f32.mrb[89].mxu0  ;;  %5346 = vmatprep.subr.bf16.mxu1 %v5678_v15 }
0x15a4   :  { %v2876_v0 = vpop.f32.mrb[90].mxu0  ;;  %5341 = vmatpush3.bf16.xpose.msra.mxu0 %v2936_v23 }
0x15a5   :  { %v2884_v34 = vpack.c.bf16 %v2874_v24, %v2874_v24  ;;  %v2877_v28 = vadd.f32 %v4733_v19, %v2876_v0  ;;  %v5333_v30 = vpop.f32.mrb[91].mxu0  ;;  %5352 = vmatprep.subr.bf16.mxu0 %v5678_v15 }
0x15a6   :  { %v5560_v30 = vld [vmem:[%s6743_s0 + $0x60] sm:$0xff]  }
0x15a7   :  { %v2885_v35 = vpack.c.bf16 %v2877_v28, %v2877_v28  ;;  %v3004_v40 = vsel %vm460_vm3, %v2884_v34, 0 }
0x15a9   :  { %5337 = vmatmul.mubr.msk.bf16.vlgmr.msra.gmra.mrb[84].mxu1 %vm342_vm2, %v2880_v31  ;;  %v3050_v41 = vsel %vm460_vm3, %v2885_v35, 0 }
0x15aa   :  { %5347 = vmatpush3.bf16.msra.mxu1 %v3004_v40  ;;  %5348 = vmatprep.mubr.msk.bf16.mxu1 %vm5679_vm1, %v5678_v15 }
0x15ab   :  { %5343 = vmatmul.mubr.msk.bf16.vlgmr.msra.gmra.mrb[92].mxu0 %vm342_vm2, %v2881_v37  ;;  %5358 = vmatprep.subr.bf16.mxu1 %v5678_v15  ;;  %v5561_v37 = vld [vmem:[%s6743_s0 + $0x68] sm:$0xff]  }
0x15ac   :  { %5353 = vmatpush3.bf16.msra.mxu0 %v3050_v41  ;;  %5354 = vmatprep.mubr.msk.bf16.mxu0 %vm5679_vm1, %v5678_v15 }
0x15ad   :  { %5364 = vmatprep.subr.bf16.mxu0 %v5678_v15 }
0x167c   :  { %v2926_v44 = vpop.f32.mrb[84].mxu1 }
0x167d   :  { %v2927_v45 = vadd.f32 %v6320_v33, %v2926_v44  ;;  %v5338_v46 = vpop.f32.mrb[85].mxu1 }
0x167e   :  { %v2929_v26 = vpop.f32.mrb[86].mxu1  ;;  %v2972_v47 = vpop.f32.mrb[92].mxu0 }
0x167f   :  { %v2973_v29 = vadd.f32 %v6326_v32, %v2972_v47  ;;  %v5339_v5 = vpop.f32.mrb[87].mxu1  ;;  %v5344_v48 = vpop.f32.mrb[93].mxu0  ;;  %v2978_v49 = vsel %vm342_vm2, %v2927_v45, -inf  ;;  %v4758_v26 = vld [vmem:[%s6748_s3 + $0x6] ss:$0 sm:$0xff]  ;;  %v5563_v47 = vld [vmem:[%s6747_s30 + $0x68] sm:$0xff]  }
0x1680   :  { %2979 = vmax.xlane.f32.xlu0 %v2978_v49  ;;  %v2975_v50 = vpop.f32.mrb[94].mxu0 }
0x1681   :  { %v5345_v51 = vpop.f32.mrb[95].mxu0  ;;  %v2981_v53 = vsel %vm342_vm2, %v2973_v29, -inf }
0x1682   :  { %2982 = vmax.xlane.f32.xlu1 %v2981_v53 }
0x1684   :  { %2576 = vadd.xlane.f32.xlu0 %v2575_v54 }
0x1686   :  { %2579 = vadd.xlane.f32.xlu1 %v2578_v55 }
0x170d   :  { %v2980_v39 = vpop.xlane.xlu0 %2979 }
0x170e   :  { %v2984_v58 = vsub.f32 %v2927_v45, %v2980_v39  ;;  %v5562_v45 = vld [vmem:[%s6747_s30 + $0x60] sm:$0xff]  }
0x170f   :  { %v2983_v59 = vpop.xlane.xlu1 %2982 }
0x1710   :  { %v2986_v62 = vmul.f32 1.442695, %v2984_v58  ;;  %v2985_v63 = vsub.f32 %v2973_v29, %v2983_v59 }
0x1711   :  { %v2577_v36 = vpop.xlane.xlu0 %2576 }
0x1712   :  { %5632 = vpow2.f32 %v2986_v62  ;;  %v2988_v2 = vmul.f32 1.442695, %v2985_v63 }
0x1713   :  { %5634 = vrcp.f32 %v2577_v36  ;;  %v2580_v3 = vpop.xlane.xlu1 %2579 }
0x1714   :  { %5636 = vpow2.f32 %v2988_v2 }
0x1715   :  { %5638 = vrcp.f32 %v2580_v3  ;;  %v4749_v3 = vld [vmem:[%s6749_s28 + $0x6] ss:$0 sm:$0xff] }
0x171c   :  { %v5633_v4 = vpop.eup %5632 }
0x171d   :  { %v5635_v6 = vpop.eup %5634  ;;  %v2990_v52 = vsel %vm342_vm2, %v5633_v4, 0.0  ;;  %v2998_v8 = vpack.c.bf16 %v5633_v4, %v5633_v4 }
0x171e   :  { %v5637_v38 = vpop.eup %5636  ;;  %2991 = vadd.xlane.f32.xlu0 %v2990_v52  ;;  %v2677_v12 = vmul.f32 %v5635_v6, %v6381_v60  ;;  %v5559_v60 = vld [vmem:[%s6744_s8 + $0x68] sm:$0xff]  }
0x171f   :  { %v5639_v9 = vpop.eup %5638  ;;  %5349 = vmatmul.mubr.msk.bf16.vlgmr.msra.gmra.mrb[88].mxu1 %vm342_vm2, %v2998_v8  ;;  %v2993_v10 = vsel %vm342_vm2, %v5637_v38, 0.0  ;;  %v2999_v43 = vpack.c.bf16 %v5637_v38, %v5637_v38 }
0x1720   :  { %v2678_v13 = vmul.f32 %v5639_v9, %v6383_v1  ;;  %2994 = vadd.xlane.f32.xlu1 %v2993_v10  ;;  %5360 = vmatprep.mubr.msk.bf16.mxu1 %vm5679_vm1, %v5678_v15  ;;  %v4741_v1 = vld [vmem:[%s6711_s10 + $0x14] sm:$0xf] }
0x1721   :  { %5355 = vmatmul.mubr.msk.bf16.vlgmr.msra.gmra.mrb[96].mxu0 %vm342_vm2, %v2999_v43  ;;  %v3101_v17 = vsel %vm460_vm3, %v4741_v1, 0  ;;  %v4767_v43 = vld [vmem:[%s6750_s29 + $0x6] ss:$0 sm:$0xff] }
0x1722   :  { %5365 = vmatpush3.bf16.msra.mxu0 %v3148_v11  ;;  %5366 = vmatprep.mubr.msk.bf16.mxu0 %vm5679_vm1, %v5678_v15  ;;  %v2679_v14 = vpack.c.bf16 %v2678_v13, %v2677_v12 }
0x1723   :  { %5378 = vmatprep.subr.bf16.mxu0 %v5678_v15  ;;  %5359 = vmatpush3.bf16.msra.mxu1 %v3101_v17 }
0x1724   :  { %5370 = vmatprep.subr.bf16.mxu1 %v5678_v15 }
0x1729   :  { %5367 = vmatmul.mubr.msk.bf16.vlgmr.msra.gmra.mrb[100].mxu0 %vm342_vm2, %v2679_v14 }
0x172a   :  { %5379 = vmatpush3.bf16.msra.mxu0 %v5558_v16  ;;  %5382 = vmatprep.mubr.msk.bf16.mxu0 %vm5679_vm1, %v5678_v15 }
0x172b   :  { %5380 = vmatprep.subr.bf16.mxu0 %v5678_v15 }
0x172e   :  { %5381 = vmatpush3.bf16.msra.mxu0 %v5559_v60 }
0x172f   :  { %5394 = vmatprep.subr.bf16.mxu0 %v5678_v15 }
0x1731   :  { %5383 = vmatmul.mubr.msk.bf16.vlgmr.msra.gmra.mrb[104].mxu0 %vm84_vm0, %v6275_v42 }
0x1732   :  { %5396 = vmatprep.mubr.msk.bf16.mxu0 %vm5679_vm1, %v5678_v15 }
0x17ab   :  { %v2992_v18 = vpop.xlane.xlu0 %2991 }
0x17ac   :  { %5640 = vrcp.f32 %v2992_v18 }
0x17ad   :  { %v2995_v19 = vpop.xlane.xlu1 %2994 }
0x17ae   :  { %5642 = vrcp.f32 %v2995_v19 }
0x17b6   :  { %v5641_v21 = vpop.eup %5640 }
0x17b8   :  { %v5643_v22 = vpop.eup %5642 }
0x17f2   :  { %v3040_v20 = vpop.f32.mrb[88].mxu1 }
0x17f3   :  { %v5350_v61 = vpop.f32.mrb[89].mxu1  ;;  %v3092_v25 = vmul.f32 %v5641_v21, %v3040_v20 }
0x17f4   :  { %v3043_v23 = vpop.f32.mrb[90].mxu1  ;;  %v3086_v24 = vpop.f32.mrb[96].mxu0 }
0x17f5   :  { %v3093_v0 = vmul.f32 %v5643_v22, %v3086_v24  ;;  %v5351_v27 = vpop.f32.mrb[91].mxu1  ;;  %v5356_v34 = vpop.f32.mrb[97].mxu0 }
0x17f6   :  { %v3089_v28 = vpop.f32.mrb[98].mxu0 }
0x17f7   :  { %v3094_v31 = vpack.c.bf16 %v3093_v0, %v3092_v25  ;;  %v5357_v35 = vpop.f32.mrb[99].mxu0 }
0x17f9   :  { %5361 = vmatmul.mubr.msk.bf16.vlgmr.msra.gmra.mrb[92].mxu1 %vm342_vm2, %v3094_v31 }
0x17fa   :  { %5371 = vmatpush3.bf16.msra.mxu1 %v5560_v30  ;;  %5374 = vmatprep.mubr.msk.bf16.mxu1 %vm5679_vm1, %v5678_v15 }
0x17fb   :  { %5372 = vmatprep.subr.bf16.mxu1 %v5678_v15 }
0x17fc   :  { %v3184_v40 = vpop.f32.mrb[100].mxu0 }
0x17fd   :  { %v5368_v41 = vpop.f32.mrb[101].mxu0 }
0x17fe   :  { %5373 = vmatpush3.bf16.msra.mxu1 %v5561_v37  ;;  %v3187_v44 = vpop.f32.mrb[102].mxu0 }
0x17ff   :  { %v5369_v46 = vpop.f32.mrb[103].mxu0  ;;  %5386 = vmatprep.subr.bf16.mxu1 %v5678_v15 }
0x1801   :  { %5375 = vmatmul.mubr.msk.bf16.vlgmr.msra.gmra.mrb[96].mxu1 %vm84_vm0, %v6275_v42 }
0x1802   :  { %5387 = vmatpush3.bf16.msra.mxu1 %v5562_v45  ;;  %5390 = vmatprep.mubr.msk.bf16.mxu1 %vm5679_vm1, %v5678_v15 }
0x1803   :  { %5388 = vmatprep.subr.bf16.mxu1 %v5678_v15 }
0x1804   :  { %v3316_v29 = vpop.f32.mrb[104].mxu0 }
0x1805   :  { %v3317_v5 = vadd.f32 %v4758_v26, %v3316_v29  ;;  %v5384_v48 = vpop.f32.mrb[105].mxu0  ;;  %v5564_v29 = vld [vmem:[%s6743_s0 + $0x70] sm:$0xff]  }
0x1806   :  { %5389 = vmatpush3.bf16.msra.mxu1 %v5563_v47  ;;  %v3319_v49 = vpop.f32.mrb[106].mxu0 }
0x1807   :  { %v3391_v50 = vpack.c.bf16 %v3317_v5, %v3317_v5  ;;  %v3320_v51 = vadd.f32 %v4758_v26, %v3319_v49  ;;  %v5385_v53 = vpop.f32.mrb[107].mxu0  ;;  %5400 = vmatprep.subr.bf16.mxu1 %v5678_v15  ;;  %v5565_v49 = vld [vmem:[%s6743_s0 + $0x78] sm:$0xff]  }
0x1808   :  { %v4775_v53 = vld [vmem:[%s6711_s10 + $0x18] sm:$0xf] }
0x1809   :  { %v3399_v54 = vsel %vm342_vm2, %v3391_v50, 0  ;;  %5391 = vmatmul.mubr.msk.bf16.vlgmr.msra.gmra.mrb[100].mxu1 %vm84_vm0, %v6275_v42  ;;  %v3392_v55 = vpack.c.bf16 %v3320_v51, %v3320_v51  ;;  %v5566_v50 = vld [vmem:[%s6747_s30 + $0x70] sm:$0xff]   ;;  %v5567_v51 = vld [vmem:[%s6747_s30 + $0x78] sm:$0xff]  }
0x180a   :  { %5395 = vmatpush3.bf16.xpose.msra.mxu0 %v3399_v54  ;;  %5402 = vmatprep.mubr.msk.bf16.mxu1 %vm5679_vm1, %v5678_v15  ;;  %v3610_v54 = vsel %vm460_vm3, %v4775_v53, 0 }
0x180b   :  { %5406 = vmatprep.subr.bf16.mxu0 %v5678_v15  ;;  %v3445_v39 = vsel %vm342_vm2, %v3392_v55, 0 }
0x180f   :  { %5401 = vmatpush3.bf16.xpose.msra.mxu1 %v3445_v39 }
0x1810   :  { %5412 = vmatprep.subr.bf16.mxu1 %v5678_v15 }
0x18cc   :  { %v3137_v58 = vpop.f32.mrb[92].mxu1 }
0x18cd   :  { %v6485_v59 = vadd.f32 %v3184_v40, %v3137_v58  ;;  %v5362_v62 = vpop.f32.mrb[93].mxu1 }
0x18ce   :  { %v3140_v63 = vpop.f32.mrb[94].mxu1 }
0x18cf   :  { %v6487_v36 = vadd.f32 %v3187_v44, %v3140_v63  ;;  %v5363_v2 = vpop.f32.mrb[95].mxu1 }
0x18d4   :  { %v3250_v4 = vpop.f32.mrb[96].mxu1 }
0x18d5   :  { %v3251_v7 = vadd.f32 %v4749_v3, %v3250_v4  ;;  %v5376_v6 = vpop.f32.mrb[97].mxu1 }
0x18d6   :  { %v3253_v52 = vpop.f32.mrb[98].mxu1 }
0x18d7   :  { %v3389_v8 = vpack.c.bf16 %v3251_v7, %v3251_v7  ;;  %v3254_v38 = vadd.f32 %v4749_v3, %v3253_v52  ;;  %v5377_v9 = vpop.f32.mrb[99].mxu1 }
0x18d8   :  { %v5568_v9 = vld [vmem:[%s6744_s8 + $0x70] sm:$0xff]  }
0x18d9   :  { %v3390_v10 = vpack.c.bf16 %v3254_v38, %v3254_v38  ;;  %5397 = vmatmul.mubr.msk.bf16.vlgmr.msra.gmra.mrb[108].mxu0 %vm342_vm2, %v3389_v8 }
0x18da   :  { %5408 = vmatprep.mubr.msk.bf16.mxu0 %vm5679_vm1, %v5678_v15 }
0x18db   :  { %5403 = vmatmul.mubr.msk.bf16.vlgmr.msra.gmra.mrb[104].mxu1 %vm342_vm2, %v3390_v10 }
0x18dc   :  { %v3382_v11 = vpop.f32.mrb[100].mxu1  ;;  %5414 = vmatprep.mubr.msk.bf16.mxu1 %vm5679_vm1, %v5678_v15 }
0x18dd   :  { %v3383_v12 = vadd.f32 %v4767_v43, %v3382_v11  ;;  %v5392_v13 = vpop.f32.mrb[101].mxu1  ;;  %v5569_v11 = vld [vmem:[%s6744_s8 + $0x78] sm:$0xff]  }
0x18de   :  { %v3385_v14 = vpop.f32.mrb[102].mxu1 }
0x18df   :  { %v3393_v16 = vpack.c.bf16 %v3383_v12, %v3383_v12  ;;  %v3386_v60 = vadd.f32 %v4767_v43, %v3385_v14  ;;  %v5393_v1 = vpop.f32.mrb[103].mxu1 }
0x18e1   :  { %v3513_v17 = vsel %vm460_vm3, %v3393_v16, 0  ;;  %v3394_v18 = vpack.c.bf16 %v3386_v60, %v3386_v60 }
0x18e2   :  { %5407 = vmatpush3.bf16.msra.mxu0 %v3513_v17 }
0x18e3   :  { %v3559_v19 = vsel %vm460_vm3, %v3394_v18, 0  ;;  %5418 = vmatprep.subr.bf16.mxu0 %v5678_v15 }
0x18e4   :  { %5413 = vmatpush3.bf16.msra.mxu1 %v3559_v19 }
0x18e5   :  { %5424 = vmatprep.subr.bf16.mxu1 %v5678_v15 }
0x19ac   :  { %v3435_v20 = vpop.f32.mrb[108].mxu0 }
0x19ad   :  { %v3436_v21 = vadd.f32 %v6320_v33, %v3435_v20  ;;  %v5398_v61 = vpop.f32.mrb[109].mxu0 }
0x19ae   :  { %v3438_v22 = vpop.f32.mrb[110].mxu0  ;;  %v3481_v23 = vpop.f32.mrb[104].mxu1 }
0x19af   :  { %v3482_v24 = vadd.f32 %v6326_v32, %v3481_v23  ;;  %v5399_v25 = vpop.f32.mrb[111].mxu0  ;;  %v5404_v0 = vpop.f32.mrb[105].mxu1  ;;  %v3487_v27 = vsel %vm342_vm2, %v3436_v21, -inf }
0x19b0   :  { %v3484_v34 = vpop.f32.mrb[106].mxu1  ;;  %3488 = vmax.xlane.f32.xlu0 %v3487_v27  ;;  %v4800_v27 = vld [vmem:[%s6750_s29 + $0x7] ss:$0 sm:$0xff] }
0x19b1   :  { %v5405_v28 = vpop.f32.mrb[107].mxu1  ;;  %v3490_v30 = vsel %vm342_vm2, %v3482_v24, -inf }
0x19b2   :  { %3491 = vmax.xlane.f32.xlu1 %v3490_v30 }
0x1a3d   :  { %v3489_v31 = vpop.xlane.xlu0 %3488 }
0x1a3e   :  { %v3493_v35 = vsub.f32 %v3436_v21, %v3489_v31 }
0x1a3f   :  { %v3492_v37 = vpop.xlane.xlu1 %3491 }
0x1a40   :  { %v3495_v40 = vmul.f32 1.442695, %v3493_v35  ;;  %v3494_v41 = vsub.f32 %v3482_v24, %v3492_v37 }
0x1a42   :  { %5644 = vpow2.f32 %v3495_v40  ;;  %v3497_v44 = vmul.f32 1.442695, %v3494_v41 }
0x1a44   :  { %5646 = vpow2.f32 %v3497_v44 }
0x1a4c   :  { %v5645_v45 = vpop.eup %5644 }
0x1a4d   :  { %v3499_v46 = vsel %vm342_vm2, %v5645_v45, 0.0  ;;  %v3507_v26 = vpack.c.bf16 %v5645_v45, %v5645_v45 }
0x1a4e   :  { %v5647_v47 = vpop.eup %5646  ;;  %3500 = vadd.xlane.f32.xlu0 %v3499_v46 }
0x1a4f   :  { %5409 = vmatmul.mubr.msk.bf16.vlgmr.msra.gmra.mrb[112].mxu0 %vm342_vm2, %v3507_v26  ;;  %v3502_v5 = vsel %vm342_vm2, %v5647_v47, 0.0  ;;  %v3508_v48 = vpack.c.bf16 %v5647_v47, %v5647_v47 }
0x1a50   :  { %3503 = vadd.xlane.f32.xlu1 %v3502_v5  ;;  %5420 = vmatprep.mubr.msk.bf16.mxu0 %vm5679_vm1, %v5678_v15 }
0x1a51   :  { %5415 = vmatmul.mubr.msk.bf16.vlgmr.msra.gmra.mrb[108].mxu1 %vm342_vm2, %v3508_v48  ;;  %5419 = vmatpush3.bf16.msra.mxu0 %v3610_v54 }
0x1a52   :  { %5425 = vmatpush3.bf16.msra.mxu1 %v5564_v29  ;;  %5428 = vmatprep.mubr.msk.bf16.mxu1 %vm5679_vm1, %v5678_v15 }
0x1a53   :  { %5426 = vmatprep.subr.bf16.mxu1 %v5678_v15  ;;  %5432 = vmatprep.subr.bf16.mxu0 %v5678_v15 }
0x1a56   :  { %5427 = vmatpush3.bf16.msra.mxu1 %v5565_v49 }
0x1a57   :  { %5440 = vmatprep.subr.bf16.mxu1 %v5678_v15 }
0x1a59   :  { %5429 = vmatmul.mubr.msk.bf16.vlgmr.msra.gmra.mrb[112].mxu1 %vm84_vm0, %v6275_v42 }
0x1a5a   :  { %5441 = vmatpush3.bf16.msra.mxu1 %v5566_v50  ;;  %5444 = vmatprep.mubr.msk.bf16.mxu1 %vm5679_vm1, %v5678_v15 }
0x1a5b   :  { %5442 = vmatprep.subr.bf16.mxu1 %v5678_v15 }
0x1a5e   :  { %5443 = vmatpush3.bf16.msra.mxu1 %v5567_v51 }
0x1a5f   :  { %5454 = vmatprep.subr.bf16.mxu1 %v5678_v15 }
0x1a61   :  { %5445 = vmatmul.mubr.msk.bf16.vlgmr.msra.gmra.mrb[116].mxu1 %vm84_vm0, %v6275_v42 }
0x1a62   :  { %5456 = vmatprep.mubr.msk.bf16.mxu1 %vm5679_vm1, %v5678_v15 }
0x1adb   :  { %v3501_v55 = vpop.xlane.xlu0 %3500 }
0x1adc   :  { %5648 = vrcp.f32 %v3501_v55 }
0x1add   :  { %v3504_v39 = vpop.xlane.xlu1 %3503 }
0x1ade   :  { %5650 = vrcp.f32 %v3504_v39 }
0x1ae6   :  { %v5649_v62 = vpop.eup %5648 }
0x1ae8   :  { %v5651_v2 = vpop.eup %5650 }
0x1b22   :  { %v3549_v58 = vpop.f32.mrb[112].mxu0 }
0x1b23   :  { %v5410_v63 = vpop.f32.mrb[113].mxu0  ;;  %v3601_v7 = vmul.f32 %v5649_v62, %v3549_v58 }
0x1b24   :  { %v3552_v3 = vpop.f32.mrb[114].mxu0  ;;  %v3595_v4 = vpop.f32.mrb[108].mxu1 }
0x1b25   :  { %v3602_v6 = vmul.f32 %v5651_v2, %v3595_v4  ;;  %v5411_v52 = vpop.f32.mrb[115].mxu0  ;;  %v5416_v8 = vpop.f32.mrb[109].mxu1 }
0x1b26   :  { %v3598_v38 = vpop.f32.mrb[110].mxu1 }
0x1b27   :  { %v3603_v10 = vpack.c.bf16 %v3602_v6, %v3601_v7  ;;  %v5417_v43 = vpop.f32.mrb[111].mxu1 }
0x1b29   :  { %5421 = vmatmul.mubr.msk.bf16.vlgmr.msra.gmra.mrb[116].mxu0 %vm342_vm2, %v3603_v10 }
0x1b2a   :  { %5433 = vmatpush3.bf16.msra.mxu0 %v5568_v9  ;;  %5436 = vmatprep.mubr.msk.bf16.mxu0 %vm5679_vm1, %v5678_v15 }
0x1b2b   :  { %5434 = vmatprep.subr.bf16.mxu0 %v5678_v15 }
0x1b2c   :  { %v3714_v12 = vpop.f32.mrb[112].mxu1 }
0x1b2d   :  { %v5430_v13 = vpop.f32.mrb[113].mxu1 }
0x1b2e   :  { %v3717_v14 = vpop.f32.mrb[114].mxu1  ;;  %5435 = vmatpush3.bf16.msra.mxu0 %v5569_v11 }
0x1b2f   :  { %v5431_v16 = vpop.f32.mrb[115].mxu1  ;;  %5448 = vmatprep.subr.bf16.mxu0 %v5678_v15 }
0x1b31   :  { %5437 = vmatmul.mubr.msk.bf16.vlgmr.msra.gmra.mrb[120].mxu0 %vm84_vm0, %v6275_v42  ;;  %v4791_v42 = vld [vmem:[%s6748_s3 + $0x7] ss:$0 sm:$0xff] }
0x1b32   :  { %5450 = vmatprep.mubr.msk.bf16.mxu0 %vm5679_vm1, %v5678_v15 }
0x1b34   :  { %v3846_v60 = vpop.f32.mrb[116].mxu1 }
0x1b35   :  { %v5446_v1 = vpop.f32.mrb[117].mxu1  ;;  %v3847_v31 = vadd.f32 %v4800_v27, %v3846_v60 }
0x1b36   :  { %v3849_v17 = vpop.f32.mrb[118].mxu1 }
0x1b37   :  { %v5447_v18 = vpop.f32.mrb[119].mxu1  ;;  %v3850_v41 = vadd.f32 %v4800_v27, %v3849_v17  ;;  %v3857_v46 = vpack.c.bf16 %v3847_v31, %v3847_v31 }
0x1b39   :  { %v3858_v47 = vpack.c.bf16 %v3850_v41, %v3850_v41  ;;  %v3977_v5 = vsel %vm460_vm3, %v3857_v46, 0 }
0x1b3b   :  { %v4023_v48 = vsel %vm460_vm3, %v3858_v47, 0 }
0x1bfc   :  { %v3646_v19 = vpop.f32.mrb[116].mxu0 }
0x1bfd   :  { %v6562_v20 = vadd.f32 %v3646_v19, %v6485_v59  ;;  %v5422_v21 = vpop.f32.mrb[117].mxu0 }
0x1bfe   :  { %v3649_v61 = vpop.f32.mrb[118].mxu0 }
0x1bff   :  { %v6565_v22 = vadd.f32 %v3649_v61, %v6487_v36  ;;  %v5423_v23 = vpop.f32.mrb[119].mxu0  ;;  %v4782_v36 = vld [vmem:[%s6749_s28 + $0x7] ss:$0 sm:$0xff] }
0x1c00   :  { %v3715_v40 = vadd.f32 %v4782_v36, %v3714_v12  ;;  %v3718_v45 = vadd.f32 %v4782_v36, %v3717_v14  ;;  %v4808_v12 = vld [vmem:[%s6711_s10 + $0x1c] sm:$0xf] }
0x1c01   :  { %v4074_v13 = vsel %vm460_vm3, %v4808_v12, 0  ;;  %v4821_v12 = vld [vmem:[%s6717_s15 + $0x1] ss:$0 sm:$0xff] }
0x1c02   :  { %v3853_v26 = vpack.c.bf16 %v3715_v40, %v3715_v40  ;;  %v3854_v29 = vpack.c.bf16 %v3718_v45, %v3718_v45 }
0x1c04   :  { %v3780_v24 = vpop.f32.mrb[120].mxu0 }
0x1c05   :  { %v3781_v25 = vadd.f32 %v4791_v42, %v3780_v24  ;;  %v5438_v0 = vpop.f32.mrb[121].mxu0 }
0x1c06   :  { %v3783_v34 = vpop.f32.mrb[122].mxu0 }
0x1c07   :  { %v3855_v59 = vpack.c.bf16 %v3781_v25, %v3781_v25  ;;  %v3784_v28 = vadd.f32 %v4791_v42, %v3783_v34  ;;  %v5439_v30 = vpop.f32.mrb[123].mxu0 }
0x1c09   :  { %v3863_v35 = vsel %vm342_vm2, %v3855_v59, 0  ;;  %v3856_v37 = vpack.c.bf16 %v3784_v28, %v3784_v28  ;;  %v4811_v59 = vld [vmem:[%s6712_s11 + $0x1] ss:$0 sm:$0xff] }
0x1c0a   :  { %5449 = vmatpush3.bf16.xpose.msra.mxu0 %v3863_v35 }
0x1c0b   :  { %v3909_v44 = vsel %vm342_vm2, %v3856_v37, 0  ;;  %5460 = vmatprep.subr.bf16.mxu0 %v5678_v15 }
0x1c0c   :  { %5455 = vmatpush3.bf16.xpose.msra.mxu1 %v3909_v44 }
0x1c0d   :  { %5466 = vmatprep.subr.bf16.mxu1 %v5678_v15 }
0x1c11   :  { %5451 = vmatmul.mubr.msk.bf16.vlgmr.msra.gmra.mrb[124].mxu0 %vm342_vm2, %v3853_v26 }
0x1c12   :  { %5461 = vmatpush3.bf16.msra.mxu0 %v3977_v5  ;;  %5462 = vmatprep.mubr.msk.bf16.mxu0 %vm5679_vm1, %v5678_v15 }
0x1c13   :  { %5457 = vmatmul.mubr.msk.bf16.vlgmr.msra.gmra.mrb[120].mxu1 %vm342_vm2, %v3854_v29  ;;  %5472 = vmatprep.subr.bf16.mxu0 %v5678_v15 }
0x1c14   :  { %5467 = vmatpush3.bf16.msra.mxu1 %v4023_v48  ;;  %5468 = vmatprep.mubr.msk.bf16.mxu1 %vm5679_vm1, %v5678_v15 }
0x1c15   :  { %5478 = vmatprep.subr.bf16.mxu1 %v5678_v15 }
0x1ce4   :  { %v3899_v49 = vpop.f32.mrb[124].mxu0 }
0x1ce5   :  { %v3900_v50 = vadd.f32 %v6320_v33, %v3899_v49  ;;  %v5452_v51 = vpop.f32.mrb[125].mxu0 }
0x1ce6   :  { %v3902_v53 = vpop.f32.mrb[126].mxu0  ;;  %v3945_v54 = vpop.f32.mrb[120].mxu1  ;;  %v5571_v51 = vld [vmem:[%s6713_s14 + $0x18] sm:$0xff]  }
0x1ce7   :  { %v3946_v55 = vadd.f32 %v6326_v32, %v3945_v54  ;;  %v5453_v39 = vpop.f32.mrb[127].mxu0  ;;  %v5458_v58 = vpop.f32.mrb[121].mxu1  ;;  %v3951_v62 = vsel %vm342_vm2, %v3900_v50, -inf }
0x1ce8   :  { %v3948_v63 = vpop.f32.mrb[122].mxu1  ;;  %3952 = vmax.xlane.f32.xlu0 %v3951_v62 }
0x1ce9   :  { %v5459_v2 = vpop.f32.mrb[123].mxu1  ;;  %v3954_v3 = vsel %vm342_vm2, %v3946_v55, -inf }
0x1cea   :  { %3955 = vmax.xlane.f32.xlu1 %v3954_v3  ;;  %v4814_v2 = vld [vmem:[%s6714_s12 + $0x1] ss:$0 sm:$0xff] }
0x1d75   :  { %v3953_v4 = vpop.xlane.xlu0 %3952 }
0x1d76   :  { %v3957_v7 = vsub.f32 %v3900_v50, %v3953_v4 }
0x1d77   :  { %v3956_v6 = vpop.xlane.xlu1 %3955 }
0x1d78   :  { %v3959_v52 = vmul.f32 1.442695, %v3957_v7  ;;  %v3958_v33 = vsub.f32 %v3946_v55, %v3956_v6 }
0x1d7a   :  { %5652 = vpow2.f32 %v3959_v52  ;;  %v3961_v8 = vmul.f32 1.442695, %v3958_v33  ;;  %v4815_v52 = vld [vmem:[%s6715_s13 + $0x1] ss:$0 sm:$0xff] }
0x1d7c   :  { %5654 = vpow2.f32 %v3961_v8 }
0x1d84   :  { %v5653_v38 = vpop.eup %5652 }
0x1d85   :  { %v3963_v32 = vsel %vm342_vm2, %v5653_v38, 0.0  ;;  %v3971_v9 = vpack.c.bf16 %v5653_v38, %v5653_v38 }
0x1d86   :  { %v5655_v10 = vpop.eup %5654  ;;  %3964 = vadd.xlane.f32.xlu0 %v3963_v32 }
0x1d87   :  { %5463 = vmatmul.mubr.msk.bf16.vlgmr.msra.gmra.mrb[128].mxu0 %vm342_vm2, %v3971_v9  ;;  %v3966_v43 = vsel %vm342_vm2, %v5655_v10, 0.0  ;;  %v3972_v11 = vpack.c.bf16 %v5655_v10, %v5655_v10  ;;  %v5572_v9 = vld [vmem:[%s6716_s16 + $0x20] sm:$0xff]   ;;  %v5573_v10 = vld [vmem:[%s6716_s16 + $0x28] sm:$0xff]  }
0x1d88   :  { %3967 = vadd.xlane.f32.xlu1 %v3966_v43  ;;  %5474 = vmatprep.mubr.msk.bf16.mxu0 %vm5679_vm1, %v5678_v15  ;;  %v5574_v43 = vld [vmem:[%s6716_s16 + $0x30] sm:$0xff]  }
0x1d89   :  { %5469 = vmatmul.mubr.msk.bf16.vlgmr.msra.gmra.mrb[124].mxu1 %vm342_vm2, %v3972_v11  ;;  %5473 = vmatpush3.bf16.msra.mxu0 %v4074_v13  ;;  %v5575_v11 = vld [vmem:[%s6716_s16 + $0x38] sm:$0xff]  }
0x1d8a   :  { %5482 = vmatprep.mubr.msk.bf16.mxu1 %vm5679_vm1, %v5678_v15  ;;  %5486 = vmatprep.subr.bf16.mxu0 %v5678_v15 }
0x1e13   :  { %v3965_v14 = vpop.xlane.xlu0 %3964 }
0x1e14   :  { %5656 = vrcp.f32 %v3965_v14 }
0x1e15   :  { %v3968_v16 = vpop.xlane.xlu1 %3967 }
0x1e16   :  { %5658 = vrcp.f32 %v3968_v16 }
0x1e1e   :  { %v5657_v1 = vpop.eup %5656 }
0x1e20   :  { %v5659_v18 = vpop.eup %5658 }
0x1e5a   :  { %v4013_v60 = vpop.f32.mrb[128].mxu0 }
0x1e5b   :  { %v5464_v17 = vpop.f32.mrb[129].mxu0  ;;  %v4065_v61 = vmul.f32 %v5657_v1, %v4013_v60 }
0x1e5c   :  { %v4016_v19 = vpop.f32.mrb[130].mxu0  ;;  %v4059_v21 = vpop.f32.mrb[124].mxu1 }
0x1e5d   :  { %v4066_v23 = vmul.f32 %v5659_v18, %v4059_v21  ;;  %v5465_v42 = vpop.f32.mrb[131].mxu0  ;;  %v5470_v24 = vpop.f32.mrb[125].mxu1 }
0x1e5e   :  { %v4062_v25 = vpop.f32.mrb[126].mxu1 }
0x1e5f   :  { %v4067_v0 = vpack.c.bf16 %v4066_v23, %v4065_v61  ;;  %v5471_v27 = vpop.f32.mrb[127].mxu1 }
0x1e61   :  { %5475 = vmatmul.mubr.msk.bf16.vlgmr.msra.gmra.mrb[132].mxu0 %vm342_vm2, %v4067_v0 }
0x1e62   :  { %5494 = vmatprep.mubr.msk.bf16.mxu0 %vm5679_vm1, %v5678_v15  ;;  %5487 = vmatpush3.bf16.msra.mxu0 %v5572_v9 }
0x1e63   :  { %5488 = vmatprep.subr.bf16.mxu0 %v5678_v15 }
0x1e66   :  { %5489 = vmatpush3.bf16.msra.mxu0 %v5573_v10 }
0x1e67   :  { %5490 = vmatprep.subr.bf16.mxu0 %v5678_v15 }
0x1e6a   :  { %5491 = vmatpush3.bf16.msra.mxu0 %v5574_v43  ;;  %v4843_v43 = vld [vmem:[%s6720_s19 + $0x1] ss:$0 sm:$0xff] }
0x1e6b   :  { %5492 = vmatprep.subr.bf16.mxu0 %v5678_v15 }
0x1e6e   :  { %5493 = vmatpush3.bf16.msra.mxu0 %v5575_v11 }
0x1f34   :  { %v4110_v34 = vpop.f32.mrb[132].mxu0 }
0x1f35   :  { %v4117_v28 = vadd.f32 %v4110_v34, %v6562_v20  ;;  %v5476_v30 = vpop.f32.mrb[133].mxu0 }
0x1f36   :  { %v4113_v36 = vpop.f32.mrb[134].mxu0 }
0x1f37   :  { %v4127_v31 = vadd.f32 %v4811_v59, %v4117_v28  ;;  %v4118_v35 = vadd.f32 %v4113_v36, %v6565_v22  ;;  %v5477_v37 = vpop.f32.mrb[135].mxu0 }
0x1f39   :  { %v4128_v40 = vadd.f32 %v4811_v59, %v4118_v35  ;;  %v4129_v41 = vadd.f32 %v4127_v31, %v6266_v56 }
0x1f3b   :  { %v4135_v44 = vsel %vm84_vm0, %v4129_v41, 0.0  ;;  %v4130_v45 = vadd.f32 %v4128_v40, %v6268_v57  ;;  %v5570_v57 = vld [vmem:[%s6713_s14 + $0x10] sm:$0xff]  }
0x1f3c   :  { %4136 = vadd.xlane.f32.xlu0 %v4135_v44  ;;  %5479 = vmatpush3.bf16.msra.mxu1 %v5570_v57 }
0x1f3d   :  { %v4138_v46 = vsel %vm84_vm0, %v4130_v45, 0.0  ;;  %5480 = vmatprep.subr.bf16.mxu1 %v5678_v15 }
0x1f3e   :  { %4139 = vadd.xlane.f32.xlu1 %v4138_v46 }
0x1f40   :  { %5481 = vmatpush3.bf16.msra.mxu1 %v5571_v51 }
0x1f41   :  { %5498 = vmatprep.subr.bf16.mxu1 %v5678_v15 }
0x1fc9   :  { %v4137_v26 = vpop.xlane.xlu0 %4136 }
0x1fca   :  { %v4141_v47 = vmul.f32 0.03125, %v4137_v26 }
0x1fcb   :  { %v4140_v20 = vpop.xlane.xlu1 %4139 }
0x1fcc   :  { %v4143_v29 = vsub.f32 %v4129_v41, %v4141_v47  ;;  %v4142_v5 = vmul.f32 0.03125, %v4140_v20  ;;  %v4834_v41 = vld [vmem:[%s6718_s17 + $0x1] ss:$0 sm:$0xff] }
0x1fce   :  { %v4144_v48 = vsub.f32 %v4130_v45, %v4142_v5  ;;  %v4145_v49 = vmul.f32 %v4143_v29, %v4143_v29 }
0x1fd0   :  { %v4147_v22 = vsel %vm84_vm0, %v4145_v49, 0.0  ;;  %v4146_v50 = vmul.f32 %v4144_v48, %v4144_v48 }
0x1fd1   :  { %4148 = vadd.xlane.f32.xlu0 %v4147_v22 }
0x1fd2   :  { %v4150_v56 = vsel %vm84_vm0, %v4146_v50, 0.0 }
0x1fd3   :  { %4151 = vadd.xlane.f32.xlu1 %v4150_v56 }
0x205e   :  { %v4149_v53 = vpop.xlane.xlu0 %4148 }
0x205f   :  { %v4153_v54 = vmul.f32 0.03125, %v4149_v53 }
0x2060   :  { %v4152_v55 = vpop.xlane.xlu1 %4151 }
0x2061   :  { %v4155_v39 = vadd.f32 1e-12, %v4153_v54  ;;  %v4154_v58 = vmul.f32 0.03125, %v4152_v55 }
0x2063   :  { %5660 = vrsqrt.f32 %v4155_v39  ;;  %v4156_v62 = vadd.f32 1e-12, %v4154_v58 }
0x2065   :  { %5662 = vrsqrt.f32 %v4156_v62  ;;  %v5576_v62 = vld [vmem:[%s6721_s20] sm:$0xff]  }
0x206d   :  { %v5661_v63 = vpop.eup %5660 }
0x206e   :  { %v4159_v3 = vmul.f32 %v5661_v63, %v4143_v29  ;;  %v5577_v63 = vld [vmem:[%s6721_s20 + $0x8] sm:$0xff]  }
0x206f   :  { %v5663_v4 = vpop.eup %5662 }
0x2070   :  { %v4167_v7 = vmul.f32 %v4814_v2, %v4159_v3  ;;  %v4160_v6 = vmul.f32 %v5663_v4, %v4144_v48 }
0x2072   :  { %v4168_v33 = vmul.f32 %v4814_v2, %v4160_v6  ;;  %v4175_v8 = vadd.f32 %v4815_v52, %v4167_v7 }
0x2074   :  { %v4176_v38 = vadd.f32 %v4815_v52, %v4168_v33 }
0x2076   :  { %v4177_v32 = vpack.c.bf16 %v4176_v38, %v4175_v8 }
0x2078   :  { %5483 = vmatmul.mubr.msk.bf16.vlgmr.msra.gmra.mrb[128].mxu1 %vm84_vm0, %v4177_v32 }
0x2079   :  { %5502 = vmatprep.mubr.msk.bf16.mxu1 %vm5679_vm1, %v5678_v15  ;;  %5499 = vmatpush3.bf16.msra.mxu1 %v5576_v62 }
0x207a   :  { %5500 = vmatprep.subr.bf16.mxu1 %v5678_v15 }
0x207d   :  { %5501 = vmatpush3.bf16.msra.mxu1 %v5577_v63 }
0x207e   :  { %5506 = vmatprep.subr.bf16.mxu1 %v5678_v15 }
0x214b   :  { %v4240_v13 = vpop.f32.mrb[128].mxu1 }
0x214c   :  { %v4241_v14 = vadd.f32 %v4821_v12, %v4240_v13  ;;  %v5484_v16 = vpop.f32.mrb[129].mxu1 }
0x214d   :  { %v4243_v60 = vpop.f32.mrb[130].mxu1  ;;  %v5578_v16 = vld [vmem:[%s6722_s22] sm:$0xff]  }
0x214e   :  { %v4247_v1 = vmul.f32 %v4241_v14, %v4241_v14  ;;  %v4244_v17 = vadd.f32 %v4821_v12, %v4243_v60  ;;  %v5485_v18 = vpop.f32.mrb[131].mxu1  ;;  %v5579_v60 = vld [vmem:[%s6722_s22 + $0x8] sm:$0xff]  }
0x2150   :  { %v4249_v19 = vmul.f32 %v4247_v1, %v4241_v14  ;;  %v4248_v21 = vmul.f32 %v4244_v17, %v4244_v17  ;;  %v4844_v1 = vld [vmem:[%s6723_s21] ss:$0 sm:$0xff] }
0x2152   :  { %v4251_v61 = vmul.f32 0.044715, %v4249_v19  ;;  %v4250_v23 = vmul.f32 %v4248_v21, %v4244_v17 }
0x2154   :  { %v4253_v42 = vadd.f32 %v4251_v61, %v4241_v14  ;;  %v4252_v24 = vmul.f32 0.044715, %v4250_v23 }
0x2156   :  { %v4255_v25 = vmul.f32 0.7978846, %v4253_v42  ;;  %v4254_v0 = vadd.f32 %v4252_v24, %v4244_v17 }
0x2158   :  { %5664 = vtanh.f32 %v4255_v25  ;;  %v4256_v27 = vmul.f32 0.7978846, %v4254_v0 }
0x215a   :  { %5666 = vtanh.f32 %v4256_v27 }
0x2162   :  { %v5665_v34 = vpop.eup %5664 }
0x2163   :  { %v4259_v59 = vadd.f32 1.0, %v5665_v34 }
0x2164   :  { %v5667_v28 = vpop.eup %5666 }
0x2165   :  { %v4261_v30 = vmul.f32 0.5, %v4259_v59  ;;  %v4260_v36 = vadd.f32 1.0, %v5667_v28 }
0x2167   :  { %v4262_v31 = vmul.f32 0.5, %v4260_v36  ;;  %v4263_v35 = vmul.f32 %v4261_v30, %v4241_v14 }
0x2169   :  { %v4264_v37 = vmul.f32 %v4262_v31, %v4244_v17 }
0x216b   :  { %v4265_v40 = vpack.c.bf16 %v4264_v37, %v4263_v35 }
0x216d   :  { %5495 = vmatmul.mubr.msk.bf16.vlgmr.msra.gmra.mrb[136].mxu0 %vm2172_vm4, %v4265_v40 }
0x2240   :  { %v4344_v44 = vpop.f32.mrb[136].mxu0 }
0x2241   :  { %v4345_v45 = vadd.f32 %v4834_v41, %v4344_v44  ;;  %v5496_v46 = vpop.f32.mrb[137].mxu0 }
0x2242   :  { %v4347_v26 = vpop.f32.mrb[138].mxu0 }
0x2243   :  { %v4348_v47 = vadd.f32 %v4834_v41, %v4347_v26  ;;  %v5497_v20 = vpop.f32.mrb[139].mxu0  ;;  %v4351_v29 = vadd.f32 %v4345_v45, %v4175_v8  ;;  %v4842_v8 = vld [vmem:[%s6719_s18 + $0x1] ss:$0 sm:$0xff] }
0x2245   :  { %v4357_v5 = vsel %vm84_vm0, %v4351_v29, 0.0  ;;  %v4352_v48 = vadd.f32 %v4348_v47, %v4176_v38 }
0x2246   :  { %4358 = vadd.xlane.f32.xlu0 %v4357_v5 }
0x2247   :  { %v4360_v49 = vsel %vm84_vm0, %v4352_v48, 0.0 }
0x2248   :  { %4361 = vadd.xlane.f32.xlu1 %v4360_v49 }
0x22d3   :  { %v4359_v22 = vpop.xlane.xlu0 %4358 }
0x22d4   :  { %v4363_v50 = vmul.f32 0.03125, %v4359_v22 }
0x22d5   :  { %v4362_v56 = vpop.xlane.xlu1 %4361 }
0x22d6   :  { %v4365_v57 = vsub.f32 %v4351_v29, %v4363_v50  ;;  %v4364_v51 = vmul.f32 0.03125, %v4362_v56 }
0x22d8   :  { %v4366_v53 = vsub.f32 %v4352_v48, %v4364_v51  ;;  %v4367_v54 = vmul.f32 %v4365_v57, %v4365_v57 }
0x22da   :  { %v4369_v55 = vsel %vm84_vm0, %v4367_v54, 0.0  ;;  %v4368_v39 = vmul.f32 %v4366_v53, %v4366_v53 }
0x22db   :  { %4370 = vadd.xlane.f32.xlu0 %v4369_v55 }
0x22dc   :  { %v4372_v58 = vsel %vm84_vm0, %v4368_v39, 0.0 }
0x22dd   :  { %4373 = vadd.xlane.f32.xlu1 %v4372_v58 }
0x2368   :  { %v4371_v2 = vpop.xlane.xlu0 %4370 }
0x2369   :  { %v4375_v3 = vmul.f32 0.03125, %v4371_v2 }
0x236a   :  { %v4374_v4 = vpop.xlane.xlu1 %4373 }
0x236b   :  { %v4377_v7 = vadd.f32 1e-12, %v4375_v3  ;;  %v4376_v6 = vmul.f32 0.03125, %v4374_v4 }
0x236d   :  { %5668 = vrsqrt.f32 %v4377_v7  ;;  %v4378_v52 = vadd.f32 1e-12, %v4376_v6 }
0x236f   :  { %5670 = vrsqrt.f32 %v4378_v52 }
0x2377   :  { %v5669_v33 = vpop.eup %5668 }
0x2378   :  { %v4381_v38 = vmul.f32 %v5669_v33, %v4365_v57 }
0x2379   :  { %v5671_v32 = vpop.eup %5670 }
0x237a   :  { %v4389_v9 = vmul.f32 %v4842_v8, %v4381_v38  ;;  %v4382_v10 = vmul.f32 %v5671_v32, %v4366_v53 }
0x237c   :  { %v4390_v11 = vmul.f32 %v4842_v8, %v4382_v10  ;;  %v4397_v12 = vadd.f32 %v4843_v43, %v4389_v9 }
0x237e   :  { %v4398_v13 = vadd.f32 %v4843_v43, %v4390_v11 }
0x2380   :  { %v4399_v14 = vpack.c.bf16 %v4398_v13, %v4397_v12 }
0x2382   :  { %5503 = vmatmul.mubr.msk.bf16.vlgmr.msra.gmra.mrb[132].mxu1 %vm84_vm0, %v4399_v14 }
0x2383   :  { %5510 = vmatprep.mubr.msk.bf16.mxu1 %vm5679_vm1, %v5678_v15  ;;  %5507 = vmatpush3.bf16.msra.mxu1 %v5578_v16 }
0x2384   :  { %5508 = vmatprep.subr.bf16.mxu1 %v5678_v15  ;;  %v4848_v15 = vld [vmem:[%s6724_s23] ss:$0 sm:$0xff] }
0x2387   :  { %5509 = vmatpush3.bf16.msra.mxu1 %v5579_v60 }
0x2455   :  { %v4460_v17 = vpop.f32.mrb[132].mxu1 }
0x2456   :  { %v4461_v18 = vadd.f32 %v4844_v1, %v4460_v17  ;;  %v5504_v19 = vpop.f32.mrb[133].mxu1 }
0x2457   :  { %v4463_v21 = vpop.f32.mrb[134].mxu1 }
0x2458   :  { %v4464_v61 = vadd.f32 %v4844_v1, %v4463_v21  ;;  %v5505_v23 = vpop.f32.mrb[135].mxu1  ;;  %5672 = vtanh.f32 %v4461_v18 }
0x245a   :  { %5674 = vtanh.f32 %v4464_v61 }
0x2462   :  { %v5673_v42 = vpop.eup %5672 }
0x2464   :  { %v5675_v24 = vpop.eup %5674 }
0x2465   :  { %v4469_v25 = vpack.c.bf16 %v5675_v24, %v5673_v42 }
0x2467   :  { %5511 = vmatmul.mubr.msk.bf16.vlgmr.msra.gmra.mrb[136].mxu1 %vm84_vm0, %v4469_v25 }
0x253a   :  { %v4530_v0 = vpop.f32.mrb[136].mxu1 }
0x253b   :  { %v4531_v27 = vadd.f32 %v4848_v15, %v4530_v0  ;;  %v5512_v34 = vpop.f32.mrb[137].mxu1 }
0x253c   :  { %v4533_v59 = vpop.f32.mrb[138].mxu1 }
0x253d   :  { %4537 = vst [vmem:[%s6725_s24] sm:$0xff] %v4531_v27  ;;  %v4534_v28 = vadd.f32 %v4848_v15, %v4533_v59  ;;  %v5513_v30 = vpop.f32.mrb[139].mxu1 }
0x253f   :  { %4538 = vst [vmem:[%s6725_s24 + $0x8] sm:$0xff] %v4534_v28 }

</bundles_post_ra>
